<compile_context>
chip_gen: v7x
topology: tpu7x:2x2x1
jax: 0.10.0
libtpu: 0.0.40
codegen_flags: <defaults>
</compile_context>

<pallas_src>
import functools

import jax
import jax.numpy as jnp
from jax.experimental import pallas as pl
from jax.experimental.pallas import tpu as pltpu


LANE = 128  # final logits padded to a lane-dense store


def _round_up(x, m):
    return ((x + m - 1) // m) * m


# ----------------------------------------------------------------------------
# Fused forward kernel: one grid step == B_TILE samples, everything 2-D.
# ----------------------------------------------------------------------------
def _acdann_fused_kernel(x_ref, w1e_ref, w1o_ref, b1_ref, w2_ref, b2_ref,
                         w3_ref, b3_ref, wfc_ref, bfc_ref,
                         wc1_ref, bc1_ref, wc2_ref, bc2_ref, o_ref, *, win):
    f32 = jnp.float32
    bf16 = jnp.bfloat16

    xb = x_ref[...].astype(bf16)                                  # (B, L)

    # --- Conv1d(1,16,9)+BN+ReLU+MaxPool1d(2,2): two dense matmuls + max -----
    even = jnp.dot(xb, w1e_ref[...], preferred_element_type=f32)  # (B, l2*16)
    odd = jnp.dot(xb, w1o_ref[...], preferred_element_type=f32)
    h1 = jnp.maximum(jnp.maximum(even, odd) + b1_ref[...], 0.0)   # (B, l2*16)

    # --- Conv1d(16,32,3)+BN+ReLU: single dense matmul ------------------------
    h2 = jnp.dot(h1.astype(bf16), w2_ref[...], preferred_element_type=f32)
    h2 = jnp.maximum(h2 + b2_ref[...], 0.0)                       # (B, l3*32)

    # --- Conv1d(32,64,3)+BN+ReLU: single dense matmul ------------------------
    h3 = jnp.dot(h2.astype(bf16), w3_ref[...], preferred_element_type=f32)
    h3 = jnp.maximum(h3 + b3_ref[...], 0.0)                       # (B, l4*64)

    # --- AdaptiveMaxPool1d(8): max over `win` contiguous 64-lane blocks ------
    C = 64
    pooled_blocks = []
    for l in range(8):
        blk = h3[:, (l * win) * C:(l * win + 1) * C]
        for k in range(1, win):
            s = (l * win + k) * C
            blk = jnp.maximum(blk, h3[:, s:s + C])
        pooled_blocks.append(blk)
    # (B, 512), column = l*64 + c; channel-major Flatten folded into wfc.
    pooled = jnp.concatenate(pooled_blocks, axis=-1).astype(bf16)

    # --- Linear(512,256)+ReLU -------------------------------------------------
    feat = jnp.dot(pooled, wfc_ref[...], preferred_element_type=f32)
    feat = jnp.maximum(feat + bfc_ref[...], 0.0)                  # (B, 256)

    # --- clf: Linear(256,256)+ReLU, Linear(256, num_classes padded to 128) ---
    z = jnp.dot(feat.astype(bf16), wc1_ref[...], preferred_element_type=f32)
    z = jnp.maximum(z + bc1_ref[...], 0.0)                        # (B, 256)
    logits = jnp.dot(z.astype(bf16), wc2_ref[...], preferred_element_type=f32)
    o_ref[...] = (logits + bc2_ref[...]).astype(o_ref.dtype)      # (B, LANE)


# ----------------------------------------------------------------------------
# Parameter construction: BN folded, convs packed as dense banded matrices.
# ----------------------------------------------------------------------------
def _fold_bn(w, b, gamma, beta, mean, var, eps=1e-5):
    """Fold eval-mode BatchNorm1d into the preceding Conv1d weight/bias."""
    s = gamma / jnp.sqrt(var + eps)          # (Cout,)
    return w * s[:, None, None], b * s + (beta - mean * s)


def _conv_dense(w_kio, l_in, l_out, stride=1, offset=0):
    """Pack a Conv1d weight (K, Cin, Cout) as a dense (l_in*Cin, l_out*Cout)
    matrix so that  out[:, t*Cout + co] = sum_{k,ci} in[:, (t*stride+offset+k)*Cin + ci] * w[k,ci,co]."""
    K, Ci, Co = w_kio.shape
    M = jnp.zeros((l_in * Ci, l_out * Co), jnp.float32)
    for t in range(l_out):
        for k in range(K):
            p = t * stride + offset + k
            M = M.at[p * Ci:(p + 1) * Ci, t * Co:(t + 1) * Co].set(w_kio[k])
    return M


def make_params(key, num_classes=3, length=64):
    assert num_classes <= LANE
    L = length
    l1 = L - 8
    assert l1 % 2 == 0, "Conv1+MaxPool path requires even (L - 8)"
    l2 = l1 // 2
    l3 = l2 - 2
    l4 = l3 - 2
    assert l4 % 8 == 0, "AdaptiveMaxPool1d(8) path requires uniform windows"

    ks = list(jax.random.split(key, 32))
    kit = iter(ks)

    def nrm(shape, scale=0.1):
        return scale * jax.random.normal(next(kit), shape, dtype=jnp.float32)

    p = {}

    # conv1: Conv1d(1, 16, 9) + BN(16); even/odd pooling phases packed densely.
    w1 = nrm((16, 1, 9)); b1 = nrm((16,))
    g1 = 1.0 + nrm((16,)); bt1 = nrm((16,)); m1 = nrm((16,)); v1 = 0.5 + jnp.abs(nrm((16,)))
    w1f, b1f = _fold_bn(w1, b1, g1, bt1, m1, v1)
    w1k = jnp.transpose(w1f, (2, 1, 0))                               # (9, 1, 16)
    p["w1e"] = _conv_dense(w1k, L, l2, stride=2, offset=0).astype(jnp.bfloat16)  # (L, l2*16)
    p["w1o"] = _conv_dense(w1k, L, l2, stride=2, offset=1).astype(jnp.bfloat16)
    p["b1"] = jnp.tile(b1f, l2).reshape(1, l2 * 16)

    # conv2: Conv1d(16, 32, 3) + BN(32) as dense (l2*16, l3*32)
    w2 = nrm((32, 16, 3)); b2 = nrm((32,))
    g2 = 1.0 + nrm((32,)); bt2 = nrm((32,)); m2 = nrm((32,)); v2 = 0.5 + jnp.abs(nrm((32,)))
    w2f, b2f = _fold_bn(w2, b2, g2, bt2, m2, v2)
    p["w2"] = _conv_dense(jnp.transpose(w2f, (2, 1, 0)), l2, l3).astype(jnp.bfloat16)
    p["b2"] = jnp.tile(b2f, l3).reshape(1, l3 * 32)

    # conv3: Conv1d(32, 64, 3) + BN(64) as dense (l3*32, l4*64)
    w3 = nrm((64, 32, 3)); b3 = nrm((64,))
    g3 = 1.0 + nrm((64,)); bt3 = nrm((64,)); m3 = nrm((64,)); v3 = 0.5 + jnp.abs(nrm((64,)))
    w3f, b3f = _fold_bn(w3, b3, g3, bt3, m3, v3)
    p["w3"] = _conv_dense(jnp.transpose(w3f, (2, 1, 0)), l3, l4).astype(jnp.bfloat16)
    p["b3"] = jnp.tile(b3f, l4).reshape(1, l4 * 64)

    # Linear(8*64, 256): torch weight (256, 512), flatten index = c*8 + l.
    # Our pooled layout has column = l*64 + c -> fold the permutation here.
    w_fc = nrm((256, 512)); b_fc = nrm((256,))
    p["w_fc"] = (jnp.transpose(w_fc.reshape(256, 64, 8), (2, 1, 0))
                 .reshape(512, 256).astype(jnp.bfloat16))             # (512, 256)
    p["b_fc"] = b_fc.reshape(1, 256)

    # clf: Linear(256,256), Linear(256,num_classes) (transposed; last layer
    # zero-padded to 128 output lanes for a dense store).
    w_c1 = nrm((256, 256)); b_c1 = nrm((256,))
    p["w_c1"] = jnp.transpose(w_c1, (1, 0)).astype(jnp.bfloat16)       # (256, 256)
    p["b_c1"] = b_c1.reshape(1, 256)

    w_c2 = nrm((num_classes, 256)); b_c2 = nrm((num_classes,))
    w_c2t = jnp.transpose(w_c2, (1, 0))                                # (256, nc)
    p["w_c2"] = (jnp.zeros((256, LANE), jnp.float32)
                 .at[:, :num_classes].set(w_c2t).astype(jnp.bfloat16))  # (256, 128)
    p["b_c2"] = jnp.zeros((1, LANE), jnp.float32).at[0, :num_classes].set(b_c2)
    return p


def _pick_batch_tile(n, block_b):
    """Multiple-of-8 batch tile; prefers >= 2 grid steps (v7x has 2 TCs)."""
    bt = _round_up(min(block_b, max((n + 1) // 2, 1)), 8)
    return min(bt, _round_up(n, 8))


# ----------------------------------------------------------------------------
# Forward pass (eval branch of ACDANN.forward) -- one fused pallas_call
# ----------------------------------------------------------------------------
@functools.partial(jax.jit, static_argnames=("num_classes", "block_b"))
def acdann_forward(target_data, params, num_classes=3, block_b=128):
    """target_data: (N, 1, L) float32 (NCL, like the PyTorch module)."""
    N, cin, L = target_data.shape
    assert cin == 1, "this kernel build assumes in_channel == 1"
    l1 = L - 8
    assert l1 % 2 == 0
    l2 = l1 // 2
    l3 = l2 - 2
    l4 = l3 - 2
    assert l4 % 8 == 0, "AdaptiveMaxPool1d(8) path requires uniform windows"
    win = l4 // 8
    assert params["w1e"].shape == (L, l2 * 16), "params built for another length"

    bt = _pick_batch_tile(N, block_b)
    n_pad = _round_up(N, bt)
    grid = (n_pad // bt,)

    x = target_data.astype(jnp.float32).reshape(N, L)
    if n_pad != N:
        x = jnp.pad(x, ((0, n_pad - N), (0, 0)))

    kernel = functools.partial(_acdann_fused_kernel, win=win)
    rep = lambda i: (0, 0)  # resident weights: block index never changes
    out = pl.pallas_call(
        kernel,
        out_shape=jax.ShapeDtypeStruct((n_pad, LANE), jnp.float32),
        grid=grid,
        in_specs=[
            pl.BlockSpec((bt, L), lambda i: (i, 0)),            # x (batch tile)
            pl.BlockSpec((L, l2 * 16), rep),                    # w1 even phase
            pl.BlockSpec((L, l2 * 16), rep),                    # w1 odd phase
            pl.BlockSpec((1, l2 * 16), rep),                    # b1 (tiled)
            pl.BlockSpec((l2 * 16, l3 * 32), rep),              # w2 dense
            pl.BlockSpec((1, l3 * 32), rep),                    # b2
            pl.BlockSpec((l3 * 32, l4 * 64), rep),              # w3 dense
            pl.BlockSpec((1, l4 * 64), rep),                    # b3
            pl.BlockSpec((512, 256), rep),                      # w_fc (reordered)
            pl.BlockSpec((1, 256), rep),                        # b_fc
            pl.BlockSpec((256, 256), rep),                      # w_c1
            pl.BlockSpec((1, 256), rep),                        # b_c1
            pl.BlockSpec((256, LANE), rep),                     # w_c2 (padded)
            pl.BlockSpec((1, LANE), rep),                       # b_c2 (padded)
        ],
        out_specs=pl.BlockSpec((bt, LANE), lambda i: (i, 0)),
        compiler_params=pltpu.CompilerParams(
            dimension_semantics=("parallel",),
            vmem_limit_bytes=32 * 1024 * 1024),
    )(x, params["w1e"], params["w1o"], params["b1"], params["w2"], params["b2"],
      params["w3"], params["b3"], params["w_fc"], params["b_fc"],
      params["w_c1"], params["b_c1"], params["w_c2"], params["b_c2"])

    return out[:N, :num_classes]


# ----------------------------------------------------------------------------
if __name__ == "__main__":
    key = jax.random.PRNGKey(0)
    k_param, k_data = jax.random.split(key)

    params = make_params(k_param, num_classes=3, length=64)

    # target_data: (batch=2, in_channel=1, length=64) -- NCL like PyTorch.
    target_data = jax.random.normal(k_data, (2, 1, 64), dtype=jnp.float32)

    logits = acdann_forward(target_data, params, num_classes=3)
    logits = jax.block_until_ready(logits)

    assert logits.shape == (2, 3), logits.shape
    assert bool(jnp.all(jnp.isfinite(logits)))
    print("KERNEL_OK")
</pallas_src>

<mosaic_0001>
module attributes {stable_mosaic.version = 11 : i64} {
  func.func @_acdann_fused_kernel(%arg0: i32, %arg1: memref<8x64xf32, #tpu.memory_space<vmem>>, %arg2: memref<64x448xbf16, #tpu.memory_space<vmem>>, %arg3: memref<64x448xbf16, #tpu.memory_space<vmem>>, %arg4: memref<1x448xf32, #tpu.memory_space<vmem>>, %arg5: memref<448x832xbf16, #tpu.memory_space<vmem>>, %arg6: memref<1x832xf32, #tpu.memory_space<vmem>>, %arg7: memref<832x1536xbf16, #tpu.memory_space<vmem>>, %arg8: memref<1x1536xf32, #tpu.memory_space<vmem>>, %arg9: memref<512x256xbf16, #tpu.memory_space<vmem>>, %arg10: memref<1x256xf32, #tpu.memory_space<vmem>>, %arg11: memref<256x256xbf16, #tpu.memory_space<vmem>>, %arg12: memref<1x256xf32, #tpu.memory_space<vmem>>, %arg13: memref<256x128xbf16, #tpu.memory_space<vmem>>, %arg14: memref<1x128xf32, #tpu.memory_space<vmem>>, %arg15: memref<8x128xf32, #tpu.memory_space<vmem>>) attributes {dimension_semantics = [#tpu.dimension_semantics<parallel>], iteration_bounds = array<i64: 1>, scalar_prefetch = 0 : i64, scratch_operands = 0 : i64, tpu.core_type = #tpu.core_type<tc>, window_params = [{transform_indices = @transform_0, window_bounds = array<i64: 8, 64>}, {pipeline_mode = #tpu.pipeline_mode<synchronous>, transform_indices = @transform_1, window_bounds = array<i64: 64, 448>}, {pipeline_mode = #tpu.pipeline_mode<synchronous>, transform_indices = @transform_2, window_bounds = array<i64: 64, 448>}, {pipeline_mode = #tpu.pipeline_mode<synchronous>, transform_indices = @transform_3, window_bounds = array<i64: 1, 448>}, {pipeline_mode = #tpu.pipeline_mode<synchronous>, transform_indices = @transform_4, window_bounds = array<i64: 448, 832>}, {pipeline_mode = #tpu.pipeline_mode<synchronous>, transform_indices = @transform_5, window_bounds = array<i64: 1, 832>}, {pipeline_mode = #tpu.pipeline_mode<synchronous>, transform_indices = @transform_6, window_bounds = array<i64: 832, 1536>}, {pipeline_mode = #tpu.pipeline_mode<synchronous>, transform_indices = @transform_7, window_bounds = array<i64: 1, 1536>}, {pipeline_mode = #tpu.pipeline_mode<synchronous>, transform_indices = @transform_8, window_bounds = array<i64: 512, 256>}, {pipeline_mode = #tpu.pipeline_mode<synchronous>, transform_indices = @transform_9, window_bounds = array<i64: 1, 256>}, {pipeline_mode = #tpu.pipeline_mode<synchronous>, transform_indices = @transform_10, window_bounds = array<i64: 256, 256>}, {pipeline_mode = #tpu.pipeline_mode<synchronous>, transform_indices = @transform_11, window_bounds = array<i64: 1, 256>}, {pipeline_mode = #tpu.pipeline_mode<synchronous>, transform_indices = @transform_12, window_bounds = array<i64: 256, 128>}, {pipeline_mode = #tpu.pipeline_mode<synchronous>, transform_indices = @transform_13, window_bounds = array<i64: 1, 128>}, {transform_indices = @transform_14, window_bounds = array<i64: 8, 128>}]} {
    %c0 = arith.constant 0 : index
    %c0_0 = arith.constant 0 : index
    %0 = vector.load %arg1[%c0, %c0_0] : memref<8x64xf32, #tpu.memory_space<vmem>>, vector<8x64xf32>
    %1 = arith.truncf %0 : vector<8x64xf32> to vector<8x64xbf16>
    %c0_1 = arith.constant 0 : index
    %c0_2 = arith.constant 0 : index
    %2 = vector.load %arg2[%c0_1, %c0_2] : memref<64x448xbf16, #tpu.memory_space<vmem>>, vector<64x448xbf16>
    %cst = arith.constant dense<0.000000e+00> : vector<8x448xf32>
    %3 = tpu.matmul %1, %2, %cst {dimension_numbers = #tpu.dot_dimension_numbers<[1], [0], [0], [1], [0, 0, 1, 1], [], []>} : vector<8x64xbf16>, vector<64x448xbf16>, vector<8x448xf32> -> vector<8x448xf32>
    %c0_3 = arith.constant 0 : index
    %c0_4 = arith.constant 0 : index
    %4 = vector.load %arg3[%c0_3, %c0_4] : memref<64x448xbf16, #tpu.memory_space<vmem>>, vector<64x448xbf16>
    %cst_5 = arith.constant dense<0.000000e+00> : vector<8x448xf32>
    %5 = tpu.matmul %1, %4, %cst_5 {dimension_numbers = #tpu.dot_dimension_numbers<[1], [0], [0], [1], [0, 0, 1, 1], [], []>} : vector<8x64xbf16>, vector<64x448xbf16>, vector<8x448xf32> -> vector<8x448xf32>
    %6 = arith.maximumf %3, %5 : vector<8x448xf32>
    %c0_6 = arith.constant 0 : index
    %c0_7 = arith.constant 0 : index
    %7 = vector.load %arg4[%c0_6, %c0_7] : memref<1x448xf32, #tpu.memory_space<vmem>>, vector<1x448xf32>
    %8 = vector.broadcast %7 : vector<1x448xf32> to vector<8x448xf32>
    %9 = arith.addf %6, %8 : vector<8x448xf32>
    %cst_8 = arith.constant 0.000000e+00 : f32
    %10 = vector.broadcast %cst_8 : f32 to vector<8x448xf32>
    %11 = arith.maximumf %9, %10 : vector<8x448xf32>
    %12 = arith.truncf %11 : vector<8x448xf32> to vector<8x448xbf16>
    %c0_9 = arith.constant 0 : index
    %c0_10 = arith.constant 0 : index
    %13 = vector.load %arg5[%c0_9, %c0_10] : memref<448x832xbf16, #tpu.memory_space<vmem>>, vector<448x832xbf16>
    %cst_11 = arith.constant dense<0.000000e+00> : vector<8x832xf32>
    %14 = tpu.matmul %12, %13, %cst_11 {dimension_numbers = #tpu.dot_dimension_numbers<[1], [0], [0], [1], [0, 0, 1, 1], [], []>} : vector<8x448xbf16>, vector<448x832xbf16>, vector<8x832xf32> -> vector<8x832xf32>
    %c0_12 = arith.constant 0 : index
    %c0_13 = arith.constant 0 : index
    %15 = vector.load %arg6[%c0_12, %c0_13] : memref<1x832xf32, #tpu.memory_space<vmem>>, vector<1x832xf32>
    %16 = vector.broadcast %15 : vector<1x832xf32> to vector<8x832xf32>
    %17 = arith.addf %14, %16 : vector<8x832xf32>
    %cst_14 = arith.constant 0.000000e+00 : f32
    %18 = vector.broadcast %cst_14 : f32 to vector<8x832xf32>
    %19 = arith.maximumf %17, %18 : vector<8x832xf32>
    %20 = arith.truncf %19 : vector<8x832xf32> to vector<8x832xbf16>
    %c0_15 = arith.constant 0 : index
    %c0_16 = arith.constant 0 : index
    %21 = vector.load %arg7[%c0_15, %c0_16] : memref<832x1536xbf16, #tpu.memory_space<vmem>>, vector<832x1536xbf16>
    %cst_17 = arith.constant dense<0.000000e+00> : vector<8x1536xf32>
    %22 = tpu.matmul %20, %21, %cst_17 {dimension_numbers = #tpu.dot_dimension_numbers<[1], [0], [0], [1], [0, 0, 1, 1], [], []>} : vector<8x832xbf16>, vector<832x1536xbf16>, vector<8x1536xf32> -> vector<8x1536xf32>
    %c0_18 = arith.constant 0 : index
    %c0_19 = arith.constant 0 : index
    %23 = vector.load %arg8[%c0_18, %c0_19] : memref<1x1536xf32, #tpu.memory_space<vmem>>, vector<1x1536xf32>
    %24 = vector.broadcast %23 : vector<1x1536xf32> to vector<8x1536xf32>
    %25 = arith.addf %22, %24 : vector<8x1536xf32>
    %cst_20 = arith.constant 0.000000e+00 : f32
    %26 = vector.broadcast %cst_20 : f32 to vector<8x1536xf32>
    %27 = arith.maximumf %25, %26 : vector<8x1536xf32>
    %28 = vector.extract_strided_slice %27 {offsets = [0, 0], sizes = [8, 64], strides = [1, 1]} : vector<8x1536xf32> to vector<8x64xf32>
    %29 = vector.extract_strided_slice %27 {offsets = [0, 64], sizes = [8, 64], strides = [1, 1]} : vector<8x1536xf32> to vector<8x64xf32>
    %30 = arith.maximumf %28, %29 : vector<8x64xf32>
    %31 = vector.extract_strided_slice %27 {offsets = [0, 128], sizes = [8, 64], strides = [1, 1]} : vector<8x1536xf32> to vector<8x64xf32>
    %32 = arith.maximumf %30, %31 : vector<8x64xf32>
    %33 = vector.extract_strided_slice %27 {offsets = [0, 192], sizes = [8, 64], strides = [1, 1]} : vector<8x1536xf32> to vector<8x64xf32>
    %34 = vector.extract_strided_slice %27 {offsets = [0, 256], sizes = [8, 64], strides = [1, 1]} : vector<8x1536xf32> to vector<8x64xf32>
    %35 = arith.maximumf %33, %34 : vector<8x64xf32>
    %36 = vector.extract_strided_slice %27 {offsets = [0, 320], sizes = [8, 64], strides = [1, 1]} : vector<8x1536xf32> to vector<8x64xf32>
    %37 = arith.maximumf %35, %36 : vector<8x64xf32>
    %38 = vector.extract_strided_slice %27 {offsets = [0, 384], sizes = [8, 64], strides = [1, 1]} : vector<8x1536xf32> to vector<8x64xf32>
    %39 = vector.extract_strided_slice %27 {offsets = [0, 448], sizes = [8, 64], strides = [1, 1]} : vector<8x1536xf32> to vector<8x64xf32>
    %40 = arith.maximumf %38, %39 : vector<8x64xf32>
    %41 = vector.extract_strided_slice %27 {offsets = [0, 512], sizes = [8, 64], strides = [1, 1]} : vector<8x1536xf32> to vector<8x64xf32>
    %42 = arith.maximumf %40, %41 : vector<8x64xf32>
    %43 = vector.extract_strided_slice %27 {offsets = [0, 576], sizes = [8, 64], strides = [1, 1]} : vector<8x1536xf32> to vector<8x64xf32>
    %44 = vector.extract_strided_slice %27 {offsets = [0, 640], sizes = [8, 64], strides = [1, 1]} : vector<8x1536xf32> to vector<8x64xf32>
    %45 = arith.maximumf %43, %44 : vector<8x64xf32>
    %46 = vector.extract_strided_slice %27 {offsets = [0, 704], sizes = [8, 64], strides = [1, 1]} : vector<8x1536xf32> to vector<8x64xf32>
    %47 = arith.maximumf %45, %46 : vector<8x64xf32>
    %48 = vector.extract_strided_slice %27 {offsets = [0, 768], sizes = [8, 64], strides = [1, 1]} : vector<8x1536xf32> to vector<8x64xf32>
    %49 = vector.extract_strided_slice %27 {offsets = [0, 832], sizes = [8, 64], strides = [1, 1]} : vector<8x1536xf32> to vector<8x64xf32>
    %50 = arith.maximumf %48, %49 : vector<8x64xf32>
    %51 = vector.extract_strided_slice %27 {offsets = [0, 896], sizes = [8, 64], strides = [1, 1]} : vector<8x1536xf32> to vector<8x64xf32>
    %52 = arith.maximumf %50, %51 : vector<8x64xf32>
    %53 = vector.extract_strided_slice %27 {offsets = [0, 960], sizes = [8, 64], strides = [1, 1]} : vector<8x1536xf32> to vector<8x64xf32>
    %54 = vector.extract_strided_slice %27 {offsets = [0, 1024], sizes = [8, 64], strides = [1, 1]} : vector<8x1536xf32> to vector<8x64xf32>
    %55 = arith.maximumf %53, %54 : vector<8x64xf32>
    %56 = vector.extract_strided_slice %27 {offsets = [0, 1088], sizes = [8, 64], strides = [1, 1]} : vector<8x1536xf32> to vector<8x64xf32>
    %57 = arith.maximumf %55, %56 : vector<8x64xf32>
    %58 = vector.extract_strided_slice %27 {offsets = [0, 1152], sizes = [8, 64], strides = [1, 1]} : vector<8x1536xf32> to vector<8x64xf32>
    %59 = vector.extract_strided_slice %27 {offsets = [0, 1216], sizes = [8, 64], strides = [1, 1]} : vector<8x1536xf32> to vector<8x64xf32>
    %60 = arith.maximumf %58, %59 : vector<8x64xf32>
    %61 = vector.extract_strided_slice %27 {offsets = [0, 1280], sizes = [8, 64], strides = [1, 1]} : vector<8x1536xf32> to vector<8x64xf32>
    %62 = arith.maximumf %60, %61 : vector<8x64xf32>
    %63 = vector.extract_strided_slice %27 {offsets = [0, 1344], sizes = [8, 64], strides = [1, 1]} : vector<8x1536xf32> to vector<8x64xf32>
    %64 = vector.extract_strided_slice %27 {offsets = [0, 1408], sizes = [8, 64], strides = [1, 1]} : vector<8x1536xf32> to vector<8x64xf32>
    %65 = arith.maximumf %63, %64 : vector<8x64xf32>
    %66 = vector.extract_strided_slice %27 {offsets = [0, 1472], sizes = [8, 64], strides = [1, 1]} : vector<8x1536xf32> to vector<8x64xf32>
    %67 = arith.maximumf %65, %66 : vector<8x64xf32>
    %68 = tpu.concatenate %32, %37, %42, %47, %52, %57, %62, %67 in 1 : vector<8x64xf32>, vector<8x64xf32>, vector<8x64xf32>, vector<8x64xf32>, vector<8x64xf32>, vector<8x64xf32>, vector<8x64xf32>, vector<8x64xf32> -> vector<8x512xf32>
    %69 = arith.truncf %68 : vector<8x512xf32> to vector<8x512xbf16>
    %c0_21 = arith.constant 0 : index
    %c0_22 = arith.constant 0 : index
    %70 = vector.load %arg9[%c0_21, %c0_22] : memref<512x256xbf16, #tpu.memory_space<vmem>>, vector<512x256xbf16>
    %cst_23 = arith.constant dense<0.000000e+00> : vector<8x256xf32>
    %71 = tpu.matmul %69, %70, %cst_23 {dimension_numbers = #tpu.dot_dimension_numbers<[1], [0], [0], [1], [0, 0, 1, 1], [], []>} : vector<8x512xbf16>, vector<512x256xbf16>, vector<8x256xf32> -> vector<8x256xf32>
    %c0_24 = arith.constant 0 : index
    %c0_25 = arith.constant 0 : index
    %72 = vector.load %arg10[%c0_24, %c0_25] : memref<1x256xf32, #tpu.memory_space<vmem>>, vector<1x256xf32>
    %73 = vector.broadcast %72 : vector<1x256xf32> to vector<8x256xf32>
    %74 = arith.addf %71, %73 : vector<8x256xf32>
    %cst_26 = arith.constant 0.000000e+00 : f32
    %75 = vector.broadcast %cst_26 : f32 to vector<8x256xf32>
    %76 = arith.maximumf %74, %75 : vector<8x256xf32>
    %77 = arith.truncf %76 : vector<8x256xf32> to vector<8x256xbf16>
    %c0_27 = arith.constant 0 : index
    %c0_28 = arith.constant 0 : index
    %78 = vector.load %arg11[%c0_27, %c0_28] : memref<256x256xbf16, #tpu.memory_space<vmem>>, vector<256x256xbf16>
    %cst_29 = arith.constant dense<0.000000e+00> : vector<8x256xf32>
    %79 = tpu.matmul %77, %78, %cst_29 {dimension_numbers = #tpu.dot_dimension_numbers<[1], [0], [0], [1], [0, 0, 1, 1], [], []>} : vector<8x256xbf16>, vector<256x256xbf16>, vector<8x256xf32> -> vector<8x256xf32>
    %c0_30 = arith.constant 0 : index
    %c0_31 = arith.constant 0 : index
    %80 = vector.load %arg12[%c0_30, %c0_31] : memref<1x256xf32, #tpu.memory_space<vmem>>, vector<1x256xf32>
    %81 = vector.broadcast %80 : vector<1x256xf32> to vector<8x256xf32>
    %82 = arith.addf %79, %81 : vector<8x256xf32>
    %cst_32 = arith.constant 0.000000e+00 : f32
    %83 = vector.broadcast %cst_32 : f32 to vector<8x256xf32>
    %84 = arith.maximumf %82, %83 : vector<8x256xf32>
    %85 = arith.truncf %84 : vector<8x256xf32> to vector<8x256xbf16>
    %c0_33 = arith.constant 0 : index
    %c0_34 = arith.constant 0 : index
    %86 = vector.load %arg13[%c0_33, %c0_34] : memref<256x128xbf16, #tpu.memory_space<vmem>>, vector<256x128xbf16>
    %cst_35 = arith.constant dense<0.000000e+00> : vector<8x128xf32>
    %87 = tpu.matmul %85, %86, %cst_35 {dimension_numbers = #tpu.dot_dimension_numbers<[1], [0], [0], [1], [0, 0, 1, 1], [], []>} : vector<8x256xbf16>, vector<256x128xbf16>, vector<8x128xf32> -> vector<8x128xf32>
    %c0_36 = arith.constant 0 : index
    %c0_37 = arith.constant 0 : index
    %88 = vector.load %arg14[%c0_36, %c0_37] : memref<1x128xf32, #tpu.memory_space<vmem>>, vector<1x128xf32>
    %89 = vector.broadcast %88 : vector<1x128xf32> to vector<8x128xf32>
    %90 = arith.addf %87, %89 : vector<8x128xf32>
    %c0_38 = arith.constant 0 : index
    %c0_39 = arith.constant 0 : index
    %91 = vector.load %arg15[%c0_38, %c0_39] : memref<8x128xf32, #tpu.memory_space<vmem>>, vector<8x128xf32>
    tpu.vector_store %arg15[%c0_38, %c0_39], %90 {strides = array<i32>} : memref<8x128xf32, #tpu.memory_space<vmem>>, vector<8x128xf32>,
    return
  }
  func.func @transform_0(%arg0: i32) -> (i32, i32) {
    %c0_i32 = arith.constant 0 : i32
    %c0_i32_0 = arith.constant 0 : i32
    return %arg0, %c0_i32 : i32, i32
  }
  func.func @transform_1(%arg0: i32) -> (i32, i32) {
    %c0_i32 = arith.constant 0 : i32
    %c0_i32_0 = arith.constant 0 : i32
    %c0_i32_1 = arith.constant 0 : i32
    return %c0_i32, %c0_i32_0 : i32, i32
  }
  func.func @transform_2(%arg0: i32) -> (i32, i32) {
    %c0_i32 = arith.constant 0 : i32
    %c0_i32_0 = arith.constant 0 : i32
    %c0_i32_1 = arith.constant 0 : i32
    return %c0_i32, %c0_i32_0 : i32, i32
  }
  func.func @transform_3(%arg0: i32) -> (i32, i32) {
    %c0_i32 = arith.constant 0 : i32
    %c0_i32_0 = arith.constant 0 : i32
    %c0_i32_1 = arith.constant 0 : i32
    return %c0_i32, %c0_i32_0 : i32, i32
  }
  func.func @transform_4(%arg0: i32) -> (i32, i32) {
    %c0_i32 = arith.constant 0 : i32
    %c0_i32_0 = arith.constant 0 : i32
    %c0_i32_1 = arith.constant 0 : i32
    return %c0_i32, %c0_i32_0 : i32, i32
  }
  func.func @transform_5(%arg0: i32) -> (i32, i32) {
    %c0_i32 = arith.constant 0 : i32
    %c0_i32_0 = arith.constant 0 : i32
    %c0_i32_1 = arith.constant 0 : i32
    return %c0_i32, %c0_i32_0 : i32, i32
  }
  func.func @transform_6(%arg0: i32) -> (i32, i32) {
    %c0_i32 = arith.constant 0 : i32
    %c0_i32_0 = arith.constant 0 : i32
    %c0_i32_1 = arith.constant 0 : i32
    return %c0_i32, %c0_i32_0 : i32, i32
  }
  func.func @transform_7(%arg0: i32) -> (i32, i32) {
    %c0_i32 = arith.constant 0 : i32
    %c0_i32_0 = arith.constant 0 : i32
    %c0_i32_1 = arith.constant 0 : i32
    return %c0_i32, %c0_i32_0 : i32, i32
  }
  func.func @transform_8(%arg0: i32) -> (i32, i32) {
    %c0_i32 = arith.constant 0 : i32
    %c0_i32_0 = arith.constant 0 : i32
    %c0_i32_1 = arith.constant 0 : i32
    return %c0_i32, %c0_i32_0 : i32, i32
  }
  func.func @transform_9(%arg0: i32) -> (i32, i32) {
    %c0_i32 = arith.constant 0 : i32
    %c0_i32_0 = arith.constant 0 : i32
    %c0_i32_1 = arith.constant 0 : i32
    return %c0_i32, %c0_i32_0 : i32, i32
  }
  func.func @transform_10(%arg0: i32) -> (i32, i32) {
    %c0_i32 = arith.constant 0 : i32
    %c0_i32_0 = arith.constant 0 : i32
    %c0_i32_1 = arith.constant 0 : i32
    return %c0_i32, %c0_i32_0 : i32, i32
  }
  func.func @transform_11(%arg0: i32) -> (i32, i32) {
    %c0_i32 = arith.constant 0 : i32
    %c0_i32_0 = arith.constant 0 : i32
    %c0_i32_1 = arith.constant 0 : i32
    return %c0_i32, %c0_i32_0 : i32, i32
  }
  func.func @transform_12(%arg0: i32) -> (i32, i32) {
    %c0_i32 = arith.constant 0 : i32
    %c0_i32_0 = arith.constant 0 : i32
    %c0_i32_1 = arith.constant 0 : i32
    return %c0_i32, %c0_i32_0 : i32, i32
  }
  func.func @transform_13(%arg0: i32) -> (i32, i32) {
    %c0_i32 = arith.constant 0 : i32
    %c0_i32_0 = arith.constant 0 : i32
    %c0_i32_1 = arith.constant 0 : i32
    return %c0_i32, %c0_i32_0 : i32, i32
  }
  func.func @transform_14(%arg0: i32) -> (i32, i32) {
    %c0_i32 = arith.constant 0 : i32
    %c0_i32_0 = arith.constant 0 : i32
    return %arg0, %c0_i32 : i32, i32
  }
}

</mosaic_0001>

<bundles_post_ra>
// kernel: acdann_forward.1
= control target key start
LH: loop header
LB: loop body
LE: loop exit
PB: predicated region body
PF: predicated region fallthrough
CT: control target
= control target key end

     0   :  { %19 = vsyncpa [#allocation3], 0  ;;  %s11496_s0 = inlined_call_operand.vmem [shape: f32[8,64], index: 0, kind: input, shape index: {}]   ;;  %s11497_s1 = inlined_call_operand.hbm [shape: bf16[64,448], index: 1, kind: input, shape index: {}]   ;;  %s11498_s2 = inlined_call_operand.hbm [shape: bf16[64,448], index: 2, kind: input, shape index: {}]   ;;  %s11499_s3 = inlined_call_operand.hbm [shape: f32[1,448], index: 3, kind: input, shape index: {}]   ;;  %s11500_s4 = inlined_call_operand.hbm [shape: bf16[448,832], index: 4, kind: input, shape index: {}]   ;;  %s11501_s5 = inlined_call_operand.hbm [shape: f32[1,832], index: 5, kind: input, shape index: {}]   ;;  %s11502_s6 = inlined_call_operand.hbm [shape: bf16[832,1536], index: 6, kind: input, shape index: {}]   ;;  %s11503_s7 = inlined_call_operand.hbm [shape: f32[1,1536], index: 7, kind: input, shape index: {}]   ;;  %s11504_s8 = inlined_call_operand.hbm [shape: bf16[512,256], index: 8, kind: input, shape index: {}]   ;;  %s11505_s9 = inlined_call_operand.hbm [shape: f32[1,256], index: 9, kind: input, shape index: {}]   ;;  %s11506_s10 = inlined_call_operand.hbm [shape: bf16[256,256], index: 10, kind: input, shape index: {}]   ;;  %s11507_s11 = inlined_call_operand.hbm [shape: f32[1,256], index: 11, kind: input, shape index: {}]   ;;  %s11508_s12 = inlined_call_operand.hbm [shape: bf16[256,128], index: 12, kind: input, shape index: {}]   ;;  %s11509_s13 = inlined_call_operand.hbm [shape: f32[1,128], index: 13, kind: input, shape index: {}]   ;;  %s11510_s14 = inlined_call_operand.vmem [shape: f32[8,128], index: 14, kind: output, shape index: {}]  }
   0x1   :  { %20 = vsyncpa [#allocation5], 0 }
   0x2   :  { %21 = vsyncpa [#allocation8], 0 }
   0x3   :  { %22 = vsyncpa [#allocation11], 0 }
   0x4   :  { %23 = vsyncpa [#allocation14], 0 }
   0x5   :  { %24 = vsyncpa [#allocation17], 0 }
   0x6   :  { %25 = vsyncpa [#allocation20], 0  ;;  %s10904_s29 = smov [#allocation4]   ;;  %s10905_s15 = smov [#allocation7]  }
   0x7   :  { %s45_s30 = sshll.u32 %s10904_s29, 4  ;;  %s67_s16 = sshll.u32 %s10905_s15, 4  ;;  %s46_s30 = int_to_ptr.vmem [resolvable:$true] %s45_s30  ;;  %s11003_s16 = int_to_ptr.vmem [resolvable:$true] %s67_s16 }
   0x8   :  { %s10604_s19 = scalar_lea.hbm %s11498_s2, 2048 }
   0x9   :  { %p10605_p0 = scmp.ne.s32.totalorder %s11498_s2, %s10604_s19  ;;  %p10608_p1 = scmp.lt.u32.totalorder %s10604_s19, %s11498_s2 }
   0xb   :  { %p10610_p2 = pnand %p10608_p1, %p10605_p0 }
   0xd   :  { %10613 = shalt.err (!%p10610_p2)
}
   0xe   :  { %s10614_s24 = scalar_lea.vmem %s46_s30, 2048  ;;  %p10619_p4 = scmp.lt.s32.totalorder %s46_s30, %s46_s30 }
   0xf   :  { %p10615_p3 = scmp.ne.s32.totalorder %s46_s30, %s10614_s24  ;;  %p10620_p5 = scmp.lt.s32.totalorder %s10614_s24, %s10614_s24 }
  0x11   :  { %p10621_p6 = por %p10620_p5, %p10619_p4 }
  0x13   :  { %p10622_p7 = pnand %p10621_p6, %p10615_p3 }
  0x15   :  { %10625 = shalt.err (!%p10622_p7)
}
  0x16   :  { %s10906_s25 = smov 256   ;;  %s10907_s26 = smov 16  }
  0x17   :  { %51 = dma.hbm_to_vmem [thread:$0]  %s11498_s2, 2048, %s46_s30, [#allocation5], %s10906_s25, %s10906_s25, %s10907_s26  }
  0x18   :  { %s10626_s17 = scalar_lea.hbm %s11500_s4, 25088 }
  0x19   :  { %p10627_p8 = scmp.ne.s32.totalorder %s11500_s4, %s10626_s17  ;;  %p10630_p9 = scmp.lt.u32.totalorder %s10626_s17, %s11500_s4 }
  0x1b   :  { %p10632_p10 = pnand %p10630_p9, %p10627_p8 }
  0x1d   :  { %10635 = shalt.err (!%p10632_p10)
}
  0x1e   :  { %s10636_s22 = scalar_lea.vmem %s11003_s16, 25088  ;;  %p10641_p12 = scmp.lt.s32.totalorder %s11003_s16, %s11003_s16 }
  0x1f   :  { %p10637_p11 = scmp.ne.s32.totalorder %s11003_s16, %s10636_s22  ;;  %p10642_p13 = scmp.lt.s32.totalorder %s10636_s22, %s10636_s22 }
  0x21   :  { %p10643_p0 = por %p10642_p13, %p10641_p12 }
  0x23   :  { %p10644_p1 = pnand %p10643_p0, %p10637_p11 }
  0x25   :  { %10647 = shalt.err (!%p10644_p1)
}
  0x26   :  { %s10908_s2 = smov 448   ;;  %s10909_s30 = smov 28  }
  0x27   :  { %73 = dma.hbm_to_vmem [thread:$0]  %s11500_s4, 25088, %s11003_s16, [#allocation8], %s10908_s2, %s10908_s2, %s10909_s30  }
  0x28   :  { %s10910_s27 = smov [#allocation10]   ;;  %s10648_s17 = scalar_lea.hbm %s11502_s6, 79872 }
  0x29   :  { %s89_s28 = sshll.u32 %s10910_s27, 4  ;;  %p10649_p2 = scmp.ne.s32.totalorder %s11502_s6, %s10648_s17  ;;  %s90_s28 = int_to_ptr.vmem [resolvable:$true] %s89_s28 }
  0x2a   :  { %p10652_p3 = scmp.lt.u32.totalorder %s10648_s17, %s11502_s6 }
  0x2c   :  { %p10654_p4 = pnand %p10652_p3, %p10649_p2 }
  0x2e   :  { %10657 = shalt.err (!%p10654_p4)
}
  0x2f   :  { %s10658_s22 = scalar_lea.vmem %s90_s28, 79872  ;;  %p10663_p6 = scmp.lt.s32.totalorder %s90_s28, %s90_s28 }
  0x30   :  { %p10659_p5 = scmp.ne.s32.totalorder %s90_s28, %s10658_s22  ;;  %p10664_p7 = scmp.lt.s32.totalorder %s10658_s22, %s10658_s22 }
  0x32   :  { %p10665_p8 = por %p10664_p7, %p10663_p6 }
  0x34   :  { %p10666_p9 = pnand %p10665_p8, %p10659_p5 }
  0x36   :  { %10669 = shalt.err (!%p10666_p9)
}
  0x37   :  { %s10911_s4 = smov 768   ;;  %s10912_s16 = smov 48  }
  0x38   :  { %95 = dma.hbm_to_vmem [thread:$0]  %s11502_s6, 79872, %s90_s28, [#allocation11], %s10911_s4, %s10911_s4, %s10912_s16  }
  0x39   :  { %s10913_s23 = smov [#allocation13]   ;;  %s10670_s15 = scalar_lea.hbm %s11504_s8, 8192 }
  0x3a   :  { %s111_s24 = sshll.u32 %s10913_s23, 4  ;;  %p10671_p10 = scmp.ne.s32.totalorder %s11504_s8, %s10670_s15  ;;  %s112_s24 = int_to_ptr.vmem [resolvable:$true] %s111_s24 }
  0x3b   :  { %p10674_p11 = scmp.lt.u32.totalorder %s10670_s15, %s11504_s8 }
  0x3d   :  { %p10676_p12 = pnand %p10674_p11, %p10671_p10 }
  0x3f   :  { %10679 = shalt.err (!%p10676_p12)
}
  0x40   :  { %s10680_s21 = scalar_lea.vmem %s112_s24, 8192  ;;  %p10685_p0 = scmp.lt.s32.totalorder %s112_s24, %s112_s24 }
  0x41   :  { %p10681_p13 = scmp.ne.s32.totalorder %s112_s24, %s10680_s21  ;;  %p10686_p1 = scmp.lt.s32.totalorder %s10680_s21, %s10680_s21 }
  0x43   :  { %p10687_p2 = por %p10686_p1, %p10685_p0 }
  0x45   :  { %p10688_p3 = pnand %p10687_p2, %p10681_p13 }
  0x47   :  { %10691 = shalt.err (!%p10688_p3)
}
  0x48   :  { %s10914_s6 = smov 128   ;;  %s10915_s28 = smov 8  }
  0x49   :  { %117 = dma.hbm_to_vmem [thread:$0]  %s11504_s8, 8192, %s112_s24, [#allocation14], %s10914_s6, %s10914_s6, %s10915_s28  }
  0x4a   :  { %s10916_s16 = smov [#allocation16]   ;;  %s10917_s30 = smov [#allocation19]  }
  0x4b   :  { %s133_s2 = sshll.u32 %s10916_s16, 4  ;;  %s155_s23 = sshll.u32 %s10917_s30, 4  ;;  %s134_s2 = int_to_ptr.vmem [resolvable:$true] %s133_s2  ;;  %s11061_s23 = int_to_ptr.vmem [resolvable:$true] %s155_s23 }
  0x4c   :  { %s10692_s15 = scalar_lea.hbm %s11506_s10, 4096 }
  0x4d   :  { %p10693_p4 = scmp.ne.s32.totalorder %s11506_s10, %s10692_s15  ;;  %p10696_p5 = scmp.lt.u32.totalorder %s10692_s15, %s11506_s10 }
  0x4f   :  { %p10698_p6 = pnand %p10696_p5, %p10693_p4 }
  0x51   :  { %10701 = shalt.err (!%p10698_p6)
}
  0x52   :  { %s10702_s8 = scalar_lea.vmem %s134_s2, 4096  ;;  %p10707_p8 = scmp.lt.s32.totalorder %s134_s2, %s134_s2 }
  0x53   :  { %p10703_p7 = scmp.ne.s32.totalorder %s134_s2, %s10702_s8  ;;  %p10708_p9 = scmp.lt.s32.totalorder %s10702_s8, %s10702_s8 }
  0x55   :  { %p10709_p10 = por %p10708_p9, %p10707_p8 }
  0x57   :  { %p10710_p11 = pnand %p10709_p10, %p10703_p7 }
  0x59   :  { %10713 = shalt.err (!%p10710_p11)
}
  0x5a   :  { %139 = dma.hbm_to_vmem [thread:$0]  %s11506_s10, 4096, %s134_s2, [#allocation17], %s10914_s6, %s10914_s6, %s10915_s28  }
  0x5b   :  { %s10714_s16 = scalar_lea.hbm %s11508_s12, 2048 }
  0x5c   :  { %p10715_p12 = scmp.ne.s32.totalorder %s11508_s12, %s10714_s16  ;;  %p10718_p13 = scmp.lt.u32.totalorder %s10714_s16, %s11508_s12 }
  0x5e   :  { %p10720_p0 = pnand %p10718_p13, %p10715_p12 }
  0x60   :  { %10723 = shalt.err (!%p10720_p0)
}
  0x61   :  { %s10724_s17 = scalar_lea.vmem %s11061_s23, 2048  ;;  %p10729_p2 = scmp.lt.s32.totalorder %s11061_s23, %s11061_s23 }
  0x62   :  { %p10725_p1 = scmp.ne.s32.totalorder %s11061_s23, %s10724_s17  ;;  %p10730_p3 = scmp.lt.s32.totalorder %s10724_s17, %s10724_s17 }
  0x64   :  { %p10731_p4 = por %p10730_p3, %p10729_p2 }
  0x66   :  { %p10732_p5 = pnand %p10731_p4, %p10725_p1 }
  0x68   :  { %10735 = shalt.err (!%p10732_p5)
}
  0x69   :  { %s10918_s10 = smov 64   ;;  %s10919_s6 = smov 4  }
  0x6a   :  { %161 = dma.hbm_to_vmem [thread:$0]  %s11508_s12, 2048, %s11061_s23, [#allocation20], %s10918_s10, %s10918_s10, %s10919_s6  }
  0x6b   :  { %s10920_s18 = smov [#allocation2]   ;;  %s10921_s20 = smov [#allocation6]  }
  0x6c   :  { %s33_s19 = sshll.u32 %s10920_s18, 4  ;;  %s58_s8 = sshll.u32 %s10921_s20, 4  ;;  %s34_s19 = int_to_ptr.vmem [resolvable:$true] %s33_s19  ;;  %s59_s8 = int_to_ptr.vmem [resolvable:$true] %s58_s8 }
  0x6d   :  { %s10736_s22 = scalar_lea.hbm %s11497_s1, 2048 }
  0x6e   :  { %p10737_p6 = scmp.ne.s32.totalorder %s11497_s1, %s10736_s22  ;;  %p10740_p7 = scmp.lt.u32.totalorder %s10736_s22, %s11497_s1 }
  0x70   :  { %p10742_p8 = pnand %p10740_p7, %p10737_p6 }
  0x72   :  { %10745 = shalt.err (!%p10742_p8)
}
  0x73   :  { %s10746_s12 = scalar_lea.vmem %s34_s19, 2048  ;;  %p10751_p10 = scmp.lt.s32.totalorder %s34_s19, %s34_s19 }
  0x74   :  { %p10747_p9 = scmp.ne.s32.totalorder %s34_s19, %s10746_s12  ;;  %p10752_p11 = scmp.lt.s32.totalorder %s10746_s12, %s10746_s12 }
  0x76   :  { %p10753_p12 = por %p10752_p11, %p10751_p10 }
  0x78   :  { %p10754_p13 = pnand %p10753_p12, %p10747_p9 }
  0x7a   :  { %10757 = shalt.err (!%p10754_p13)
}
  0x7b   :  { %39 = dma.hbm_to_vmem [thread:$0]  %s11497_s1, 2048, %s34_s19, [#allocation3], %s10906_s25, %s10906_s25, %s10907_s26  }
  0x7c   :  { %s10758_s6 = scalar_lea.hbm %s11499_s3, 64 }
  0x7d   :  { %p10759_p0 = scmp.ne.s32.totalorder %s11499_s3, %s10758_s6  ;;  %p10762_p1 = scmp.lt.u32.totalorder %s10758_s6, %s11499_s3 }
  0x7f   :  { %p10764_p2 = pnand %p10762_p1, %p10759_p0 }
  0x81   :  { %10767 = shalt.err (!%p10764_p2)
}
  0x82   :  { %s10768_s24 = scalar_lea.vmem %s59_s8, 64  ;;  %p10773_p4 = scmp.lt.s32.totalorder %s59_s8, %s59_s8 }
  0x83   :  { %p10769_p3 = scmp.ne.s32.totalorder %s59_s8, %s10768_s24  ;;  %p10774_p5 = scmp.lt.s32.totalorder %s10768_s24, %s10768_s24 }
  0x85   :  { %p10775_p6 = por %p10774_p5, %p10773_p4 }
  0x87   :  { %p10776_p7 = pnand %p10775_p6, %p10769_p3 }
  0x89   :  { %10779 = shalt.err (!%p10776_p7)
}
  0x8a   :  { %61 = dma.hbm_to_vmem [thread:$0]  %s11499_s3, 64, %s59_s8, [#allocation5]  }
  0x8b   :  { %s10922_s26 = smov [#allocation9]   ;;  %s10923_s21 = smov [#allocation12]  }
  0x8c   :  { %s80_s19 = sshll.u32 %s10922_s26, 4  ;;  %s102_s22 = sshll.u32 %s10923_s21, 4  ;;  %s81_s19 = int_to_ptr.vmem [resolvable:$true] %s80_s19  ;;  %s103_s22 = int_to_ptr.vmem [resolvable:$true] %s102_s22 }
  0x8d   :  { %s10780_s30 = scalar_lea.hbm %s11501_s5, 112 }
  0x8e   :  { %p10781_p8 = scmp.ne.s32.totalorder %s11501_s5, %s10780_s30  ;;  %p10784_p9 = scmp.lt.u32.totalorder %s10780_s30, %s11501_s5 }
  0x90   :  { %p10786_p10 = pnand %p10784_p9, %p10781_p8 }
  0x92   :  { %10789 = shalt.err (!%p10786_p10)
}
  0x93   :  { %s10790_s3 = scalar_lea.vmem %s81_s19, 112  ;;  %s10794_s8 = scalar_lea.vmem %s81_s19, 128 }
  0x94   :  { %p10791_p11 = scmp.ne.s32.totalorder %s81_s19, %s10790_s3  ;;  %p10795_p12 = scmp.lt.s32.totalorder %s81_s19, %s81_s19 }
  0x95   :  { %p10796_p13 = scmp.lt.s32.totalorder %s10794_s8, %s10790_s3 }
  0x97   :  { %p10797_p0 = por %p10796_p13, %p10795_p12 }
  0x99   :  { %p10798_p1 = pnand %p10797_p0, %p10791_p11 }
  0x9b   :  { %10801 = shalt.err (!%p10798_p1)
}
  0x9c   :  { %83 = dma.hbm_to_vmem [thread:$0]  %s11501_s5, 112, %s81_s19, [#allocation8]  }
  0x9d   :  { %s10802_s2 = scalar_lea.hbm %s11503_s7, 192 }
  0x9e   :  { %p10803_p2 = scmp.ne.s32.totalorder %s11503_s7, %s10802_s2  ;;  %p10806_p3 = scmp.lt.u32.totalorder %s10802_s2, %s11503_s7 }
  0xa0   :  { %p10808_p4 = pnand %p10806_p3, %p10803_p2 }
  0xa2   :  { %10811 = shalt.err (!%p10808_p4)
}
  0xa3   :  { %s10812_s25 = scalar_lea.vmem %s103_s22, 192  ;;  %p10817_p6 = scmp.lt.s32.totalorder %s103_s22, %s103_s22 }
  0xa4   :  { %p10813_p5 = scmp.ne.s32.totalorder %s103_s22, %s10812_s25  ;;  %p10818_p7 = scmp.lt.s32.totalorder %s10812_s25, %s10812_s25 }
  0xa6   :  { %p10819_p8 = por %p10818_p7, %p10817_p6 }
  0xa8   :  { %p10820_p9 = pnand %p10819_p8, %p10813_p5 }
  0xaa   :  { %10823 = shalt.err (!%p10820_p9)
}
  0xab   :  { %105 = dma.hbm_to_vmem [thread:$0]  %s11503_s7, 192, %s103_s22, [#allocation11]  }
  0xac   :  { %s10924_s19 = smov [#allocation15]   ;;  %s10925_s4 = smov [#allocation18]  }
  0xad   :  { %s124_s21 = sshll.u32 %s10924_s19, 4  ;;  %s146_s16 = sshll.u32 %s10925_s4, 4  ;;  %s125_s21 = int_to_ptr.vmem [resolvable:$true] %s124_s21  ;;  %s147_s16 = int_to_ptr.vmem [resolvable:$true] %s146_s16 }
  0xae   :  { %s10824_s12 = scalar_lea.hbm %s11505_s9, 32 }
  0xaf   :  { %p10825_p10 = scmp.ne.s32.totalorder %s11505_s9, %s10824_s12  ;;  %p10828_p11 = scmp.lt.u32.totalorder %s10824_s12, %s11505_s9 }
  0xb1   :  { %p10830_p12 = pnand %p10828_p11, %p10825_p10 }
  0xb3   :  { %10833 = shalt.err (!%p10830_p12)
}
  0xb4   :  { %s10834_s7 = scalar_lea.vmem %s125_s21, 32  ;;  %p10839_p0 = scmp.lt.s32.totalorder %s125_s21, %s125_s21 }
  0xb5   :  { %p10835_p13 = scmp.ne.s32.totalorder %s125_s21, %s10834_s7  ;;  %p10840_p1 = scmp.lt.s32.totalorder %s10834_s7, %s10834_s7 }
  0xb7   :  { %p10841_p2 = por %p10840_p1, %p10839_p0 }
  0xb9   :  { %p10842_p3 = pnand %p10841_p2, %p10835_p13 }
  0xbb   :  { %10845 = shalt.err (!%p10842_p3)
}
  0xbc   :  { %127 = dma.hbm_to_vmem [thread:$0]  %s11505_s9, 32, %s125_s21, [#allocation14]  }
  0xbd   :  { %s10846_s28 = scalar_lea.hbm %s11507_s11, 32 }
  0xbe   :  { %p10847_p4 = scmp.ne.s32.totalorder %s11507_s11, %s10846_s28  ;;  %p10850_p5 = scmp.lt.u32.totalorder %s10846_s28, %s11507_s11 }
  0xc0   :  { %p10852_p6 = pnand %p10850_p5, %p10847_p4 }
  0xc2   :  { %10855 = shalt.err (!%p10852_p6)
}
  0xc3   :  { %s10856_s1 = scalar_lea.vmem %s147_s16, 32  ;;  %p10861_p8 = scmp.lt.s32.totalorder %s147_s16, %s147_s16 }
  0xc4   :  { %p10857_p7 = scmp.ne.s32.totalorder %s147_s16, %s10856_s1  ;;  %p10862_p9 = scmp.lt.s32.totalorder %s10856_s1, %s10856_s1 }
  0xc6   :  { %p10863_p10 = por %p10862_p9, %p10861_p8 }
  0xc8   :  { %p10864_p11 = pnand %p10863_p10, %p10857_p7 }
  0xca   :  { %10867 = shalt.err (!%p10864_p11)
}
  0xcb   :  { %149 = dma.hbm_to_vmem [thread:$0]  %s11507_s11, 32, %s147_s16, [#allocation17]  }
  0xcc   :  { %s10926_s5 = smov [#allocation21]   ;;  %s10868_s4 = scalar_lea.hbm %s11509_s13, 16 }
  0xcd   :  { %s168_s26 = sshll.u32 %s10926_s5, 4  ;;  %p10869_p12 = scmp.ne.s32.totalorder %s11509_s13, %s10868_s4  ;;  %s169_s26 = int_to_ptr.vmem [resolvable:$true] %s168_s26 }
  0xce   :  { %p10872_p13 = scmp.lt.u32.totalorder %s10868_s4, %s11509_s13 }
  0xd0   :  { %p10874_p0 = pnand %p10872_p13, %p10869_p12 }
  0xd2   :  { %10877 = shalt.err (!%p10874_p0)
}
  0xd3   :  { %s10878_s29 = scalar_lea.vmem %s169_s26, 16  ;;  %s10882_s11 = scalar_lea.vmem %s169_s26, 32 }
  0xd4   :  { %p10879_p1 = scmp.ne.s32.totalorder %s169_s26, %s10878_s29  ;;  %p10883_p2 = scmp.lt.s32.totalorder %s169_s26, %s169_s26 }
  0xd5   :  { %p10884_p3 = scmp.lt.s32.totalorder %s10882_s11, %s10878_s29 }
  0xd7   :  { %p10885_p4 = por %p10884_p3, %p10883_p2 }
  0xd9   :  { %p10886_p5 = pnand %p10885_p4, %p10879_p1 }
  0xdb   :  { %10889 = shalt.err (!%p10886_p5)
}
  0xdc   :  { %171 = dma.hbm_to_vmem [thread:$0]  %s11509_s13, 16, %s169_s26, [#allocation20]  }
  0xdd   :  { %10890 = dma.done.wait [#allocation3], 2048  }
  0xde   :  { %10891 = vsyncadd [#allocation3], 4294965248 }
  0xdf   :  { %10892 = dma.done.wait [#allocation5], 2112  }
  0xe0   :  { %10893 = vsyncadd [#allocation5], 4294965184 }
  0xe1   :  { %10894 = dma.done.wait [#allocation8], 25200  }
  0xe2   :  { %10895 = vsyncadd [#allocation8], 4294942096 }
  0xe3   :  { %10896 = dma.done.wait [#allocation11], 80064  }
  0xe4   :  { %10897 = vsyncadd [#allocation11], 4294887232 }
  0xe5   :  { %10898 = dma.done.wait [#allocation14], 8224  }
  0xe6   :  { %10899 = vsyncadd [#allocation14], 4294959072 }
  0xe7   :  { %10900 = dma.done.wait [#allocation17], 4128  }
  0xe8   :  { %10901 = vsyncadd [#allocation17], 4294963168 }
  0xe9   :  { %10902 = dma.done.wait [#allocation20], 2064  }
  0xea   :  { %10903 = vsyncadd [#allocation20], 4294965232  ;;  %v10927_v0 = vmov 0   ;;  %v9180_v1 = vld [vmem:[#allocation2 + $0x4] ss:$16 sps:$4 sm:$0xff]   ;;  %vm310_vm0 = vcmask 523264  }
  0xeb   :  { %346 = vmatprep.mubr.bf16.mxu0 %v10927_v0  ;;  %387 = vmatprep.mubr.bf16.mxu1 %v10927_v0  ;;  %v9182_v2 = vld [vmem:[#allocation2] ss:$16 sps:$4 sm:$0xff]   ;;  %v9183_v3 = vld [vmem:[#allocation2 + $0x24] ss:$16 sps:$4 sm:$0xff]   ;;  %v9204_v11 = vld [vmem:[#allocation2 + $0xc] ss:$16 sps:$4 sm:$0xff]  }
  0xec   :  { %314 = vmatprep.subr.bf16.mxu0 %v9180_v1  ;;  %v9185_v4 = vld [vmem:[#allocation2 + $0x20] ss:$16 sps:$4 sm:$0xff]   ;;  %v9186_v5 = vld [vmem:[#allocation2 + $0x44] ss:$16 sps:$4 sm:$0xff]   ;;  %v9206_v12 = vld [vmem:[#allocation2 + $0x8] ss:$16 sps:$4 sm:$0xff]   ;;  %355 = vmatprep.subr.bf16.mxu1 %v9204_v11 }
  0xed   :  { %315 = vmatpush1.bf16.msra.mxu0 %v9182_v2  ;;  %v9188_v6 = vld [vmem:[#allocation2 + $0x40] ss:$16 sps:$4 sm:$0xff]   ;;  %v9189_v7 = vld [vmem:[#allocation2 + $0x64] ss:$16 sps:$4 sm:$0xff]   ;;  %v9207_v13 = vld [vmem:[#allocation2 + $0x2c] ss:$16 sps:$4 sm:$0xff]   ;;  %356 = vmatpush1.bf16.msra.mxu1 %v9206_v12 }
  0xee   :  { %316 = vmatprep.subr.bf16.mxu0 %v9183_v3  ;;  %v9191_v8 = vld [vmem:[#allocation2 + $0x60] ss:$16 sps:$4 sm:$0xff]   ;;  %v9194_v10 = vld [vmem:[#allocation4 + $0x4] ss:$16 sps:$4 sm:$0xff]   ;;  %v9209_v16 = vld [vmem:[#allocation2 + $0x28] ss:$16 sps:$4 sm:$0xff]   ;;  %357 = vmatprep.subr.bf16.mxu1 %v9207_v13 }
  0xef   :  { %v212_v9 = vld [vmem:[%s11496_s0] sm:$0xff]  ;;  %v9210_v18 = vld [vmem:[#allocation2 + $0x4c] ss:$16 sps:$4 sm:$0xff]   ;;  %v9212_v20 = vld [vmem:[#allocation2 + $0x48] ss:$16 sps:$4 sm:$0xff]  }
  0xf0   :  { %v11186_v14 = vpack.c.bf16 %v212_v9, %v212_v9  ;;  %v9192_v15 = vld [vmem:[#allocation4] ss:$16 sps:$4 sm:$0xff]   ;;  %v9197_v17 = vld [vmem:[#allocation4 + $0x24] ss:$16 sps:$4 sm:$0xff]   ;;  %v9213_v21 = vld [vmem:[#allocation2 + $0x6c] ss:$16 sps:$4 sm:$0xff]  }
  0xf1   :  { %317 = vmatpush1.bf16.msra.mxu0 %v9185_v4  ;;  %v9195_v19 = vld [vmem:[#allocation4 + $0x20] ss:$16 sps:$4 sm:$0xff]   ;;  %358 = vmatpush1.bf16.msra.mxu1 %v9209_v16  ;;  %v9200_v22 = vld [vmem:[#allocation4 + $0x44] ss:$16 sps:$4 sm:$0xff]   ;;  %v9215_v24 = vld [vmem:[#allocation2 + $0x68] ss:$16 sps:$4 sm:$0xff]  }
  0xf2   :  { %318 = vmatprep.subr.bf16.mxu0 %v9186_v5  ;;  %359 = vmatprep.subr.bf16.mxu1 %v9210_v18  ;;  %v9198_v23 = vld [vmem:[#allocation4 + $0x40] ss:$16 sps:$4 sm:$0xff]   ;;  %v9218_v25 = vld [vmem:[#allocation4 + $0xc] ss:$16 sps:$4 sm:$0xff]   ;;  %v9203_v26 = vld [vmem:[#allocation4 + $0x64] ss:$16 sps:$4 sm:$0xff]  }
  0xf3   :  { %v9201_v27 = vld [vmem:[#allocation4 + $0x60] ss:$16 sps:$4 sm:$0xff]   ;;  %v9216_v28 = vld [vmem:[#allocation4 + $0x8] ss:$16 sps:$4 sm:$0xff]   ;;  %v9221_v29 = vld [vmem:[#allocation4 + $0x2c] ss:$16 sps:$4 sm:$0xff]  }
  0xf4   :  { %v9230_v30 = vld [vmem:[#allocation7 + $0x4] ss:$28 sps:$4 sm:$0xff]   ;;  %v9224_v32 = vld [vmem:[#allocation4 + $0x4c] ss:$16 sps:$4 sm:$0xff]   ;;  %v9242_v38 = vld [vmem:[#allocation7 + $0x74] ss:$28 sps:$4 sm:$0xff]  }
  0xf5   :  { %319 = vmatpush1.bf16.msra.mxu0 %v9188_v6  ;;  %360 = vmatpush1.bf16.msra.mxu1 %v9212_v20  ;;  %v9219_v31 = vld [vmem:[#allocation4 + $0x28] ss:$16 sps:$4 sm:$0xff]   ;;  %v9228_v33 = vld [vmem:[#allocation7] ss:$28 sps:$4 sm:$0xff]   ;;  %v9227_v36 = vld [vmem:[#allocation4 + $0x6c] ss:$16 sps:$4 sm:$0xff]  }
  0xf6   :  { %320 = vmatprep.subr.bf16.mxu0 %v9189_v7  ;;  %361 = vmatprep.subr.bf16.mxu1 %v9213_v21  ;;  %v9236_v34 = vld [vmem:[#allocation7 + $0x3c] ss:$28 sps:$4 sm:$0xff]   ;;  %v9222_v35 = vld [vmem:[#allocation4 + $0x48] ss:$16 sps:$4 sm:$0xff]   ;;  %v9233_v40 = vld [vmem:[#allocation7 + $0xc] ss:$28 sps:$4 sm:$0xff]  }
  0xf7   :  { %v9234_v37 = vld [vmem:[#allocation7 + $0x38] ss:$28 sps:$4 sm:$0xff]   ;;  %v9240_v41 = vld [vmem:[#allocation7 + $0x70] ss:$28 sps:$4 sm:$0xff]   ;;  %v9231_v43 = vld [vmem:[#allocation7 + $0x8] ss:$28 sps:$4 sm:$0xff]  }
  0xf8   :  { %v9225_v39 = vld [vmem:[#allocation4 + $0x68] ss:$16 sps:$4 sm:$0xff]   ;;  %v9248_v42 = vld [vmem:[#allocation7 + $0xac] ss:$28 sps:$4 sm:$0xff]   ;;  %v9237_v47 = vld [vmem:[#allocation7 + $0x40] ss:$28 sps:$4 sm:$0xff]  }
  0xf9   :  { %321 = vmatpush1.bf16.msra.mxu0 %v9191_v8  ;;  %362 = vmatpush1.bf16.msra.mxu1 %v9215_v24  ;;  %v9239_v44 = vld [vmem:[#allocation7 + $0x44] ss:$28 sps:$4 sm:$0xff]   ;;  %v9245_v48 = vld [vmem:[#allocation7 + $0x7c] ss:$28 sps:$4 sm:$0xff]   ;;  %v9251_v52 = vld [vmem:[#allocation7 + $0xb4] ss:$28 sps:$4 sm:$0xff]  }
  0xfa   :  { %492 = vmatprep.subr.bf16.mxu0 %v9194_v10  ;;  %533 = vmatprep.subr.bf16.mxu1 %v9218_v25  ;;  %v9246_v45 = vld [vmem:[#allocation7 + $0xa8] ss:$28 sps:$4 sm:$0xff]   ;;  %v9252_v49 = vld [vmem:[#allocation7 + $0xe0] ss:$28 sps:$4 sm:$0xff]   ;;  %v9243_v50 = vld [vmem:[#allocation7 + $0x78] ss:$28 sps:$4 sm:$0xff]  }
  0xfb   :  { %v9254_v46 = vld [vmem:[#allocation7 + $0xe4] ss:$28 sps:$4 sm:$0xff]   ;;  %v9260_v51 = vld [vmem:[#allocation7 + $0x11c] ss:$28 sps:$4 sm:$0xff]   ;;  %v9266_v54 = vld [vmem:[#allocation7 + $0x154] ss:$28 sps:$4 sm:$0xff]  }
  0xfc   :  { %8021 = vmatmul.mubr.msk.bf16.vlgmr.msra.gmra.mrb[0].mxu0 %vm310_vm0, %v11186_v14  ;;  %8022 = vmatmul.mubr.msk.bf16.vlgmr.msra.gmra.mrb[0].mxu1 %vm310_vm0, %v11186_v14  ;;  %v9258_v53 = vld [vmem:[#allocation7 + $0x118] ss:$28 sps:$4 sm:$0xff]   ;;  %v9249_v55 = vld [vmem:[#allocation7 + $0xb0] ss:$28 sps:$4 sm:$0xff]   ;;  %v9255_v59 = vld [vmem:[#allocation7 + $0xe8] ss:$28 sps:$4 sm:$0xff]  }
  0xfd   :  { %493 = vmatpush1.bf16.msra.mxu0 %v9192_v15  ;;  %524 = vmatprep.mubr.bf16.mxu0 %v10927_v0  ;;  %v9257_v56 = vld [vmem:[#allocation7 + $0xec] ss:$28 sps:$4 sm:$0xff]   ;;  %v9263_v60 = vld [vmem:[#allocation7 + $0x124] ss:$28 sps:$4 sm:$0xff]   ;;  %v9269_v1 = vld [vmem:[#allocation7 + $0x15c] ss:$28 sps:$4 sm:$0xff]  }
  0xfe   :  { %494 = vmatprep.subr.bf16.mxu0 %v9197_v17  ;;  %534 = vmatpush1.bf16.msra.mxu1 %v9216_v28  ;;  %v9264_v57 = vld [vmem:[#allocation7 + $0x150] ss:$28 sps:$4 sm:$0xff]   ;;  %v9270_v61 = vld [vmem:[#allocation7 + $0x188] ss:$28 sps:$4 sm:$0xff]   ;;  %v9261_v63 = vld [vmem:[#allocation7 + $0x120] ss:$28 sps:$4 sm:$0xff]  }
  0xff   :  { %565 = vmatprep.mubr.bf16.mxu1 %v10927_v0  ;;  %535 = vmatprep.subr.bf16.mxu1 %v9221_v29  ;;  %v9272_v58 = vld [vmem:[#allocation7 + $0x18c] ss:$28 sps:$4 sm:$0xff]   ;;  %v9278_v62 = vld [vmem:[#allocation7 + $0x1c4] ss:$28 sps:$4 sm:$0xff]   ;;  %v9284_v3 = vld [vmem:[#allocation7 + $0x1fc] ss:$28 sps:$4 sm:$0xff]  }
 0x100   :  { %v9276_v2 = vld [vmem:[#allocation7 + $0x1c0] ss:$28 sps:$4 sm:$0xff]   ;;  %v9267_v4 = vld [vmem:[#allocation7 + $0x158] ss:$28 sps:$4 sm:$0xff]   ;;  %v9273_v7 = vld [vmem:[#allocation7 + $0x190] ss:$28 sps:$4 sm:$0xff]  }
 0x101   :  { %495 = vmatpush1.bf16.msra.mxu0 %v9195_v19  ;;  %v9275_v5 = vld [vmem:[#allocation7 + $0x194] ss:$28 sps:$4 sm:$0xff]   ;;  %v9281_v8 = vld [vmem:[#allocation7 + $0x1cc] ss:$28 sps:$4 sm:$0xff]   ;;  %v9287_v10 = vld [vmem:[#allocation7 + $0x204] ss:$28 sps:$4 sm:$0xff]  }
 0x102   :  { %496 = vmatprep.subr.bf16.mxu0 %v9200_v22  ;;  %536 = vmatpush1.bf16.msra.mxu1 %v9219_v31  ;;  %v9282_v6 = vld [vmem:[#allocation7 + $0x1f8] ss:$28 sps:$4 sm:$0xff]   ;;  %v9279_v9 = vld [vmem:[#allocation7 + $0x1c8] ss:$28 sps:$4 sm:$0xff]   ;;  %v9285_v11 = vld [vmem:[#allocation7 + $0x200] ss:$28 sps:$4 sm:$0xff]  }
 0x103   :  { %537 = vmatprep.subr.bf16.mxu1 %v9224_v32  ;;  %v9290_v12 = vld [vmem:[#allocation7 + $0x234] ss:$28 sps:$4 sm:$0xff]   ;;  %v9293_v13 = vld [vmem:[#allocation7 + $0x23c] ss:$28 sps:$4 sm:$0xff]   ;;  %v9294_v16 = vld [vmem:[#allocation7 + $0x268] ss:$28 sps:$4 sm:$0xff]  }
 0x104   :  { %v9291_v15 = vld [vmem:[#allocation7 + $0x238] ss:$28 sps:$4 sm:$0xff]   ;;  %v9296_v17 = vld [vmem:[#allocation7 + $0x26c] ss:$28 sps:$4 sm:$0xff]   ;;  %v9302_v20 = vld [vmem:[#allocation7 + $0x2a4] ss:$28 sps:$4 sm:$0xff]  }
 0x105   :  { %497 = vmatpush1.bf16.msra.mxu0 %v9198_v23  ;;  %v9297_v18 = vld [vmem:[#allocation7 + $0x270] ss:$28 sps:$4 sm:$0xff]   ;;  %v9300_v21 = vld [vmem:[#allocation7 + $0x2a0] ss:$28 sps:$4 sm:$0xff]   ;;  %v9303_v23 = vld [vmem:[#allocation7 + $0x2a8] ss:$28 sps:$4 sm:$0xff]  }
 0x106   :  { %498 = vmatprep.subr.bf16.mxu0 %v9203_v26  ;;  %538 = vmatpush1.bf16.msra.mxu1 %v9222_v35  ;;  %v9299_v19 = vld [vmem:[#allocation7 + $0x274] ss:$28 sps:$4 sm:$0xff]   ;;  %v9305_v22 = vld [vmem:[#allocation7 + $0x2ac] ss:$28 sps:$4 sm:$0xff]   ;;  %v9308_v24 = vld [vmem:[#allocation7 + $0x2dc] ss:$28 sps:$4 sm:$0xff]  }
 0x107   :  { %539 = vmatprep.subr.bf16.mxu1 %v9227_v36  ;;  %v9311_v25 = vld [vmem:[#allocation7 + $0x2e4] ss:$28 sps:$4 sm:$0xff]   ;;  %v9306_v26 = vld [vmem:[#allocation7 + $0x2d8] ss:$28 sps:$4 sm:$0xff]   ;;  %v9312_v29 = vld [vmem:[#allocation7 + $0x310] ss:$28 sps:$4 sm:$0xff]  }
 0x108   :  { %v9314_v28 = vld [vmem:[#allocation7 + $0x314] ss:$28 sps:$4 sm:$0xff]   ;;  %v9317_v31 = vld [vmem:[#allocation7 + $0x31c] ss:$28 sps:$4 sm:$0xff]   ;;  %v9320_v32 = vld [vmem:[#allocation7 + $0x34c] ss:$28 sps:$4 sm:$0xff]  }
 0x109   :  { %499 = vmatpush1.bf16.msra.mxu0 %v9201_v27  ;;  %v9309_v27 = vld [vmem:[#allocation7 + $0x2e0] ss:$28 sps:$4 sm:$0xff]   ;;  %v9321_v35 = vld [vmem:[#allocation7 + $0x350] ss:$28 sps:$4 sm:$0xff]  }
 0x10a   :  { %1884 = vmatprep.subr.bf16.mxu0 %v9230_v30  ;;  %540 = vmatpush1.bf16.msra.mxu1 %v9225_v39  ;;  %v9315_v30 = vld [vmem:[#allocation7 + $0x318] ss:$28 sps:$4 sm:$0xff]   ;;  %v9326_v36 = vld [vmem:[#allocation7 + $0x384] ss:$28 sps:$4 sm:$0xff]  }
 0x10b   :  { %1966 = vmatprep.subr.bf16.mxu1 %v9233_v40 }
 0x10c   :  { %8039 = vmatmul.mubr.msk.bf16.vlgmr.msra.gmra.mrb[4].mxu0 %vm310_vm0, %v11186_v14 }
 0x10d   :  { %1885 = vmatpush1.bf16.msra.mxu0 %v9228_v33  ;;  %8040 = vmatmul.mubr.msk.bf16.vlgmr.msra.gmra.mrb[4].mxu1 %vm310_vm0, %v11186_v14  ;;  %v9288_v14 = vld [vmem:[#allocation7 + $0x230] ss:$28 sps:$4 sm:$0xff]  }
 0x10e   :  { %1886 = vmatprep.subr.bf16.mxu0 %v9236_v34  ;;  %1967 = vmatpush1.bf16.msra.mxu1 %v9231_v43  ;;  %v9323_v33 = vld [vmem:[#allocation7 + $0x354] ss:$28 sps:$4 sm:$0xff]   ;;  %v9318_v34 = vld [vmem:[#allocation7 + $0x348] ss:$28 sps:$4 sm:$0xff]  }
 0x10f   :  { %1968 = vmatprep.subr.bf16.mxu1 %v9239_v44  ;;  %v11200_v44 = vld [vmem:[#allocation6] sm:$0xf] }
 0x111   :  { %1887 = vmatpush1.bf16.msra.mxu0 %v9234_v37  ;;  %v9329_v37 = vld [vmem:[#allocation7 + $0x38c] ss:$28 sps:$4 sm:$0xff]  }
 0x112   :  { %1888 = vmatprep.subr.bf16.mxu0 %v9242_v38  ;;  %1969 = vmatpush1.bf16.msra.mxu1 %v9237_v47 }
 0x113   :  { %1970 = vmatprep.subr.bf16.mxu1 %v9245_v48 }
 0x115   :  { %1889 = vmatpush1.bf16.msra.mxu0 %v9240_v41 }
 0x116   :  { %1890 = vmatprep.subr.bf16.mxu0 %v9248_v42  ;;  %1971 = vmatpush1.bf16.msra.mxu1 %v9243_v50  ;;  %v580_v42 = vlaneseq }
 0x117   :  { %1972 = vmatprep.subr.bf16.mxu1 %v9251_v52 }
 0x118   :  { %v11198_v43 = vshrl.u32 %v580_v42, 7  ;;  %v9369_v42 = vld [vmem:[#allocation7 + $0x510] ss:$28 sps:$4 sm:$0xff]  }
 0x119   :  { %1891 = vmatpush1.bf16.msra.mxu0 %v9246_v45 }
 0x11a   :  { %1892 = vmatprep.subr.bf16.mxu0 %v9254_v46  ;;  %1973 = vmatpush1.bf16.msra.mxu1 %v9249_v55  ;;  %v11203_v45 = vsub.s32 0, %v11198_v43  ;;  %v11208_v47 = vsub.s32 1, %v11198_v43 }
 0x11b   :  { %1974 = vmatprep.subr.bf16.mxu1 %v9257_v56 }
 0x11d   :  { %1893 = vmatpush1.bf16.msra.mxu0 %v9252_v49 }
 0x11e   :  { %1894 = vmatprep.subr.bf16.mxu0 %v9260_v51  ;;  %1975 = vmatpush1.bf16.msra.mxu1 %v9255_v59  ;;  %v583_v51 = vrot.slane %v11200_v44, %v11203_v45 }
 0x11f   :  { %1976 = vmatprep.subr.bf16.mxu1 %v9263_v60 }
 0x121   :  { %1895 = vmatpush1.bf16.msra.mxu0 %v9258_v53  ;;  %v587_v53 = vrot.slane %v11200_v44, %v11208_v47 }
 0x122   :  { %1896 = vmatprep.subr.bf16.mxu0 %v9266_v54  ;;  %1977 = vmatpush1.bf16.msra.mxu1 %v9261_v63  ;;  %v9324_v63 = vld [vmem:[#allocation7 + $0x380] ss:$28 sps:$4 sm:$0xff]  }
 0x123   :  { %1978 = vmatprep.subr.bf16.mxu1 %v9269_v1  ;;  %v9327_v1 = vld [vmem:[#allocation7 + $0x388] ss:$28 sps:$4 sm:$0xff]  }
 0x125   :  { %1897 = vmatpush1.bf16.msra.mxu0 %v9264_v57 }
 0x126   :  { %1898 = vmatprep.subr.bf16.mxu0 %v9272_v58  ;;  %1979 = vmatpush1.bf16.msra.mxu1 %v9267_v4 }
 0x127   :  { %1980 = vmatprep.subr.bf16.mxu1 %v9275_v5  ;;  %v9332_v5 = vld [vmem:[#allocation7 + $0x3bc] ss:$28 sps:$4 sm:$0xff]  }
 0x129   :  { %1899 = vmatpush1.bf16.msra.mxu0 %v9270_v61 }
 0x12a   :  { %1900 = vmatprep.subr.bf16.mxu0 %v9278_v62  ;;  %1981 = vmatpush1.bf16.msra.mxu1 %v9273_v7  ;;  %v9330_v7 = vld [vmem:[#allocation7 + $0x3b8] ss:$28 sps:$4 sm:$0xff]  }
 0x12b   :  { %1982 = vmatprep.subr.bf16.mxu1 %v9281_v8  ;;  %v9333_v8 = vld [vmem:[#allocation7 + $0x3c0] ss:$28 sps:$4 sm:$0xff]  }
 0x12d   :  { %1901 = vmatpush1.bf16.msra.mxu0 %v9276_v2  ;;  %v11215_v2 = vsub.s32 3, %v11198_v43 }
 0x12e   :  { %1902 = vmatprep.subr.bf16.mxu0 %v9284_v3  ;;  %1983 = vmatpush1.bf16.msra.mxu1 %v9279_v9 }
 0x12f   :  { %1984 = vmatprep.subr.bf16.mxu1 %v9287_v10  ;;  %v595_v10 = vrot.slane %v11200_v44, %v11215_v2 }
 0x131   :  { %1903 = vmatpush1.bf16.msra.mxu0 %v9282_v6  ;;  %v9335_v6 = vld [vmem:[#allocation7 + $0x3c4] ss:$28 sps:$4 sm:$0xff]  }
 0x132   :  { %1985 = vmatpush1.bf16.msra.mxu1 %v9285_v11  ;;  %1904 = vmatprep.subr.bf16.mxu0 %v9290_v12  ;;  %v9338_v11 = vld [vmem:[#allocation7 + $0x3f4] ss:$28 sps:$4 sm:$0xff]   ;;  %v9341_v12 = vld [vmem:[#allocation7 + $0x3fc] ss:$28 sps:$4 sm:$0xff]  }
 0x133   :  { %1986 = vmatprep.subr.bf16.mxu1 %v9293_v13 }
 0x135   :  { %1905 = vmatpush1.bf16.msra.mxu0 %v9288_v14 }
 0x136   :  { %1987 = vmatpush1.bf16.msra.mxu1 %v9291_v15  ;;  %1906 = vmatprep.subr.bf16.mxu0 %v9296_v17  ;;  %v9336_v17 = vld [vmem:[#allocation7 + $0x3f0] ss:$28 sps:$4 sm:$0xff]  }
 0x137   :  { %1988 = vmatprep.subr.bf16.mxu1 %v9299_v19 }
 0x139   :  { %1907 = vmatpush1.bf16.msra.mxu0 %v9294_v16 }
 0x13a   :  { %1989 = vmatpush1.bf16.msra.mxu1 %v9297_v18  ;;  %1908 = vmatprep.subr.bf16.mxu0 %v9302_v20  ;;  %v9339_v18 = vld [vmem:[#allocation7 + $0x3f8] ss:$28 sps:$4 sm:$0xff]  }
 0x13b   :  { %1990 = vmatprep.subr.bf16.mxu1 %v9305_v22  ;;  %v9347_v22 = vld [vmem:[#allocation7 + $0x434] ss:$28 sps:$4 sm:$0xff]  }
 0x13d   :  { %1909 = vmatpush1.bf16.msra.mxu0 %v9300_v21  ;;  %v9344_v21 = vld [vmem:[#allocation7 + $0x42c] ss:$28 sps:$4 sm:$0xff]  }
 0x13e   :  { %1991 = vmatpush1.bf16.msra.mxu1 %v9303_v23  ;;  %1910 = vmatprep.subr.bf16.mxu0 %v9308_v24  ;;  %v9342_v24 = vld [vmem:[#allocation7 + $0x428] ss:$28 sps:$4 sm:$0xff]  }
 0x13f   :  { %1992 = vmatprep.subr.bf16.mxu1 %v9311_v25  ;;  %v9345_v25 = vld [vmem:[#allocation7 + $0x430] ss:$28 sps:$4 sm:$0xff]  }
 0x141   :  { %1911 = vmatpush1.bf16.msra.mxu0 %v9306_v26 }
 0x142   :  { %1993 = vmatpush1.bf16.msra.mxu1 %v9309_v27  ;;  %1912 = vmatprep.subr.bf16.mxu0 %v9314_v28  ;;  %v9350_v27 = vld [vmem:[#allocation7 + $0x464] ss:$28 sps:$4 sm:$0xff]   ;;  %v9353_v28 = vld [vmem:[#allocation7 + $0x46c] ss:$28 sps:$4 sm:$0xff]  }
 0x143   :  { %1994 = vmatprep.subr.bf16.mxu1 %v9317_v31  ;;  %v9356_v31 = vld [vmem:[#allocation7 + $0x49c] ss:$28 sps:$4 sm:$0xff]  }
 0x145   :  { %1913 = vmatpush1.bf16.msra.mxu0 %v9312_v29  ;;  %v9348_v29 = vld [vmem:[#allocation7 + $0x460] ss:$28 sps:$4 sm:$0xff]  }
 0x146   :  { %1995 = vmatpush1.bf16.msra.mxu1 %v9315_v30  ;;  %1914 = vmatprep.subr.bf16.mxu0 %v9320_v32  ;;  %v9351_v30 = vld [vmem:[#allocation7 + $0x468] ss:$28 sps:$4 sm:$0xff]  }
 0x147   :  { %1996 = vmatprep.subr.bf16.mxu1 %v9323_v33  ;;  %v9359_v32 = vld [vmem:[#allocation7 + $0x4a4] ss:$28 sps:$4 sm:$0xff]   ;;  %v9354_v33 = vld [vmem:[#allocation7 + $0x498] ss:$28 sps:$4 sm:$0xff]  }
 0x149   :  { %1915 = vmatpush1.bf16.msra.mxu0 %v9318_v34  ;;  %v9357_v34 = vld [vmem:[#allocation7 + $0x4a0] ss:$28 sps:$4 sm:$0xff]  }
 0x14a   :  { %1997 = vmatpush1.bf16.msra.mxu1 %v9321_v35  ;;  %1925 = vmatprep.subr.bf16.mxu0 %v9326_v36  ;;  %v9362_v35 = vld [vmem:[#allocation7 + $0x4d4] ss:$28 sps:$4 sm:$0xff]   ;;  %v9365_v36 = vld [vmem:[#allocation7 + $0x4dc] ss:$28 sps:$4 sm:$0xff]  }
 0x14b   :  { %2007 = vmatprep.subr.bf16.mxu1 %v9329_v37  ;;  %v9360_v37 = vld [vmem:[#allocation7 + $0x4d0] ss:$28 sps:$4 sm:$0xff]  }
 0x1cf   :  { %v348_v38 = vpop.f32.mrb[0].mxu0  ;;  %v11205_v46 = vpop.f32.mrb[0].mxu1 }
 0x1d0   :  { %v350_v39 = vpop.f32.mrb[1].mxu0  ;;  %v391_v48 = vpop.f32.mrb[1].mxu1 }
 0x1d1   :  { %v352_v40 = vpop.f32.mrb[2].mxu0  ;;  %v393_v49 = vpop.f32.mrb[2].mxu1 }
 0x1d2   :  { %v353_v41 = vpop.f32.mrb[3].mxu0  ;;  %v394_v50 = vpop.f32.mrb[3].mxu1  ;;  %v9371_v40 = vld [vmem:[#allocation7 + $0x514] ss:$28 sps:$4 sm:$0xff]   ;;  %v9377_v49 = vld [vmem:[#allocation7 + $0x54c] ss:$28 sps:$4 sm:$0xff]  }
 0x1d3   :  { %v9366_v41 = vld [vmem:[#allocation7 + $0x508] ss:$28 sps:$4 sm:$0xff]   ;;  %v9372_v50 = vld [vmem:[#allocation7 + $0x540] ss:$28 sps:$4 sm:$0xff]  }
 0x1df   :  { %v526_v52 = vpop.f32.mrb[4].mxu0 }
 0x1e0   :  { %v574_v54 = vmax.f32 %v348_v38, %v526_v52  ;;  %v528_v55 = vpop.f32.mrb[5].mxu0  ;;  %v11225_v9 = vpop.f32.mrb[4].mxu1  ;;  %v9363_v38 = vld [vmem:[#allocation7 + $0x4d8] ss:$28 sps:$4 sm:$0xff]  }
 0x1e1   :  { %v575_v56 = vmax.f32 %v350_v39, %v528_v55  ;;  %v530_v57 = vpop.f32.mrb[6].mxu0  ;;  %v576_v13 = vmax.f32 %v11205_v46, %v11225_v9  ;;  %v569_v14 = vpop.f32.mrb[5].mxu1  ;;  %v9368_v39 = vld [vmem:[#allocation7 + $0x50c] ss:$28 sps:$4 sm:$0xff]   ;;  %v9380_v52 = vld [vmem:[#allocation7 + $0x57c] ss:$28 sps:$4 sm:$0xff]  }
 0x1e2   :  { %v600_v58 = vadd.f32 %v583_v51, %v574_v54  ;;  %v531_v59 = vpop.f32.mrb[7].mxu0  ;;  %v577_v15 = vmax.f32 %v391_v48, %v569_v14  ;;  %v571_v16 = vpop.f32.mrb[6].mxu1  ;;  %v9374_v48 = vld [vmem:[#allocation7 + $0x544] ss:$28 sps:$4 sm:$0xff]   ;;  %v11238_v54 = vsub.s32 2, %v11198_v43 }
 0x1e3   :  { %v601_v60 = vadd.f32 %v587_v53, %v575_v56  ;;  %v572_v19 = vpop.f32.mrb[7].mxu1  ;;  %v9375_v51 = vld [vmem:[#allocation7 + $0x548] ss:$28 sps:$4 sm:$0xff]   ;;  %v9378_v55 = vld [vmem:[#allocation7 + $0x578] ss:$28 sps:$4 sm:$0xff]  }
 0x1e4   :  { %v604_v61 = vmax.f32 %v600_v58, 0.0  ;;  %v603_v20 = vadd.f32 %v595_v10, %v577_v15  ;;  %v9383_v53 = vld [vmem:[#allocation7 + $0x584] ss:$28 sps:$4 sm:$0xff]   ;;  %v591_v57 = vrot.slane %v11200_v44, %v11238_v54  ;;  %v9386_v58 = vld [vmem:[#allocation7 + $0x5b4] ss:$28 sps:$4 sm:$0xff]  }
 0x1e5   :  { %v605_v62 = vmax.f32 %v601_v60, 0.0  ;;  %v9381_v56 = vld [vmem:[#allocation7 + $0x580] ss:$28 sps:$4 sm:$0xff]   ;;  %v9384_v60 = vld [vmem:[#allocation7 + $0x5b0] ss:$28 sps:$4 sm:$0xff]  }
 0x1e6   :  { %v11219_v4 = vpack.c.bf16 %v604_v61, %v604_v61  ;;  %v607_v23 = vmax.f32 %v603_v20, 0.0  ;;  %v9389_v59 = vld [vmem:[#allocation7 + $0x5bc] ss:$28 sps:$4 sm:$0xff]   ;;  %v9393_v44 = vld [vmem:[#allocation7 + $0x5f0] ss:$28 sps:$4 sm:$0xff]  }
 0x1e7   :  { %v11217_v3 = vpack.c.bf16 %v605_v62, %v605_v62  ;;  %v9387_v61 = vld [vmem:[#allocation7 + $0x5b8] ss:$28 sps:$4 sm:$0xff]   ;;  %v9392_v62 = vld [vmem:[#allocation7 + $0x5ec] ss:$28 sps:$4 sm:$0xff]   ;;  %v9408_v15 = vld [vmem:[#allocation7 + $0x84] ss:$28 sps:$4 sm:$0xff]  }
 0x1e8   :  { %v11231_v26 = vpack.c.bf16 %v607_v23, %v607_v23  ;;  %v9396_v10 = vld [vmem:[#allocation7 + $0x10] ss:$28 sps:$4 sm:$0xff]   ;;  %v9401_v9 = vld [vmem:[#allocation7 + $0x48] ss:$28 sps:$4 sm:$0xff]   ;;  %v9413_v19 = vld [vmem:[#allocation7 + $0xbc] ss:$28 sps:$4 sm:$0xff]  }
 0x1e9   :  { %1916 = vmatprep.mubr.bf16.mxu0 %v11217_v3  ;;  %1998 = vmatprep.mubr.bf16.mxu1 %v11217_v3  ;;  %v9404_v46 = vld [vmem:[#allocation7 + $0x210] ss:$28 sps:$4 sm:$0xff]   ;;  %v9409_v16 = vld [vmem:[#allocation7 + $0x248] ss:$28 sps:$4 sm:$0xff]   ;;  %v9414_v20 = vld [vmem:[#allocation7 + $0x280] ss:$28 sps:$4 sm:$0xff]  }
 0x1ea   :  { %1917 = vmatmul.mubr.bf16.vlgmr.msra.gmra.mrb[8].mxu0 %v11219_v4  ;;  %1999 = vmatmul.mubr.bf16.vlgmr.msra.gmra.mrb[8].mxu1 %v11219_v4  ;;  %v9418_v23 = vld [vmem:[#allocation7 + $0xf4] ss:$28 sps:$4 sm:$0xff]  }
 0x1eb   :  { %1926 = vmatpush1.bf16.msra.mxu0 %v9324_v63  ;;  %2008 = vmatpush1.bf16.msra.mxu1 %v9327_v1  ;;  %v602_v63 = vadd.f32 %v591_v57, %v576_v13  ;;  %v9395_v1 = vld [vmem:[#allocation7 + $0x5f4] ss:$28 sps:$4 sm:$0xff]  }
 0x1ec   :  { %1927 = vmatprep.subr.bf16.mxu0 %v9332_v5  ;;  %2009 = vmatprep.subr.bf16.mxu1 %v9335_v6  ;;  %v9390_v5 = vld [vmem:[#allocation7 + $0x5e8] ss:$28 sps:$4 sm:$0xff]   ;;  %v9398_v6 = vld [vmem:[#allocation7 + $0x14] ss:$28 sps:$4 sm:$0xff]  }
 0x1ed   :  { %8237 = vmatprep.mubr.msk.bf16.mxu0 %vm310_vm0, %v11231_v26  ;;  %8238 = vmatprep.mubr.msk.bf16.mxu1 %vm310_vm0, %v11231_v26  ;;  %v9405_v13 = vld [vmem:[#allocation7 + $0x50] ss:$28 sps:$4 sm:$0xff]  }
 0x1ee   :  { %v9454_v57 = vld [vmem:[#allocation7 + $0x2b4] ss:$28 sps:$4 sm:$0xff]  }
 0x1ef   :  { %1928 = vmatpush1.bf16.msra.mxu0 %v9330_v7  ;;  %2010 = vmatpush1.bf16.msra.mxu1 %v9333_v8  ;;  %v606_v7 = vmax.f32 %v602_v63, 0.0  ;;  %v9399_v8 = vld [vmem:[#allocation7 + $0x1d8] ss:$28 sps:$4 sm:$0xff]   ;;  %v9462_v63 = vld [vmem:[#allocation7 + $0x324] ss:$28 sps:$4 sm:$0xff]  }
 0x1f0   :  { %1929 = vmatprep.subr.bf16.mxu0 %v9338_v11  ;;  %2011 = vmatprep.subr.bf16.mxu1 %v9341_v12  ;;  %v9400_v11 = vld [vmem:[#allocation7 + $0x18] ss:$28 sps:$4 sm:$0xff]   ;;  %v9403_v12 = vld [vmem:[#allocation7 + $0x4c] ss:$28 sps:$4 sm:$0xff]  }
 0x1f1   :  { %v11245_v14 = vpack.c.bf16 %v606_v7, %v606_v7  ;;  %v9467_v7 = vld [vmem:[#allocation7 + $0x520] ss:$28 sps:$4 sm:$0xff]  }
 0x1f3   :  { %1930 = vmatpush1.bf16.msra.mxu0 %v9336_v17  ;;  %2012 = vmatpush1.bf16.msra.mxu1 %v9339_v18  ;;  %v9406_v17 = vld [vmem:[#allocation7 + $0x80] ss:$28 sps:$4 sm:$0xff]   ;;  %v9410_v18 = vld [vmem:[#allocation7 + $0x88] ss:$28 sps:$4 sm:$0xff]  }
 0x1f4   :  { %1931 = vmatprep.subr.bf16.mxu0 %v9344_v21  ;;  %2013 = vmatprep.subr.bf16.mxu1 %v9347_v22  ;;  %v9411_v21 = vld [vmem:[#allocation7 + $0xb8] ss:$28 sps:$4 sm:$0xff]   ;;  %v9415_v22 = vld [vmem:[#allocation7 + $0xc0] ss:$28 sps:$4 sm:$0xff]  }
 0x1f7   :  { %1932 = vmatpush1.bf16.msra.mxu0 %v9342_v24  ;;  %2014 = vmatpush1.bf16.msra.mxu1 %v9345_v25  ;;  %v9419_v24 = vld [vmem:[#allocation7 + $0x2b8] ss:$28 sps:$4 sm:$0xff]  }
 0x1f8   :  { %1933 = vmatprep.subr.bf16.mxu0 %v9350_v27  ;;  %2015 = vmatprep.subr.bf16.mxu1 %v9353_v28  ;;  %v9420_v25 = vld [vmem:[#allocation7 + $0xf8] ss:$28 sps:$4 sm:$0xff]   ;;  %v9423_v27 = vld [vmem:[#allocation7 + $0x12c] ss:$28 sps:$4 sm:$0xff]  }
 0x1f9   :  { %v9424_v28 = vld [vmem:[#allocation7 + $0x2f0] ss:$28 sps:$4 sm:$0xff]  }
 0x1fb   :  { %1934 = vmatpush1.bf16.msra.mxu0 %v9348_v29  ;;  %2016 = vmatpush1.bf16.msra.mxu1 %v9351_v30  ;;  %v9421_v29 = vld [vmem:[#allocation7 + $0x128] ss:$28 sps:$4 sm:$0xff]   ;;  %v9425_v30 = vld [vmem:[#allocation7 + $0x130] ss:$28 sps:$4 sm:$0xff]  }
 0x1fc   :  { %1935 = vmatprep.subr.bf16.mxu0 %v9356_v31  ;;  %2017 = vmatprep.subr.bf16.mxu1 %v9359_v32  ;;  %v9428_v31 = vld [vmem:[#allocation7 + $0x164] ss:$28 sps:$4 sm:$0xff]  }
 0x1fd   :  { %v9429_v32 = vld [vmem:[#allocation7 + $0x328] ss:$28 sps:$4 sm:$0xff]  }
 0x1ff   :  { %1936 = vmatpush1.bf16.msra.mxu0 %v9354_v33  ;;  %2018 = vmatpush1.bf16.msra.mxu1 %v9357_v34  ;;  %v9426_v33 = vld [vmem:[#allocation7 + $0x160] ss:$28 sps:$4 sm:$0xff]   ;;  %v9430_v34 = vld [vmem:[#allocation7 + $0x168] ss:$28 sps:$4 sm:$0xff]  }
 0x200   :  { %1937 = vmatprep.subr.bf16.mxu0 %v9362_v35  ;;  %2019 = vmatprep.subr.bf16.mxu1 %v9365_v36  ;;  %v9433_v35 = vld [vmem:[#allocation7 + $0x19c] ss:$28 sps:$4 sm:$0xff]  }
 0x201   :  { %v9434_v36 = vld [vmem:[#allocation7 + $0x360] ss:$28 sps:$4 sm:$0xff]  }
 0x203   :  { %1938 = vmatpush1.bf16.msra.mxu0 %v9360_v37  ;;  %2020 = vmatpush1.bf16.msra.mxu1 %v9363_v38  ;;  %v9431_v37 = vld [vmem:[#allocation7 + $0x198] ss:$28 sps:$4 sm:$0xff]   ;;  %v9435_v38 = vld [vmem:[#allocation7 + $0x1a0] ss:$28 sps:$4 sm:$0xff]  }
 0x204   :  { %1939 = vmatprep.subr.bf16.mxu0 %v9368_v39  ;;  %2021 = vmatprep.subr.bf16.mxu1 %v9371_v40  ;;  %v9438_v39 = vld [vmem:[#allocation7 + $0x1d4] ss:$28 sps:$4 sm:$0xff]  }
 0x205   :  { %v9436_v40 = vld [vmem:[#allocation7 + $0x1d0] ss:$28 sps:$4 sm:$0xff]  }
 0x207   :  { %1940 = vmatpush1.bf16.msra.mxu0 %v9366_v41  ;;  %2022 = vmatpush1.bf16.msra.mxu1 %v9369_v42  ;;  %v9439_v41 = vld [vmem:[#allocation7 + $0x398] ss:$28 sps:$4 sm:$0xff]   ;;  %v9442_v42 = vld [vmem:[#allocation7 + $0x20c] ss:$28 sps:$4 sm:$0xff]  }
 0x208   :  { %1941 = vmatprep.subr.bf16.mxu0 %v9374_v48  ;;  %2023 = vmatprep.subr.bf16.mxu1 %v9377_v49  ;;  %v9440_v48 = vld [vmem:[#allocation7 + $0x208] ss:$28 sps:$4 sm:$0xff]   ;;  %v9443_v49 = vld [vmem:[#allocation7 + $0x3d0] ss:$28 sps:$4 sm:$0xff]  }
 0x20b   :  { %1942 = vmatpush1.bf16.msra.mxu0 %v9372_v50  ;;  %2024 = vmatpush1.bf16.msra.mxu1 %v9375_v51  ;;  %v9446_v50 = vld [vmem:[#allocation7 + $0x244] ss:$28 sps:$4 sm:$0xff]  }
 0x20c   :  { %1943 = vmatprep.subr.bf16.mxu0 %v9380_v52  ;;  %2025 = vmatprep.subr.bf16.mxu1 %v9383_v53  ;;  %v9444_v51 = vld [vmem:[#allocation7 + $0x240] ss:$28 sps:$4 sm:$0xff]   ;;  %v9447_v52 = vld [vmem:[#allocation7 + $0x408] ss:$28 sps:$4 sm:$0xff]  }
 0x20d   :  { %v9450_v53 = vld [vmem:[#allocation7 + $0x27c] ss:$28 sps:$4 sm:$0xff]  }
 0x20f   :  { %1944 = vmatpush1.bf16.msra.mxu0 %v9378_v55  ;;  %2026 = vmatpush1.bf16.msra.mxu1 %v9381_v56  ;;  %v9448_v55 = vld [vmem:[#allocation7 + $0x278] ss:$28 sps:$4 sm:$0xff]   ;;  %v9451_v56 = vld [vmem:[#allocation7 + $0x440] ss:$28 sps:$4 sm:$0xff]  }
 0x210   :  { %1945 = vmatprep.subr.bf16.mxu0 %v9386_v58  ;;  %2027 = vmatprep.subr.bf16.mxu1 %v9389_v59  ;;  %v9452_v58 = vld [vmem:[#allocation7 + $0x2b0] ss:$28 sps:$4 sm:$0xff]   ;;  %v9455_v59 = vld [vmem:[#allocation7 + $0x478] ss:$28 sps:$4 sm:$0xff]  }
 0x213   :  { %1946 = vmatpush1.bf16.msra.mxu0 %v9384_v60  ;;  %2028 = vmatpush1.bf16.msra.mxu1 %v9387_v61  ;;  %v9458_v60 = vld [vmem:[#allocation7 + $0x2ec] ss:$28 sps:$4 sm:$0xff]  }
 0x214   :  { %1947 = vmatprep.subr.bf16.mxu0 %v9392_v62  ;;  %2029 = vmatprep.subr.bf16.mxu1 %v9395_v1  ;;  %v9456_v61 = vld [vmem:[#allocation7 + $0x2e8] ss:$28 sps:$4 sm:$0xff]   ;;  %v9459_v62 = vld [vmem:[#allocation7 + $0x4b0] ss:$28 sps:$4 sm:$0xff]   ;;  %v9460_v1 = vld [vmem:[#allocation7 + $0x320] ss:$28 sps:$4 sm:$0xff]  }
 0x217   :  { %1948 = vmatpush1.bf16.msra.mxu0 %v9390_v5  ;;  %2030 = vmatpush1.bf16.msra.mxu1 %v9393_v44  ;;  %v9463_v5 = vld [vmem:[#allocation7 + $0x4e8] ss:$28 sps:$4 sm:$0xff]   ;;  %v9466_v44 = vld [vmem:[#allocation7 + $0x35c] ss:$28 sps:$4 sm:$0xff]  }
 0x218   :  { %2048 = vmatprep.subr.bf16.mxu0 %v9398_v6  ;;  %8984 = vmatprep.subr.bf16.mxu1 %v9399_v8  ;;  %v9464_v6 = vld [vmem:[#allocation7 + $0x358] ss:$28 sps:$4 sm:$0xff]  }
 0x219   :  { %v9470_v8 = vld [vmem:[#allocation7 + $0x394] ss:$28 sps:$4 sm:$0xff]  }
 0x21a   :  { %1958 = vmatmul.mubr.bf16.vlgmr.msra.gmra.mrb[8].mxu0 %v11245_v14  ;;  %2040 = vmatmul.mubr.bf16.vlgmr.msra.gmra.mrb[8].mxu1 %v11245_v14 }
 0x21b   :  { %2049 = vmatpush1.bf16.msra.mxu0 %v9396_v10  ;;  %2080 = vmatprep.mubr.bf16.mxu0 %v11217_v3  ;;  %v9468_v10 = vld [vmem:[#allocation7 + $0x390] ss:$28 sps:$4 sm:$0xff]  }
 0x21c   :  { %8985 = vmatpush3.bf16.msra.mxu1 %v9400_v11  ;;  %2162 = vmatprep.mubr.bf16.mxu1 %v11217_v3  ;;  %v9416_v3 = vld [vmem:[#allocation7 + $0xf0] ss:$28 sps:$4 sm:$0xff]   ;;  %v9471_v11 = vld [vmem:[#allocation7 + $0x558] ss:$28 sps:$4 sm:$0xff]  }
 0x21d   :  { %2050 = vmatprep.subr.bf16.mxu0 %v9403_v12  ;;  %8986 = vmatprep.subr.bf16.mxu1 %v9404_v46  ;;  %v9474_v12 = vld [vmem:[#allocation7 + $0x3cc] ss:$28 sps:$4 sm:$0xff]  }
 0x21e   :  { %v9472_v46 = vld [vmem:[#allocation7 + $0x3c8] ss:$28 sps:$4 sm:$0xff]  }
 0x21f   :  { %2051 = vmatpush1.bf16.msra.mxu0 %v9401_v9  ;;  %v9475_v9 = vld [vmem:[#allocation7 + $0x590] ss:$28 sps:$4 sm:$0xff]  }
 0x220   :  { %8987 = vmatpush3.bf16.msra.mxu1 %v9405_v13  ;;  %2052 = vmatprep.subr.bf16.mxu0 %v9408_v15  ;;  %v9478_v13 = vld [vmem:[#allocation7 + $0x404] ss:$28 sps:$4 sm:$0xff]  }
 0x221   :  { %8988 = vmatprep.subr.bf16.mxu1 %v9409_v16  ;;  %v9476_v15 = vld [vmem:[#allocation7 + $0x400] ss:$28 sps:$4 sm:$0xff]   ;;  %v9479_v16 = vld [vmem:[#allocation7 + $0x5c8] ss:$28 sps:$4 sm:$0xff]  }
 0x223   :  { %2053 = vmatpush1.bf16.msra.mxu0 %v9406_v17  ;;  %v9482_v17 = vld [vmem:[#allocation7 + $0x43c] ss:$28 sps:$4 sm:$0xff]  }
 0x224   :  { %8989 = vmatpush3.bf16.msra.mxu1 %v9410_v18  ;;  %2054 = vmatprep.subr.bf16.mxu0 %v9413_v19  ;;  %v9480_v18 = vld [vmem:[#allocation7 + $0x438] ss:$28 sps:$4 sm:$0xff]  }
 0x225   :  { %8990 = vmatprep.subr.bf16.mxu1 %v9414_v20  ;;  %v9486_v19 = vld [vmem:[#allocation7 + $0x474] ss:$28 sps:$4 sm:$0xff]   ;;  %v9510_v20 = vld [vmem:[#allocation10 + $0x4] ss:$48 sps:$4 sm:$0xff]  }
 0x227   :  { %2055 = vmatpush1.bf16.msra.mxu0 %v9411_v21  ;;  %v9489_v21 = vld [vmem:[#allocation7 + $0x4ac] ss:$28 sps:$4 sm:$0xff]  }
 0x228   :  { %8991 = vmatpush3.bf16.msra.mxu1 %v9415_v22  ;;  %2056 = vmatprep.subr.bf16.mxu0 %v9418_v23  ;;  %v9508_v22 = vld [vmem:[#allocation10] ss:$48 sps:$4 sm:$0xff]   ;;  %v9516_v23 = vld [vmem:[#allocation10 + $0x64] ss:$48 sps:$4 sm:$0xff]  }
 0x229   :  { %8992 = vmatprep.subr.bf16.mxu1 %v9419_v24  ;;  %v9487_v24 = vld [vmem:[#allocation7 + $0x4a8] ss:$28 sps:$4 sm:$0xff]  }
 0x22b   :  { %2057 = vmatpush1.bf16.msra.mxu0 %v9416_v3  ;;  %v9492_v3 = vld [vmem:[#allocation7 + $0x4e4] ss:$28 sps:$4 sm:$0xff]  }
 0x22c   :  { %8993 = vmatpush3.bf16.msra.mxu1 %v9420_v25  ;;  %2058 = vmatprep.subr.bf16.mxu0 %v9423_v27  ;;  %v9514_v25 = vld [vmem:[#allocation10 + $0x60] ss:$48 sps:$4 sm:$0xff]   ;;  %v9490_v27 = vld [vmem:[#allocation7 + $0x4e0] ss:$28 sps:$4 sm:$0xff]  }
 0x22d   :  { %8994 = vmatprep.subr.bf16.mxu1 %v9424_v28  ;;  %v9522_v28 = vld [vmem:[#allocation10 + $0xc4] ss:$48 sps:$4 sm:$0xff]  }
 0x22f   :  { %2059 = vmatpush1.bf16.msra.mxu0 %v9421_v29  ;;  %v9495_v29 = vld [vmem:[#allocation7 + $0x51c] ss:$28 sps:$4 sm:$0xff]  }
 0x230   :  { %8995 = vmatpush3.bf16.msra.mxu1 %v9425_v30  ;;  %2060 = vmatprep.subr.bf16.mxu0 %v9428_v31  ;;  %v9520_v30 = vld [vmem:[#allocation10 + $0xc0] ss:$48 sps:$4 sm:$0xff]  }
 0x231   :  { %8996 = vmatprep.subr.bf16.mxu1 %v9429_v32  ;;  %v9493_v31 = vld [vmem:[#allocation7 + $0x518] ss:$28 sps:$4 sm:$0xff]   ;;  %v9528_v32 = vld [vmem:[#allocation10 + $0x124] ss:$48 sps:$4 sm:$0xff]  }
 0x233   :  { %2061 = vmatpush1.bf16.msra.mxu0 %v9426_v33  ;;  %v9498_v33 = vld [vmem:[#allocation7 + $0x554] ss:$28 sps:$4 sm:$0xff]  }
 0x234   :  { %8997 = vmatpush3.bf16.msra.mxu1 %v9430_v34  ;;  %2062 = vmatprep.subr.bf16.mxu0 %v9433_v35  ;;  %v9526_v34 = vld [vmem:[#allocation10 + $0x120] ss:$48 sps:$4 sm:$0xff]   ;;  %v9496_v35 = vld [vmem:[#allocation7 + $0x550] ss:$28 sps:$4 sm:$0xff]  }
 0x235   :  { %8998 = vmatprep.subr.bf16.mxu1 %v9434_v36  ;;  %v9534_v36 = vld [vmem:[#allocation10 + $0x184] ss:$48 sps:$4 sm:$0xff]  }
 0x237   :  { %2063 = vmatpush1.bf16.msra.mxu0 %v9431_v37  ;;  %v9501_v37 = vld [vmem:[#allocation7 + $0x58c] ss:$28 sps:$4 sm:$0xff]  }
 0x238   :  { %8999 = vmatpush3.bf16.msra.mxu1 %v9435_v38  ;;  %2064 = vmatprep.subr.bf16.mxu0 %v9438_v39  ;;  %v9532_v38 = vld [vmem:[#allocation10 + $0x180] ss:$48 sps:$4 sm:$0xff]   ;;  %v9540_v39 = vld [vmem:[#allocation10 + $0x1e4] ss:$48 sps:$4 sm:$0xff]  }
 0x239   :  { %2170 = vmatprep.subr.bf16.mxu1 %v10927_v0 }
 0x23b   :  { %2163 = vmatmul.mubr.bf16.vlgmr.msra.gmra.mrb[12].mxu1 %v11219_v4  ;;  %2065 = vmatpush1.bf16.msra.mxu0 %v9436_v40  ;;  %v9499_v40 = vld [vmem:[#allocation7 + $0x588] ss:$28 sps:$4 sm:$0xff]  }
 0x23c   :  { %2171 = vmatpush1.bf16.msra.mxu1 %v9439_v41  ;;  %8240 = vmatprep.mubr.msk.bf16.mxu1 %vm310_vm0, %v11231_v26  ;;  %v9504_v41 = vld [vmem:[#allocation7 + $0x5c4] ss:$28 sps:$4 sm:$0xff]  }
 0x23d   :  { %2066 = vmatprep.subr.bf16.mxu0 %v9442_v42  ;;  %2172 = vmatprep.subr.bf16.mxu1 %v10927_v0  ;;  %v9538_v42 = vld [vmem:[#allocation10 + $0x1e0] ss:$48 sps:$4 sm:$0xff]  }
 0x23f   :  { %2067 = vmatpush1.bf16.msra.mxu0 %v9440_v48  ;;  %v9546_v48 = vld [vmem:[#allocation10 + $0x244] ss:$48 sps:$4 sm:$0xff]  }
 0x240   :  { %2173 = vmatpush1.bf16.msra.mxu1 %v9443_v49  ;;  %2068 = vmatprep.subr.bf16.mxu0 %v9446_v50  ;;  %v9502_v49 = vld [vmem:[#allocation7 + $0x5c0] ss:$28 sps:$4 sm:$0xff]  }
 0x241   :  { %2174 = vmatprep.subr.bf16.mxu1 %v10927_v0  ;;  %v9507_v50 = vld [vmem:[#allocation7 + $0x5fc] ss:$28 sps:$4 sm:$0xff]  }
 0x243   :  { %2069 = vmatpush1.bf16.msra.mxu0 %v9444_v51  ;;  %v9544_v51 = vld [vmem:[#allocation10 + $0x240] ss:$48 sps:$4 sm:$0xff]  }
 0x244   :  { %2175 = vmatpush1.bf16.msra.mxu1 %v9447_v52  ;;  %2070 = vmatprep.subr.bf16.mxu0 %v9450_v53  ;;  %v9552_v52 = vld [vmem:[#allocation10 + $0x2a4] ss:$48 sps:$4 sm:$0xff]   ;;  %v9505_v53 = vld [vmem:[#allocation7 + $0x5f8] ss:$28 sps:$4 sm:$0xff]  }
 0x245   :  { %2176 = vmatprep.subr.bf16.mxu1 %v10927_v0 }
 0x247   :  { %2071 = vmatpush1.bf16.msra.mxu0 %v9448_v55  ;;  %v9513_v55 = vld [vmem:[#allocation10 + $0xc] ss:$48 sps:$4 sm:$0xff]  }
 0x248   :  { %2177 = vmatpush1.bf16.msra.mxu1 %v9451_v56  ;;  %2072 = vmatprep.subr.bf16.mxu0 %v9454_v57  ;;  %v9550_v56 = vld [vmem:[#allocation10 + $0x2a0] ss:$48 sps:$4 sm:$0xff]   ;;  %v9558_v57 = vld [vmem:[#allocation10 + $0x304] ss:$48 sps:$4 sm:$0xff]  }
 0x249   :  { %2178 = vmatprep.subr.bf16.mxu1 %v10927_v0 }
 0x24b   :  { %2073 = vmatpush1.bf16.msra.mxu0 %v9452_v58  ;;  %v9511_v58 = vld [vmem:[#allocation10 + $0x8] ss:$48 sps:$4 sm:$0xff]  }
 0x24c   :  { %2179 = vmatpush1.bf16.msra.mxu1 %v9455_v59  ;;  %2074 = vmatprep.subr.bf16.mxu0 %v9458_v60  ;;  %v9519_v59 = vld [vmem:[#allocation10 + $0x6c] ss:$48 sps:$4 sm:$0xff]   ;;  %v9556_v60 = vld [vmem:[#allocation10 + $0x300] ss:$48 sps:$4 sm:$0xff]  }
 0x24d   :  { %2180 = vmatprep.subr.bf16.mxu1 %v10927_v0 }
 0x24f   :  { %2075 = vmatpush1.bf16.msra.mxu0 %v9456_v61  ;;  %v9564_v61 = vld [vmem:[#allocation10 + $0x364] ss:$48 sps:$4 sm:$0xff]  }
 0x250   :  { %2181 = vmatpush1.bf16.msra.mxu1 %v9459_v62  ;;  %2076 = vmatprep.subr.bf16.mxu0 %v9462_v63  ;;  %v9517_v62 = vld [vmem:[#allocation10 + $0x68] ss:$48 sps:$4 sm:$0xff]   ;;  %v9525_v63 = vld [vmem:[#allocation10 + $0xcc] ss:$48 sps:$4 sm:$0xff]  }
 0x251   :  { %2182 = vmatprep.subr.bf16.mxu1 %v10927_v0 }
 0x253   :  { %2077 = vmatpush1.bf16.msra.mxu0 %v9460_v1  ;;  %v9562_v1 = vld [vmem:[#allocation10 + $0x360] ss:$48 sps:$4 sm:$0xff]  }
 0x254   :  { %2183 = vmatpush1.bf16.msra.mxu1 %v9463_v5  ;;  %2078 = vmatprep.subr.bf16.mxu0 %v9466_v44  ;;  %v9523_v5 = vld [vmem:[#allocation10 + $0xc8] ss:$48 sps:$4 sm:$0xff]   ;;  %v9570_v44 = vld [vmem:[#allocation10 + $0x3c4] ss:$48 sps:$4 sm:$0xff]  }
 0x255   :  { %2184 = vmatprep.subr.bf16.mxu1 %v10927_v0 }
 0x257   :  { %2079 = vmatpush1.bf16.msra.mxu0 %v9464_v6  ;;  %v9531_v6 = vld [vmem:[#allocation10 + $0x12c] ss:$48 sps:$4 sm:$0xff]  }
 0x258   :  { %2185 = vmatpush1.bf16.msra.mxu1 %v9467_v7  ;;  %2089 = vmatprep.subr.bf16.mxu0 %v9470_v8  ;;  %v9568_v7 = vld [vmem:[#allocation10 + $0x3c0] ss:$48 sps:$4 sm:$0xff]   ;;  %v9576_v8 = vld [vmem:[#allocation10 + $0x424] ss:$48 sps:$4 sm:$0xff]  }
 0x259   :  { %2186 = vmatprep.subr.bf16.mxu1 %v10927_v0 }
 0x25a   :  { %2081 = vmatmul.mubr.bf16.vlgmr.msra.gmra.mrb[12].mxu0 %v11219_v4  ;;  %v9483_v4 = vld [vmem:[#allocation7 + $0x600] ss:$28 sps:$4 sm:$0xff]  }
 0x25b   :  { %2090 = vmatpush1.bf16.msra.mxu0 %v9468_v10  ;;  %8239 = vmatprep.mubr.msk.bf16.mxu0 %vm310_vm0, %v11231_v26  ;;  %v9484_v26 = vld [vmem:[#allocation7 + $0x470] ss:$28 sps:$4 sm:$0xff]  }
 0x25c   :  { %2187 = vmatpush1.bf16.msra.mxu1 %v9471_v11  ;;  %2091 = vmatprep.subr.bf16.mxu0 %v9474_v12  ;;  %v9529_v10 = vld [vmem:[#allocation10 + $0x128] ss:$48 sps:$4 sm:$0xff]   ;;  %v9537_v11 = vld [vmem:[#allocation10 + $0x18c] ss:$48 sps:$4 sm:$0xff]   ;;  %v9582_v12 = vld [vmem:[#allocation10 + $0x484] ss:$48 sps:$4 sm:$0xff]  }
 0x25d   :  { %2188 = vmatprep.subr.bf16.mxu1 %v10927_v0 }
 0x25f   :  { %2092 = vmatpush1.bf16.msra.mxu0 %v9472_v46  ;;  %v9535_v46 = vld [vmem:[#allocation10 + $0x188] ss:$48 sps:$4 sm:$0xff]  }
 0x260   :  { %2189 = vmatpush1.bf16.msra.mxu1 %v9475_v9  ;;  %2093 = vmatprep.subr.bf16.mxu0 %v9478_v13  ;;  %v9543_v9 = vld [vmem:[#allocation10 + $0x1ec] ss:$48 sps:$4 sm:$0xff]   ;;  %v9580_v13 = vld [vmem:[#allocation10 + $0x480] ss:$48 sps:$4 sm:$0xff]  }
 0x261   :  { %2190 = vmatprep.subr.bf16.mxu1 %v10927_v0 }
 0x263   :  { %2094 = vmatpush1.bf16.msra.mxu0 %v9476_v15  ;;  %v9588_v15 = vld [vmem:[#allocation10 + $0x4e4] ss:$48 sps:$4 sm:$0xff]  }
 0x264   :  { %2191 = vmatpush1.bf16.msra.mxu1 %v9479_v16  ;;  %2095 = vmatprep.subr.bf16.mxu0 %v9482_v17  ;;  %v9541_v16 = vld [vmem:[#allocation10 + $0x1e8] ss:$48 sps:$4 sm:$0xff]   ;;  %v9549_v17 = vld [vmem:[#allocation10 + $0x24c] ss:$48 sps:$4 sm:$0xff]  }
 0x265   :  { %2192 = vmatprep.subr.bf16.mxu1 %v10927_v0 }
 0x267   :  { %2096 = vmatpush1.bf16.msra.mxu0 %v9480_v18  ;;  %v9586_v18 = vld [vmem:[#allocation10 + $0x4e0] ss:$48 sps:$4 sm:$0xff]  }
 0x268   :  { %2193 = vmatpush1.bf16.msra.mxu1 %v9483_v4  ;;  %2097 = vmatprep.subr.bf16.mxu0 %v9486_v19  ;;  %v9594_v4 = vld [vmem:[#allocation10 + $0x544] ss:$48 sps:$4 sm:$0xff]   ;;  %v9547_v19 = vld [vmem:[#allocation10 + $0x248] ss:$48 sps:$4 sm:$0xff]  }
 0x269   :  { %6035 = vmatprep.subr.bf16.mxu1 %v9510_v20  ;;  %v9555_v20 = vld [vmem:[#allocation10 + $0x2ac] ss:$48 sps:$4 sm:$0xff]  }
 0x26b   :  { %2203 = vmatmul.mubr.bf16.vlgmr.msra.gmra.mrb[16].mxu1 %v11245_v14  ;;  %2098 = vmatpush1.bf16.msra.mxu0 %v9484_v26  ;;  %v9592_v26 = vld [vmem:[#allocation10 + $0x540] ss:$48 sps:$4 sm:$0xff]  }
 0x26c   :  { %2099 = vmatprep.subr.bf16.mxu0 %v9489_v21  ;;  %6036 = vmatpush1.bf16.msra.mxu1 %v9508_v22  ;;  %v9600_v21 = vld [vmem:[#allocation10 + $0x5a4] ss:$48 sps:$4 sm:$0xff]   ;;  %v9553_v22 = vld [vmem:[#allocation10 + $0x2a8] ss:$48 sps:$4 sm:$0xff]  }
 0x26d   :  { %6037 = vmatprep.subr.bf16.mxu1 %v9516_v23  ;;  %v9561_v23 = vld [vmem:[#allocation10 + $0x30c] ss:$48 sps:$4 sm:$0xff]  }
 0x26f   :  { %2100 = vmatpush1.bf16.msra.mxu0 %v9487_v24  ;;  %v9598_v24 = vld [vmem:[#allocation10 + $0x5a0] ss:$48 sps:$4 sm:$0xff]  }
 0x270   :  { %2101 = vmatprep.subr.bf16.mxu0 %v9492_v3  ;;  %6038 = vmatpush1.bf16.msra.mxu1 %v9514_v25  ;;  %v9606_v3 = vld [vmem:[#allocation10 + $0x604] ss:$48 sps:$4 sm:$0xff]   ;;  %v9559_v25 = vld [vmem:[#allocation10 + $0x308] ss:$48 sps:$4 sm:$0xff]  }
 0x271   :  { %6039 = vmatprep.subr.bf16.mxu1 %v9522_v28  ;;  %v9565_v28 = vld [vmem:[#allocation10 + $0x368] ss:$48 sps:$4 sm:$0xff]  }
 0x273   :  { %2102 = vmatpush1.bf16.msra.mxu0 %v9490_v27  ;;  %v9567_v27 = vld [vmem:[#allocation10 + $0x36c] ss:$48 sps:$4 sm:$0xff]  }
 0x274   :  { %2103 = vmatprep.subr.bf16.mxu0 %v9495_v29  ;;  %6040 = vmatpush1.bf16.msra.mxu1 %v9520_v30  ;;  %v9573_v29 = vld [vmem:[#allocation10 + $0x3cc] ss:$48 sps:$4 sm:$0xff]   ;;  %v9571_v30 = vld [vmem:[#allocation10 + $0x3c8] ss:$48 sps:$4 sm:$0xff]  }
 0x275   :  { %6041 = vmatprep.subr.bf16.mxu1 %v9528_v32  ;;  %v9577_v32 = vld [vmem:[#allocation10 + $0x428] ss:$48 sps:$4 sm:$0xff]  }
 0x277   :  { %2104 = vmatpush1.bf16.msra.mxu0 %v9493_v31  ;;  %v9579_v31 = vld [vmem:[#allocation10 + $0x42c] ss:$48 sps:$4 sm:$0xff]  }
 0x278   :  { %2105 = vmatprep.subr.bf16.mxu0 %v9498_v33  ;;  %6042 = vmatpush1.bf16.msra.mxu1 %v9526_v34  ;;  %v9585_v33 = vld [vmem:[#allocation10 + $0x48c] ss:$48 sps:$4 sm:$0xff]   ;;  %v9583_v34 = vld [vmem:[#allocation10 + $0x488] ss:$48 sps:$4 sm:$0xff]  }
 0x279   :  { %6043 = vmatprep.subr.bf16.mxu1 %v9534_v36  ;;  %v9589_v36 = vld [vmem:[#allocation10 + $0x4e8] ss:$48 sps:$4 sm:$0xff]  }
 0x27b   :  { %2106 = vmatpush1.bf16.msra.mxu0 %v9496_v35  ;;  %v9591_v35 = vld [vmem:[#allocation10 + $0x4ec] ss:$48 sps:$4 sm:$0xff]  }
 0x27c   :  { %2107 = vmatprep.subr.bf16.mxu0 %v9501_v37  ;;  %6044 = vmatpush1.bf16.msra.mxu1 %v9532_v38  ;;  %v9597_v37 = vld [vmem:[#allocation10 + $0x54c] ss:$48 sps:$4 sm:$0xff]   ;;  %v9595_v38 = vld [vmem:[#allocation10 + $0x548] ss:$48 sps:$4 sm:$0xff]  }
 0x27d   :  { %6045 = vmatprep.subr.bf16.mxu1 %v9540_v39  ;;  %v9603_v39 = vld [vmem:[#allocation10 + $0x5ac] ss:$48 sps:$4 sm:$0xff]  }
 0x27f   :  { %2108 = vmatpush1.bf16.msra.mxu0 %v9499_v40  ;;  %v9601_v40 = vld [vmem:[#allocation10 + $0x5a8] ss:$48 sps:$4 sm:$0xff]  }
 0x280   :  { %2109 = vmatprep.subr.bf16.mxu0 %v9504_v41  ;;  %6046 = vmatpush1.bf16.msra.mxu1 %v9538_v42  ;;  %v9609_v41 = vld [vmem:[#allocation10 + $0x60c] ss:$48 sps:$4 sm:$0xff]  }
 0x281   :  { %6047 = vmatprep.subr.bf16.mxu1 %v9546_v48  ;;  %v11271_v42 = vld [vmem:[#allocation9] sm:$0x7f] }
 0x282   :  { %v841_v48 = vrot.slane %v11271_v42, %v11203_v45 }
 0x283   :  { %2110 = vmatpush1.bf16.msra.mxu0 %v9502_v49  ;;  %v845_v49 = vrot.slane %v11271_v42, %v11208_v47 }
 0x284   :  { %2111 = vmatprep.subr.bf16.mxu0 %v9507_v50  ;;  %6048 = vmatpush1.bf16.msra.mxu1 %v9544_v51  ;;  %v853_v50 = vrot.slane %v11271_v42, %v11215_v2 }
 0x285   :  { %6049 = vmatprep.subr.bf16.mxu1 %v9552_v52 }
 0x287   :  { %2112 = vmatpush1.bf16.msra.mxu0 %v9505_v53 }
 0x288   :  { %6199 = vmatprep.subr.bf16.mxu0 %v9513_v55  ;;  %6050 = vmatpush1.bf16.msra.mxu1 %v9550_v56 }
 0x289   :  { %6051 = vmatprep.subr.bf16.mxu1 %v9558_v57 }
 0x28a   :  { %2122 = vmatmul.mubr.bf16.vlgmr.msra.gmra.mrb[12].mxu0 %v11245_v14  ;;  %v9574_v14 = vld [vmem:[#allocation10 + $0x420] ss:$48 sps:$4 sm:$0xff]  }
 0x28b   :  { %6200 = vmatpush1.bf16.msra.mxu0 %v9511_v58 }
 0x28c   :  { %6201 = vmatprep.subr.bf16.mxu0 %v9519_v59  ;;  %6052 = vmatpush1.bf16.msra.mxu1 %v9556_v60 }
 0x28d   :  { %6053 = vmatprep.subr.bf16.mxu1 %v9564_v61 }
 0x28f   :  { %6202 = vmatpush1.bf16.msra.mxu0 %v9517_v62 }
 0x290   :  { %6203 = vmatprep.subr.bf16.mxu0 %v9525_v63  ;;  %6054 = vmatpush1.bf16.msra.mxu1 %v9562_v1 }
 0x291   :  { %6055 = vmatprep.subr.bf16.mxu1 %v9570_v44 }
 0x293   :  { %6204 = vmatpush1.bf16.msra.mxu0 %v9523_v5 }
 0x294   :  { %6205 = vmatprep.subr.bf16.mxu0 %v9531_v6  ;;  %6056 = vmatpush1.bf16.msra.mxu1 %v9568_v7  ;;  %v9604_v6 = vld [vmem:[#allocation10 + $0x600] ss:$48 sps:$4 sm:$0xff]   ;;  %v9607_v7 = vld [vmem:[#allocation10 + $0x608] ss:$48 sps:$4 sm:$0xff]  }
 0x295   :  { %6057 = vmatprep.subr.bf16.mxu1 %v9576_v8 }
 0x297   :  { %6206 = vmatpush1.bf16.msra.mxu0 %v9529_v10  ;;  %v9612_v10 = vld [vmem:[#allocation10 + $0x664] ss:$48 sps:$4 sm:$0xff]  }
 0x298   :  { %6207 = vmatprep.subr.bf16.mxu0 %v9537_v11  ;;  %6058 = vmatpush1.bf16.msra.mxu1 %v9574_v14  ;;  %v9615_v11 = vld [vmem:[#allocation10 + $0x66c] ss:$48 sps:$4 sm:$0xff]  }
 0x299   :  { %6059 = vmatprep.subr.bf16.mxu1 %v9582_v12  ;;  %v9610_v12 = vld [vmem:[#allocation10 + $0x660] ss:$48 sps:$4 sm:$0xff]  }
 0x29b   :  { %6208 = vmatpush1.bf16.msra.mxu0 %v9535_v46  ;;  %v9613_v46 = vld [vmem:[#allocation10 + $0x668] ss:$48 sps:$4 sm:$0xff]  }
 0x29c   :  { %6209 = vmatprep.subr.bf16.mxu0 %v9543_v9  ;;  %6060 = vmatpush1.bf16.msra.mxu1 %v9580_v13  ;;  %v9618_v9 = vld [vmem:[#allocation10 + $0x6c4] ss:$48 sps:$4 sm:$0xff]   ;;  %v9621_v13 = vld [vmem:[#allocation10 + $0x6cc] ss:$48 sps:$4 sm:$0xff]  }
 0x29d   :  { %6061 = vmatprep.subr.bf16.mxu1 %v9588_v15  ;;  %v9616_v15 = vld [vmem:[#allocation10 + $0x6c0] ss:$48 sps:$4 sm:$0xff]  }
 0x29f   :  { %6210 = vmatpush1.bf16.msra.mxu0 %v9541_v16  ;;  %v9619_v16 = vld [vmem:[#allocation10 + $0x6c8] ss:$48 sps:$4 sm:$0xff]  }
 0x2a0   :  { %6211 = vmatprep.subr.bf16.mxu0 %v9549_v17  ;;  %6062 = vmatpush1.bf16.msra.mxu1 %v9586_v18  ;;  %v9624_v17 = vld [vmem:[#allocation10 + $0x724] ss:$48 sps:$4 sm:$0xff]   ;;  %v9627_v18 = vld [vmem:[#allocation10 + $0x72c] ss:$48 sps:$4 sm:$0xff]  }
 0x2a1   :  { %6063 = vmatprep.subr.bf16.mxu1 %v9594_v4  ;;  %v9622_v4 = vld [vmem:[#allocation10 + $0x720] ss:$48 sps:$4 sm:$0xff]  }
 0x2a3   :  { %6212 = vmatpush1.bf16.msra.mxu0 %v9547_v19  ;;  %v9625_v19 = vld [vmem:[#allocation10 + $0x728] ss:$48 sps:$4 sm:$0xff]  }
 0x2a4   :  { %6213 = vmatprep.subr.bf16.mxu0 %v9555_v20  ;;  %6064 = vmatpush1.bf16.msra.mxu1 %v9592_v26  ;;  %v9630_v20 = vld [vmem:[#allocation10 + $0x784] ss:$48 sps:$4 sm:$0xff]   ;;  %v9633_v26 = vld [vmem:[#allocation10 + $0x78c] ss:$48 sps:$4 sm:$0xff]  }
 0x2a5   :  { %6065 = vmatprep.subr.bf16.mxu1 %v9600_v21  ;;  %v9628_v21 = vld [vmem:[#allocation10 + $0x780] ss:$48 sps:$4 sm:$0xff]  }
 0x2a7   :  { %6214 = vmatpush1.bf16.msra.mxu0 %v9553_v22  ;;  %v9631_v22 = vld [vmem:[#allocation10 + $0x788] ss:$48 sps:$4 sm:$0xff]  }
 0x2a8   :  { %6215 = vmatprep.subr.bf16.mxu0 %v9561_v23  ;;  %6066 = vmatpush1.bf16.msra.mxu1 %v9598_v24  ;;  %v9636_v23 = vld [vmem:[#allocation10 + $0x7e4] ss:$48 sps:$4 sm:$0xff]   ;;  %v9639_v24 = vld [vmem:[#allocation10 + $0x7ec] ss:$48 sps:$4 sm:$0xff]  }
 0x2a9   :  { %6076 = vmatprep.subr.bf16.mxu1 %v9606_v3  ;;  %v9634_v3 = vld [vmem:[#allocation10 + $0x7e0] ss:$48 sps:$4 sm:$0xff]  }
 0x2ab   :  { %6216 = vmatpush1.bf16.msra.mxu0 %v9559_v25  ;;  %v9637_v25 = vld [vmem:[#allocation10 + $0x7e8] ss:$48 sps:$4 sm:$0xff]  }
 0x2ac   :  { %6217 = vmatprep.subr.bf16.mxu0 %v9567_v27  ;;  %v9642_v27 = vld [vmem:[#allocation10 + $0x844] ss:$48 sps:$4 sm:$0xff]  }
 0x2af   :  { %6218 = vmatpush1.bf16.msra.mxu0 %v9565_v28  ;;  %v9645_v28 = vld [vmem:[#allocation10 + $0x84c] ss:$48 sps:$4 sm:$0xff]  }
 0x2b0   :  { %6219 = vmatprep.subr.bf16.mxu0 %v9573_v29  ;;  %v9640_v29 = vld [vmem:[#allocation10 + $0x840] ss:$48 sps:$4 sm:$0xff]  }
 0x2b3   :  { %6220 = vmatpush1.bf16.msra.mxu0 %v9571_v30  ;;  %v9643_v30 = vld [vmem:[#allocation10 + $0x848] ss:$48 sps:$4 sm:$0xff]  }
 0x2b4   :  { %6221 = vmatprep.subr.bf16.mxu0 %v9579_v31  ;;  %v9648_v31 = vld [vmem:[#allocation10 + $0x8a4] ss:$48 sps:$4 sm:$0xff]  }
 0x2b7   :  { %6222 = vmatpush1.bf16.msra.mxu0 %v9577_v32  ;;  %v9651_v32 = vld [vmem:[#allocation10 + $0x8ac] ss:$48 sps:$4 sm:$0xff]  }
 0x2b8   :  { %6223 = vmatprep.subr.bf16.mxu0 %v9585_v33 }
 0x2bb   :  { %6224 = vmatpush1.bf16.msra.mxu0 %v9583_v34 }
 0x2bc   :  { %6225 = vmatprep.subr.bf16.mxu0 %v9591_v35  ;;  %v9646_v35 = vld [vmem:[#allocation10 + $0x8a0] ss:$48 sps:$4 sm:$0xff]  }
 0x2bf   :  { %6226 = vmatpush1.bf16.msra.mxu0 %v9589_v36  ;;  %v9649_v36 = vld [vmem:[#allocation10 + $0x8a8] ss:$48 sps:$4 sm:$0xff]  }
 0x2c0   :  { %6227 = vmatprep.subr.bf16.mxu0 %v9597_v37 }
 0x2c3   :  { %6228 = vmatpush1.bf16.msra.mxu0 %v9595_v38 }
 0x2c4   :  { %6229 = vmatprep.subr.bf16.mxu0 %v9603_v39  ;;  %v9654_v39 = vld [vmem:[#allocation10 + $0x904] ss:$48 sps:$4 sm:$0xff]  }
 0x2c7   :  { %6230 = vmatpush1.bf16.msra.mxu0 %v9601_v40  ;;  %v9657_v40 = vld [vmem:[#allocation10 + $0x90c] ss:$48 sps:$4 sm:$0xff]  }
 0x2c8   :  { %6240 = vmatprep.subr.bf16.mxu0 %v9609_v41 }
 0x2ed   :  { %v1959_v51 = vpop.f32.mrb[8].mxu0  ;;  %v11279_v52 = vpop.f32.mrb[8].mxu1 }
 0x2ee   :  { %v9028_v53 = vadd.f32 %v1959_v51, %v841_v48  ;;  %v1961_v55 = vpop.f32.mrb[9].mxu0  ;;  %v2043_v56 = vpop.f32.mrb[9].mxu1  ;;  %v9652_v48 = vld [vmem:[#allocation10 + $0x900] ss:$48 sps:$4 sm:$0xff]   ;;  %v9663_v51 = vld [vmem:[#allocation10 + $0x96c] ss:$48 sps:$4 sm:$0xff]  }
 0x2ef   :  { %v9029_v57 = vadd.f32 %v1961_v55, %v845_v49  ;;  %v9031_v58 = vadd.f32 %v2043_v56, %v853_v50  ;;  %v1963_v59 = vpop.f32.mrb[10].mxu0  ;;  %v2045_v60 = vpop.f32.mrb[10].mxu1  ;;  %v9655_v49 = vld [vmem:[#allocation10 + $0x908] ss:$48 sps:$4 sm:$0xff]   ;;  %v9660_v50 = vld [vmem:[#allocation10 + $0x964] ss:$48 sps:$4 sm:$0xff]  }
 0x2f0   :  { %v2210_v61 = vmax.f32 %v9028_v53, 0.0  ;;  %v1964_v62 = vpop.f32.mrb[11].mxu0  ;;  %v2046_v63 = vpop.f32.mrb[11].mxu1  ;;  %v9658_v53 = vld [vmem:[#allocation10 + $0x960] ss:$48 sps:$4 sm:$0xff]  }
 0x2f1   :  { %v2211_v1 = vmax.f32 %v9029_v57, 0.0  ;;  %v2213_v5 = vmax.f32 %v9031_v58, 0.0  ;;  %v9661_v55 = vld [vmem:[#allocation10 + $0x968] ss:$48 sps:$4 sm:$0xff]   ;;  %v9666_v56 = vld [vmem:[#allocation10 + $0x9c4] ss:$48 sps:$4 sm:$0xff]  }
 0x2f2   :  { %v11283_v8 = vpack.c.bf16 %v2210_v61, %v2210_v61  ;;  %v9669_v57 = vld [vmem:[#allocation10 + $0x9cc] ss:$48 sps:$4 sm:$0xff]   ;;  %v9664_v58 = vld [vmem:[#allocation10 + $0x9c0] ss:$48 sps:$4 sm:$0xff]   ;;  %v9667_v59 = vld [vmem:[#allocation10 + $0x9c8] ss:$48 sps:$4 sm:$0xff]  }
 0x2f3   :  { %v11281_v44 = vpack.c.bf16 %v2211_v1, %v2211_v1  ;;  %v11287_v14 = vpack.c.bf16 %v2213_v5, %v2213_v5  ;;  %v9672_v60 = vld [vmem:[#allocation10 + $0xa24] ss:$48 sps:$4 sm:$0xff]   ;;  %v9675_v61 = vld [vmem:[#allocation10 + $0xa2c] ss:$48 sps:$4 sm:$0xff]   ;;  %v9670_v62 = vld [vmem:[#allocation10 + $0xa20] ss:$48 sps:$4 sm:$0xff]  }
 0x2f4   :  { %v9673_v63 = vld [vmem:[#allocation10 + $0xa28] ss:$48 sps:$4 sm:$0xff]   ;;  %v9678_v1 = vld [vmem:[#allocation10 + $0xa84] ss:$48 sps:$4 sm:$0xff]   ;;  %v9681_v5 = vld [vmem:[#allocation10 + $0xa8c] ss:$48 sps:$4 sm:$0xff]  }
 0x2f5   :  { %6067 = vmatprep.mubr.bf16.mxu1 %v11281_v44  ;;  %6231 = vmatprep.mubr.bf16.mxu0 %v11281_v44 }
 0x2f6   :  { %6068 = vmatmul.mubr.bf16.vlgmr.msra.gmra.mrb[20].mxu1 %v11283_v8  ;;  %6232 = vmatmul.mubr.bf16.vlgmr.msra.gmra.mrb[16].mxu0 %v11283_v8 }
 0x2f7   :  { %6077 = vmatpush1.bf16.msra.mxu1 %v9604_v6  ;;  %6241 = vmatpush1.bf16.msra.mxu0 %v9607_v7  ;;  %v9676_v6 = vld [vmem:[#allocation10 + $0xa80] ss:$48 sps:$4 sm:$0xff]   ;;  %v9679_v7 = vld [vmem:[#allocation10 + $0xa88] ss:$48 sps:$4 sm:$0xff]  }
 0x2f8   :  { %6108 = vmatprep.mubr.bf16.mxu1 %v11287_v14  ;;  %6272 = vmatprep.mubr.bf16.mxu0 %v11287_v14 }
 0x2f9   :  { %6078 = vmatprep.subr.bf16.mxu1 %v9612_v10  ;;  %6242 = vmatprep.subr.bf16.mxu0 %v9615_v11  ;;  %v9684_v10 = vld [vmem:[#allocation10 + $0xae4] ss:$48 sps:$4 sm:$0xff]   ;;  %v9687_v11 = vld [vmem:[#allocation10 + $0xaec] ss:$48 sps:$4 sm:$0xff]  }
 0x2fb   :  { %6079 = vmatpush1.bf16.msra.mxu1 %v9610_v12  ;;  %6243 = vmatpush1.bf16.msra.mxu0 %v9613_v46  ;;  %v9682_v12 = vld [vmem:[#allocation10 + $0xae0] ss:$48 sps:$4 sm:$0xff]   ;;  %v9685_v46 = vld [vmem:[#allocation10 + $0xae8] ss:$48 sps:$4 sm:$0xff]  }
 0x2fc   :  { %6080 = vmatprep.subr.bf16.mxu1 %v9618_v9  ;;  %6244 = vmatprep.subr.bf16.mxu0 %v9621_v13  ;;  %v849_v9 = vrot.slane %v11271_v42, %v11238_v54  ;;  %v9690_v13 = vld [vmem:[#allocation10 + $0xb44] ss:$48 sps:$4 sm:$0xff]  }
 0x2ff   :  { %6081 = vmatpush1.bf16.msra.mxu1 %v9616_v15  ;;  %6245 = vmatpush1.bf16.msra.mxu0 %v9619_v16  ;;  %v9693_v15 = vld [vmem:[#allocation10 + $0xb4c] ss:$48 sps:$4 sm:$0xff]   ;;  %v9688_v16 = vld [vmem:[#allocation10 + $0xb40] ss:$48 sps:$4 sm:$0xff]  }
 0x300   :  { %6082 = vmatprep.subr.bf16.mxu1 %v9624_v17  ;;  %6246 = vmatprep.subr.bf16.mxu0 %v9627_v18  ;;  %v9691_v17 = vld [vmem:[#allocation10 + $0xb48] ss:$48 sps:$4 sm:$0xff]   ;;  %v9030_v18 = vadd.f32 %v11279_v52, %v849_v9  ;;  %v9708_v52 = vld [vmem:[#allocation10 + $0xc64] ss:$48 sps:$4 sm:$0xff]   ;;  %v9748_v9 = vld [vmem:[#allocation10 + $0xf00] ss:$48 sps:$4 sm:$0xff]  }
 0x303   :  { %6083 = vmatpush1.bf16.msra.mxu1 %v9622_v4  ;;  %6247 = vmatpush1.bf16.msra.mxu0 %v9625_v19  ;;  %v9696_v4 = vld [vmem:[#allocation10 + $0xba4] ss:$48 sps:$4 sm:$0xff]   ;;  %v9699_v19 = vld [vmem:[#allocation10 + $0xbac] ss:$48 sps:$4 sm:$0xff]  }
 0x304   :  { %6084 = vmatprep.subr.bf16.mxu1 %v9630_v20  ;;  %6248 = vmatprep.subr.bf16.mxu0 %v9633_v26  ;;  %v9694_v20 = vld [vmem:[#allocation10 + $0xba0] ss:$48 sps:$4 sm:$0xff]   ;;  %v9697_v26 = vld [vmem:[#allocation10 + $0xba8] ss:$48 sps:$4 sm:$0xff]  }
 0x307   :  { %6085 = vmatpush1.bf16.msra.mxu1 %v9628_v21  ;;  %6249 = vmatpush1.bf16.msra.mxu0 %v9631_v22  ;;  %v2212_v21 = vmax.f32 %v9030_v18, 0.0  ;;  %v9702_v22 = vld [vmem:[#allocation10 + $0xc04] ss:$48 sps:$4 sm:$0xff]   ;;  %v9757_v18 = vld [vmem:[#allocation10 + $0xf68] ss:$48 sps:$4 sm:$0xff]  }
 0x308   :  { %6086 = vmatprep.subr.bf16.mxu1 %v9636_v23  ;;  %6250 = vmatprep.subr.bf16.mxu0 %v9639_v24  ;;  %v9705_v23 = vld [vmem:[#allocation10 + $0xc0c] ss:$48 sps:$4 sm:$0xff]   ;;  %v9700_v24 = vld [vmem:[#allocation10 + $0xc00] ss:$48 sps:$4 sm:$0xff]  }
 0x30b   :  { %6087 = vmatpush1.bf16.msra.mxu1 %v9634_v3  ;;  %6251 = vmatpush1.bf16.msra.mxu0 %v9637_v25  ;;  %v9703_v3 = vld [vmem:[#allocation10 + $0xc08] ss:$48 sps:$4 sm:$0xff]   ;;  %v11298_v25 = vpack.c.bf16 %v2212_v21, %v2212_v21 }
 0x30c   :  { %6088 = vmatprep.subr.bf16.mxu1 %v9642_v27  ;;  %6252 = vmatprep.subr.bf16.mxu0 %v9645_v28  ;;  %v9711_v27 = vld [vmem:[#allocation10 + $0xc6c] ss:$48 sps:$4 sm:$0xff]   ;;  %v864_v28 = vsub.s32 6, %v11198_v43  ;;  %v9763_v21 = vld [vmem:[#allocation10 + $0xfc8] ss:$48 sps:$4 sm:$0xff]  }
 0x30e   :  { %v9000_v33 = vpop.f32.mrb[12].mxu1 }
 0x30f   :  { %v9001_v34 = vpop.f32.mrb[13].mxu1  ;;  %6089 = vmatpush1.bf16.msra.mxu1 %v9640_v29  ;;  %6253 = vmatpush1.bf16.msra.mxu0 %v9643_v30  ;;  %v9706_v29 = vld [vmem:[#allocation10 + $0xc60] ss:$48 sps:$4 sm:$0xff]   ;;  %v9709_v30 = vld [vmem:[#allocation10 + $0xc68] ss:$48 sps:$4 sm:$0xff]  }
 0x310   :  { %v11293_v37 = vadd.f32 %v9001_v34, %v9000_v33  ;;  %v9003_v38 = vpop.f32.mrb[14].mxu1  ;;  %6090 = vmatprep.subr.bf16.mxu1 %v9648_v31  ;;  %6254 = vmatprep.subr.bf16.mxu0 %v9651_v32  ;;  %v9714_v31 = vld [vmem:[#allocation10 + $0xcc4] ss:$48 sps:$4 sm:$0xff]   ;;  %v9717_v32 = vld [vmem:[#allocation10 + $0xccc] ss:$48 sps:$4 sm:$0xff]   ;;  %v865_v33 = vrot.slane %v11271_v42, %v864_v28 }
 0x311   :  { %v9004_v41 = vpop.f32.mrb[15].mxu1  ;;  %v9712_v34 = vld [vmem:[#allocation10 + $0xcc0] ss:$48 sps:$4 sm:$0xff]   ;;  %v9723_v38 = vld [vmem:[#allocation10 + $0xd2c] ss:$48 sps:$4 sm:$0xff]  }
 0x313   :  { %6091 = vmatpush1.bf16.msra.mxu1 %v9646_v35  ;;  %6255 = vmatpush1.bf16.msra.mxu0 %v9649_v36  ;;  %v9715_v35 = vld [vmem:[#allocation10 + $0xcc8] ss:$48 sps:$4 sm:$0xff]   ;;  %v9720_v36 = vld [vmem:[#allocation10 + $0xd24] ss:$48 sps:$4 sm:$0xff]  }
 0x314   :  { %6092 = vmatprep.subr.bf16.mxu1 %v9654_v39  ;;  %6256 = vmatprep.subr.bf16.mxu0 %v9657_v40  ;;  %v2165_v39 = vadd.f32 %v11293_v37, %v865_v33  ;;  %v9732_v37 = vld [vmem:[#allocation10 + $0xde4] ss:$48 sps:$4 sm:$0xff]  }
 0x315   :  { %v9774_v33 = vld [vmem:[#allocation10 + $0x1084] ss:$48 sps:$4 sm:$0xff]  }
 0x317   :  { %6093 = vmatpush1.bf16.msra.mxu1 %v9652_v48  ;;  %6257 = vmatpush1.bf16.msra.mxu0 %v9655_v49  ;;  %v9718_v49 = vld [vmem:[#allocation10 + $0xd20] ss:$48 sps:$4 sm:$0xff]  }
 0x318   :  { %6094 = vmatprep.subr.bf16.mxu1 %v9660_v50  ;;  %6258 = vmatprep.subr.bf16.mxu0 %v9663_v51  ;;  %v9721_v50 = vld [vmem:[#allocation10 + $0xd28] ss:$48 sps:$4 sm:$0xff]  }
 0x31b   :  { %6095 = vmatpush1.bf16.msra.mxu1 %v9658_v53  ;;  %6259 = vmatpush1.bf16.msra.mxu0 %v9661_v55  ;;  %v9726_v53 = vld [vmem:[#allocation10 + $0xd84] ss:$48 sps:$4 sm:$0xff]   ;;  %v9729_v55 = vld [vmem:[#allocation10 + $0xd8c] ss:$48 sps:$4 sm:$0xff]  }
 0x31c   :  { %6096 = vmatprep.subr.bf16.mxu1 %v9666_v56  ;;  %6260 = vmatprep.subr.bf16.mxu0 %v9669_v57  ;;  %v9724_v57 = vld [vmem:[#allocation10 + $0xd80] ss:$48 sps:$4 sm:$0xff]  }
 0x31f   :  { %6097 = vmatpush1.bf16.msra.mxu1 %v9664_v58  ;;  %6261 = vmatpush1.bf16.msra.mxu0 %v9667_v59  ;;  %v9727_v58 = vld [vmem:[#allocation10 + $0xd88] ss:$48 sps:$4 sm:$0xff]   ;;  %v9735_v59 = vld [vmem:[#allocation10 + $0xdec] ss:$48 sps:$4 sm:$0xff]  }
 0x320   :  { %6098 = vmatprep.subr.bf16.mxu1 %v9672_v60  ;;  %6262 = vmatprep.subr.bf16.mxu0 %v9675_v61  ;;  %v9730_v60 = vld [vmem:[#allocation10 + $0xde0] ss:$48 sps:$4 sm:$0xff]   ;;  %v9733_v61 = vld [vmem:[#allocation10 + $0xde8] ss:$48 sps:$4 sm:$0xff]  }
 0x323   :  { %6099 = vmatpush1.bf16.msra.mxu1 %v9670_v62  ;;  %6263 = vmatpush1.bf16.msra.mxu0 %v9673_v63  ;;  %v9738_v62 = vld [vmem:[#allocation10 + $0xe44] ss:$48 sps:$4 sm:$0xff]   ;;  %v9741_v63 = vld [vmem:[#allocation10 + $0xe4c] ss:$48 sps:$4 sm:$0xff]  }
 0x324   :  { %6100 = vmatprep.subr.bf16.mxu1 %v9678_v1  ;;  %6264 = vmatprep.subr.bf16.mxu0 %v9681_v5  ;;  %v9736_v1 = vld [vmem:[#allocation10 + $0xe40] ss:$48 sps:$4 sm:$0xff]   ;;  %v9739_v5 = vld [vmem:[#allocation10 + $0xe48] ss:$48 sps:$4 sm:$0xff]  }
 0x327   :  { %6101 = vmatpush1.bf16.msra.mxu1 %v9676_v6  ;;  %6265 = vmatpush1.bf16.msra.mxu0 %v9679_v7  ;;  %v9744_v6 = vld [vmem:[#allocation10 + $0xea4] ss:$48 sps:$4 sm:$0xff]   ;;  %v9747_v7 = vld [vmem:[#allocation10 + $0xeac] ss:$48 sps:$4 sm:$0xff]  }
 0x328   :  { %6102 = vmatprep.subr.bf16.mxu1 %v9684_v10  ;;  %6266 = vmatprep.subr.bf16.mxu0 %v9687_v11  ;;  %v9742_v10 = vld [vmem:[#allocation10 + $0xea0] ss:$48 sps:$4 sm:$0xff]   ;;  %v9745_v11 = vld [vmem:[#allocation10 + $0xea8] ss:$48 sps:$4 sm:$0xff]  }
 0x32b   :  { %6103 = vmatpush1.bf16.msra.mxu1 %v9682_v12  ;;  %6267 = vmatpush1.bf16.msra.mxu0 %v9685_v46  ;;  %v9750_v12 = vld [vmem:[#allocation10 + $0xf04] ss:$48 sps:$4 sm:$0xff]   ;;  %v9753_v46 = vld [vmem:[#allocation10 + $0xf0c] ss:$48 sps:$4 sm:$0xff]  }
 0x32c   :  { %6104 = vmatprep.subr.bf16.mxu1 %v9690_v13  ;;  %6268 = vmatprep.subr.bf16.mxu0 %v9693_v15  ;;  %v9751_v13 = vld [vmem:[#allocation10 + $0xf08] ss:$48 sps:$4 sm:$0xff]   ;;  %v9756_v15 = vld [vmem:[#allocation10 + $0xf64] ss:$48 sps:$4 sm:$0xff]  }
 0x32f   :  { %6105 = vmatpush1.bf16.msra.mxu1 %v9688_v16  ;;  %6269 = vmatpush1.bf16.msra.mxu0 %v9691_v17  ;;  %v9759_v16 = vld [vmem:[#allocation10 + $0xf6c] ss:$48 sps:$4 sm:$0xff]   ;;  %v9754_v17 = vld [vmem:[#allocation10 + $0xf60] ss:$48 sps:$4 sm:$0xff]  }
 0x330   :  { %6106 = vmatprep.subr.bf16.mxu1 %v9696_v4  ;;  %6270 = vmatprep.subr.bf16.mxu0 %v9699_v19  ;;  %v860_v4 = vsub.s32 5, %v11198_v43  ;;  %v9762_v19 = vld [vmem:[#allocation10 + $0xfc4] ss:$48 sps:$4 sm:$0xff]  }
 0x333   :  { %6107 = vmatpush1.bf16.msra.mxu1 %v9694_v20  ;;  %6271 = vmatpush1.bf16.msra.mxu0 %v9697_v26  ;;  %v9765_v20 = vld [vmem:[#allocation10 + $0xfcc] ss:$48 sps:$4 sm:$0xff]   ;;  %v9760_v26 = vld [vmem:[#allocation10 + $0xfc0] ss:$48 sps:$4 sm:$0xff]  }
 0x334   :  { %6117 = vmatprep.subr.bf16.mxu1 %v9702_v22  ;;  %6281 = vmatprep.subr.bf16.mxu0 %v9705_v23  ;;  %v861_v22 = vrot.slane %v11271_v42, %v860_v4  ;;  %v9768_v23 = vld [vmem:[#allocation10 + $0x1024] ss:$48 sps:$4 sm:$0xff]  }
 0x336   :  { %6109 = vmatmul.mubr.bf16.vlgmr.msra.gmra.mrb[20].mxu1 %v11298_v25  ;;  %6273 = vmatmul.mubr.bf16.vlgmr.msra.gmra.mrb[16].mxu0 %v11298_v25 }
 0x337   :  { %6118 = vmatpush1.bf16.msra.mxu1 %v9700_v24  ;;  %6282 = vmatpush1.bf16.msra.mxu0 %v9703_v3  ;;  %v9771_v24 = vld [vmem:[#allocation10 + $0x102c] ss:$48 sps:$4 sm:$0xff]  }
 0x338   :  { %6119 = vmatprep.subr.bf16.mxu1 %v9708_v52  ;;  %6283 = vmatprep.subr.bf16.mxu0 %v9711_v27 }
 0x33b   :  { %6120 = vmatpush1.bf16.msra.mxu1 %v9706_v29  ;;  %6284 = vmatpush1.bf16.msra.mxu0 %v9709_v30  ;;  %v9766_v30 = vld [vmem:[#allocation10 + $0x1020] ss:$48 sps:$4 sm:$0xff]  }
 0x33c   :  { %6121 = vmatprep.subr.bf16.mxu1 %v9714_v31  ;;  %6285 = vmatprep.subr.bf16.mxu0 %v9717_v32  ;;  %v9769_v31 = vld [vmem:[#allocation10 + $0x1028] ss:$48 sps:$4 sm:$0xff]  }
 0x33e   :  { %v2204_v40 = vpop.f32.mrb[16].mxu1 }
 0x33f   :  { %v11307_v41 = vadd.f32 %v2204_v40, %v2165_v39  ;;  %v2206_v48 = vpop.f32.mrb[17].mxu1  ;;  %6122 = vmatpush1.bf16.msra.mxu1 %v9712_v34  ;;  %6286 = vmatpush1.bf16.msra.mxu0 %v9715_v35  ;;  %v9777_v34 = vld [vmem:[#allocation10 + $0x108c] ss:$48 sps:$4 sm:$0xff]   ;;  %v9775_v39 = vld [vmem:[#allocation10 + $0x1088] ss:$48 sps:$4 sm:$0xff]   ;;  %v856_v40 = vsub.s32 4, %v11198_v43 }
 0x340   :  { %v2207_v51 = vpop.f32.mrb[18].mxu1  ;;  %6123 = vmatprep.subr.bf16.mxu1 %v9720_v36  ;;  %6287 = vmatprep.subr.bf16.mxu0 %v9723_v38  ;;  %v9772_v38 = vld [vmem:[#allocation10 + $0x1080] ss:$48 sps:$4 sm:$0xff]   ;;  %v9780_v48 = vld [vmem:[#allocation10 + $0x10e4] ss:$48 sps:$4 sm:$0xff]  }
 0x341   :  { %v2208_v56 = vpop.f32.mrb[19].mxu1  ;;  %v9781_v51 = vld [vmem:[#allocation10 + $0x10e8] ss:$48 sps:$4 sm:$0xff]  }
 0x342   :  { %v9789_v56 = vld [vmem:[#allocation10 + $0x114c] ss:$48 sps:$4 sm:$0xff]  }
 0x343   :  { %6124 = vmatpush1.bf16.msra.mxu1 %v9718_v49  ;;  %6288 = vmatpush1.bf16.msra.mxu0 %v9721_v50  ;;  %v9783_v49 = vld [vmem:[#allocation10 + $0x10ec] ss:$48 sps:$4 sm:$0xff]   ;;  %v9778_v50 = vld [vmem:[#allocation10 + $0x10e0] ss:$48 sps:$4 sm:$0xff]  }
 0x344   :  { %6125 = vmatprep.subr.bf16.mxu1 %v9726_v53  ;;  %6289 = vmatprep.subr.bf16.mxu0 %v9729_v55  ;;  %v857_v53 = vrot.slane %v11271_v42, %v856_v40  ;;  %v9786_v55 = vld [vmem:[#allocation10 + $0x1144] ss:$48 sps:$4 sm:$0xff]  }
 0x345   :  { %v9798_v42 = vld [vmem:[#allocation10 + $0x1204] ss:$48 sps:$4 sm:$0xff]  }
 0x347   :  { %6126 = vmatpush1.bf16.msra.mxu1 %v9724_v57  ;;  %6290 = vmatpush1.bf16.msra.mxu0 %v9727_v58  ;;  %v9784_v57 = vld [vmem:[#allocation10 + $0x1140] ss:$48 sps:$4 sm:$0xff]   ;;  %v9787_v58 = vld [vmem:[#allocation10 + $0x1148] ss:$48 sps:$4 sm:$0xff]  }
 0x348   :  { %6127 = vmatprep.subr.bf16.mxu1 %v9732_v37  ;;  %6291 = vmatprep.subr.bf16.mxu0 %v9735_v59  ;;  %v9792_v59 = vld [vmem:[#allocation10 + $0x11a4] ss:$48 sps:$4 sm:$0xff]  }
 0x34b   :  { %6128 = vmatpush1.bf16.msra.mxu1 %v9730_v60  ;;  %6292 = vmatpush1.bf16.msra.mxu0 %v9733_v61  ;;  %v9795_v60 = vld [vmem:[#allocation10 + $0x11ac] ss:$48 sps:$4 sm:$0xff]   ;;  %v9790_v61 = vld [vmem:[#allocation10 + $0x11a0] ss:$48 sps:$4 sm:$0xff]  }
 0x34c   :  { %6129 = vmatprep.subr.bf16.mxu1 %v9738_v62  ;;  %6293 = vmatprep.subr.bf16.mxu0 %v9741_v63  ;;  %v9793_v62 = vld [vmem:[#allocation10 + $0x11a8] ss:$48 sps:$4 sm:$0xff]  }
 0x34f   :  { %6130 = vmatpush1.bf16.msra.mxu1 %v9736_v1  ;;  %6294 = vmatpush1.bf16.msra.mxu0 %v9739_v5  ;;  %v9801_v1 = vld [vmem:[#allocation10 + $0x120c] ss:$48 sps:$4 sm:$0xff]   ;;  %v9796_v5 = vld [vmem:[#allocation10 + $0x1200] ss:$48 sps:$4 sm:$0xff]  }
 0x350   :  { %6131 = vmatprep.subr.bf16.mxu1 %v9744_v6  ;;  %6295 = vmatprep.subr.bf16.mxu0 %v9747_v7  ;;  %v9799_v6 = vld [vmem:[#allocation10 + $0x1208] ss:$48 sps:$4 sm:$0xff]  }
 0x353   :  { %6132 = vmatpush1.bf16.msra.mxu1 %v9742_v10  ;;  %6296 = vmatpush1.bf16.msra.mxu0 %v9745_v11  ;;  %v9804_v10 = vld [vmem:[#allocation10 + $0x1264] ss:$48 sps:$4 sm:$0xff]   ;;  %v9807_v11 = vld [vmem:[#allocation10 + $0x126c] ss:$48 sps:$4 sm:$0xff]  }
 0x354   :  { %6133 = vmatprep.subr.bf16.mxu1 %v9750_v12  ;;  %6297 = vmatprep.subr.bf16.mxu0 %v9753_v46  ;;  %v9802_v12 = vld [vmem:[#allocation10 + $0x1260] ss:$48 sps:$4 sm:$0xff]   ;;  %v9805_v46 = vld [vmem:[#allocation10 + $0x1268] ss:$48 sps:$4 sm:$0xff]  }
 0x357   :  { %6134 = vmatpush1.bf16.msra.mxu1 %v9748_v9  ;;  %6298 = vmatpush1.bf16.msra.mxu0 %v9751_v13  ;;  %v9810_v9 = vld [vmem:[#allocation10 + $0x12c4] ss:$48 sps:$4 sm:$0xff]   ;;  %v9813_v13 = vld [vmem:[#allocation10 + $0x12cc] ss:$48 sps:$4 sm:$0xff]  }
 0x358   :  { %6135 = vmatprep.subr.bf16.mxu1 %v9756_v15  ;;  %6299 = vmatprep.subr.bf16.mxu0 %v9759_v16  ;;  %v9808_v15 = vld [vmem:[#allocation10 + $0x12c0] ss:$48 sps:$4 sm:$0xff]   ;;  %v9811_v16 = vld [vmem:[#allocation10 + $0x12c8] ss:$48 sps:$4 sm:$0xff]  }
 0x35b   :  { %6136 = vmatpush1.bf16.msra.mxu1 %v9754_v17  ;;  %6300 = vmatpush1.bf16.msra.mxu0 %v9757_v18  ;;  %v9816_v17 = vld [vmem:[#allocation10 + $0x1324] ss:$48 sps:$4 sm:$0xff]   ;;  %v9819_v18 = vld [vmem:[#allocation10 + $0x132c] ss:$48 sps:$4 sm:$0xff]  }
 0x35c   :  { %6137 = vmatprep.subr.bf16.mxu1 %v9762_v19  ;;  %6301 = vmatprep.subr.bf16.mxu0 %v9765_v20  ;;  %v9814_v19 = vld [vmem:[#allocation10 + $0x1320] ss:$48 sps:$4 sm:$0xff]   ;;  %v9817_v20 = vld [vmem:[#allocation10 + $0x1328] ss:$48 sps:$4 sm:$0xff]  }
 0x35d   :  { %v2123_v3 = vpop.f32.mrb[12].mxu0 }
 0x35e   :  { %v2125_v52 = vpop.f32.mrb[13].mxu0  ;;  %v9032_v37 = vadd.f32 %v2123_v3, %v857_v53  ;;  %v9823_v3 = vld [vmem:[#allocation10 + $0x18] ss:$48 sps:$4 sm:$0xff]   ;;  %v9852_v53 = vld [vmem:[#allocation10 + $0x1f4] ss:$48 sps:$4 sm:$0xff]  }
 0x35f   :  { %v9033_v27 = vadd.f32 %v2125_v52, %v861_v22  ;;  %6138 = vmatpush1.bf16.msra.mxu1 %v9760_v26  ;;  %6302 = vmatpush1.bf16.msra.mxu0 %v9763_v21  ;;  %v2127_v29 = vpop.f32.mrb[14].mxu0  ;;  %v2216_v26 = vmax.f32 %v11307_v41, 0.0  ;;  %v9822_v21 = vld [vmem:[#allocation10 + $0x14] ss:$48 sps:$4 sm:$0xff]   ;;  %v9825_v22 = vld [vmem:[#allocation10 + $0x1c] ss:$48 sps:$4 sm:$0xff]  }
 0x360   :  { %v2128_v32 = vpop.f32.mrb[15].mxu0  ;;  %6139 = vmatprep.subr.bf16.mxu1 %v9768_v23  ;;  %6303 = vmatprep.subr.bf16.mxu0 %v9771_v24  ;;  %v2214_v63 = vmax.f32 %v9032_v37, 0.0  ;;  %v9820_v23 = vld [vmem:[#allocation10 + $0x10] ss:$48 sps:$4 sm:$0xff]   ;;  %v9828_v52 = vld [vmem:[#allocation10 + $0x74] ss:$48 sps:$4 sm:$0xff]  }
 0x361   :  { %v2215_v35 = vmax.f32 %v9033_v27, 0.0  ;;  %v11328_v24 = vpack.c.bf16 %v2216_v26, %v2216_v26  ;;  %v9831_v27 = vld [vmem:[#allocation10 + $0x7c] ss:$48 sps:$4 sm:$0xff]   ;;  %v9826_v41 = vld [vmem:[#allocation10 + $0x70] ss:$48 sps:$4 sm:$0xff]  }
 0x362   :  { %v11321_v7 = vpack.c.bf16 %v2214_v63, %v2214_v63  ;;  %v9829_v29 = vld [vmem:[#allocation10 + $0x78] ss:$48 sps:$4 sm:$0xff]   ;;  %v9832_v32 = vld [vmem:[#allocation10 + $0xd0] ss:$48 sps:$4 sm:$0xff]   ;;  %v9861_v37 = vld [vmem:[#allocation10 + $0x25c] ss:$48 sps:$4 sm:$0xff]  }
 0x363   :  { %v11313_v36 = vpack.c.bf16 %v2215_v35, %v2215_v35  ;;  %6140 = vmatpush1.bf16.msra.mxu1 %v9766_v30  ;;  %6304 = vmatpush1.bf16.msra.mxu0 %v9769_v31  ;;  %v9834_v30 = vld [vmem:[#allocation10 + $0xd4] ss:$48 sps:$4 sm:$0xff]   ;;  %v9837_v31 = vld [vmem:[#allocation10 + $0xdc] ss:$48 sps:$4 sm:$0xff]   ;;  %v9862_v63 = vld [vmem:[#allocation10 + $0x2b0] ss:$48 sps:$4 sm:$0xff]  }
 0x364   :  { %6141 = vmatprep.subr.bf16.mxu1 %v9774_v33  ;;  %6305 = vmatprep.subr.bf16.mxu0 %v9777_v34  ;;  %v9835_v33 = vld [vmem:[#allocation10 + $0xd8] ss:$48 sps:$4 sm:$0xff]   ;;  %v9840_v34 = vld [vmem:[#allocation10 + $0x134] ss:$48 sps:$4 sm:$0xff]   ;;  %v9843_v35 = vld [vmem:[#allocation10 + $0x13c] ss:$48 sps:$4 sm:$0xff]  }
 0x365   :  { %6149 = vmatprep.mubr.bf16.mxu1 %v11313_v36  ;;  %6313 = vmatprep.mubr.bf16.mxu0 %v11313_v36  ;;  %v9889_v26 = vld [vmem:[#allocation10 + $0x438] ss:$48 sps:$4 sm:$0xff]  }
 0x367   :  { %6142 = vmatpush1.bf16.msra.mxu1 %v9772_v38  ;;  %6306 = vmatpush1.bf16.msra.mxu0 %v9775_v39  ;;  %v9838_v38 = vld [vmem:[#allocation10 + $0x130] ss:$48 sps:$4 sm:$0xff]   ;;  %v9841_v39 = vld [vmem:[#allocation10 + $0x138] ss:$48 sps:$4 sm:$0xff]  }
 0x368   :  { %6143 = vmatprep.subr.bf16.mxu1 %v9780_v48  ;;  %6307 = vmatprep.subr.bf16.mxu0 %v9783_v49  ;;  %v9846_v48 = vld [vmem:[#allocation10 + $0x194] ss:$48 sps:$4 sm:$0xff]   ;;  %v9849_v49 = vld [vmem:[#allocation10 + $0x19c] ss:$48 sps:$4 sm:$0xff]  }
 0x36b   :  { %6144 = vmatpush1.bf16.msra.mxu1 %v9778_v50  ;;  %6308 = vmatpush1.bf16.msra.mxu0 %v9781_v51  ;;  %v9844_v50 = vld [vmem:[#allocation10 + $0x190] ss:$48 sps:$4 sm:$0xff]   ;;  %v9847_v51 = vld [vmem:[#allocation10 + $0x198] ss:$48 sps:$4 sm:$0xff]  }
 0x36c   :  { %6145 = vmatprep.subr.bf16.mxu1 %v9786_v55  ;;  %6309 = vmatprep.subr.bf16.mxu0 %v9789_v56  ;;  %v9855_v55 = vld [vmem:[#allocation10 + $0x1fc] ss:$48 sps:$4 sm:$0xff]   ;;  %v9850_v56 = vld [vmem:[#allocation10 + $0x1f0] ss:$48 sps:$4 sm:$0xff]  }
 0x36f   :  { %6146 = vmatpush1.bf16.msra.mxu1 %v9784_v57  ;;  %6310 = vmatpush1.bf16.msra.mxu0 %v9787_v58  ;;  %v9853_v57 = vld [vmem:[#allocation10 + $0x1f8] ss:$48 sps:$4 sm:$0xff]   ;;  %v9858_v58 = vld [vmem:[#allocation10 + $0x254] ss:$48 sps:$4 sm:$0xff]  }
 0x370   :  { %6147 = vmatprep.subr.bf16.mxu1 %v9792_v59  ;;  %6311 = vmatprep.subr.bf16.mxu0 %v9795_v60  ;;  %v9856_v59 = vld [vmem:[#allocation10 + $0x250] ss:$48 sps:$4 sm:$0xff]   ;;  %v9859_v60 = vld [vmem:[#allocation10 + $0x258] ss:$48 sps:$4 sm:$0xff]  }
 0x373   :  { %6148 = vmatpush1.bf16.msra.mxu1 %v9790_v61  ;;  %6312 = vmatpush1.bf16.msra.mxu0 %v9793_v62  ;;  %v9864_v61 = vld [vmem:[#allocation10 + $0x2b4] ss:$48 sps:$4 sm:$0xff]   ;;  %v9867_v62 = vld [vmem:[#allocation10 + $0x2bc] ss:$48 sps:$4 sm:$0xff]  }
 0x374   :  { %6158 = vmatprep.subr.bf16.mxu1 %v9798_v42  ;;  %6322 = vmatprep.subr.bf16.mxu0 %v9801_v1  ;;  %v9865_v42 = vld [vmem:[#allocation10 + $0x2b8] ss:$48 sps:$4 sm:$0xff]   ;;  %v9870_v1 = vld [vmem:[#allocation10 + $0x314] ss:$48 sps:$4 sm:$0xff]  }
 0x376   :  { %6150 = vmatmul.mubr.bf16.vlgmr.msra.gmra.mrb[20].mxu1 %v11321_v7  ;;  %6314 = vmatmul.mubr.bf16.vlgmr.msra.gmra.mrb[16].mxu0 %v11321_v7 }
 0x377   :  { %6159 = vmatpush1.bf16.msra.mxu1 %v9796_v5  ;;  %6323 = vmatpush1.bf16.msra.mxu0 %v9799_v6  ;;  %v9873_v5 = vld [vmem:[#allocation10 + $0x31c] ss:$48 sps:$4 sm:$0xff]   ;;  %v9868_v6 = vld [vmem:[#allocation10 + $0x310] ss:$48 sps:$4 sm:$0xff]  }
 0x378   :  { %6160 = vmatprep.subr.bf16.mxu1 %v9804_v10  ;;  %6324 = vmatprep.subr.bf16.mxu0 %v9807_v11  ;;  %v9871_v10 = vld [vmem:[#allocation10 + $0x318] ss:$48 sps:$4 sm:$0xff]   ;;  %v9876_v11 = vld [vmem:[#allocation10 + $0x374] ss:$48 sps:$4 sm:$0xff]  }
 0x379   :  { %6190 = vmatprep.mubr.bf16.mxu1 %v10927_v0  ;;  %6354 = vmatprep.mubr.bf16.mxu0 %v10927_v0 }
 0x37b   :  { %6161 = vmatpush1.bf16.msra.mxu1 %v9802_v12  ;;  %6325 = vmatpush1.bf16.msra.mxu0 %v9805_v46  ;;  %v9879_v12 = vld [vmem:[#allocation10 + $0x37c] ss:$48 sps:$4 sm:$0xff]   ;;  %v9874_v46 = vld [vmem:[#allocation10 + $0x370] ss:$48 sps:$4 sm:$0xff]  }
 0x37c   :  { %6162 = vmatprep.subr.bf16.mxu1 %v9810_v9  ;;  %6326 = vmatprep.subr.bf16.mxu0 %v9813_v13  ;;  %v9877_v9 = vld [vmem:[#allocation10 + $0x378] ss:$48 sps:$4 sm:$0xff]   ;;  %v9882_v13 = vld [vmem:[#allocation10 + $0x3d4] ss:$48 sps:$4 sm:$0xff]  }
 0x37f   :  { %6163 = vmatpush1.bf16.msra.mxu1 %v9808_v15  ;;  %6327 = vmatpush1.bf16.msra.mxu0 %v9811_v16  ;;  %v9885_v15 = vld [vmem:[#allocation10 + $0x3dc] ss:$48 sps:$4 sm:$0xff]   ;;  %v9880_v16 = vld [vmem:[#allocation10 + $0x3d0] ss:$48 sps:$4 sm:$0xff]  }
 0x380   :  { %6164 = vmatprep.subr.bf16.mxu1 %v9816_v17  ;;  %6328 = vmatprep.subr.bf16.mxu0 %v9819_v18  ;;  %v9883_v17 = vld [vmem:[#allocation10 + $0x3d8] ss:$48 sps:$4 sm:$0xff]   ;;  %v9888_v18 = vld [vmem:[#allocation10 + $0x434] ss:$48 sps:$4 sm:$0xff]  }
 0x383   :  { %6165 = vmatpush1.bf16.msra.mxu1 %v9814_v19  ;;  %6329 = vmatpush1.bf16.msra.mxu0 %v9817_v20  ;;  %v9891_v19 = vld [vmem:[#allocation10 + $0x43c] ss:$48 sps:$4 sm:$0xff]   ;;  %v9886_v20 = vld [vmem:[#allocation10 + $0x430] ss:$48 sps:$4 sm:$0xff]  }
 0x384   :  { %6363 = vmatprep.subr.bf16.mxu1 %v9822_v21  ;;  %6527 = vmatprep.subr.bf16.mxu0 %v9825_v22  ;;  %v9894_v21 = vld [vmem:[#allocation10 + $0x494] ss:$48 sps:$4 sm:$0xff]   ;;  %v9897_v22 = vld [vmem:[#allocation10 + $0x49c] ss:$48 sps:$4 sm:$0xff]  }
 0x386   :  { %8865 = vmatmul.mubr.msk.bf16.vlgmr.msra.gmra.mrb[20].mxu1 %vm310_vm0, %v11328_v24  ;;  %8866 = vmatmul.mubr.msk.bf16.vlgmr.msra.gmra.mrb[16].mxu0 %vm310_vm0, %v11328_v24 }
 0x387   :  { %6364 = vmatpush1.bf16.msra.mxu1 %v9820_v23  ;;  %6395 = vmatprep.mubr.bf16.mxu1 %v11281_v44  ;;  %v9892_v23 = vld [vmem:[#allocation10 + $0x490] ss:$48 sps:$4 sm:$0xff]  }
 0x388   :  { %6528 = vmatpush1.bf16.msra.mxu0 %v9823_v3  ;;  %6559 = vmatprep.mubr.bf16.mxu0 %v11281_v44  ;;  %v9895_v3 = vld [vmem:[#allocation10 + $0x498] ss:$48 sps:$4 sm:$0xff]  }
 0x389   :  { %6365 = vmatprep.subr.bf16.mxu1 %v9828_v52  ;;  %6529 = vmatprep.subr.bf16.mxu0 %v9831_v27  ;;  %v9900_v52 = vld [vmem:[#allocation10 + $0x4f4] ss:$48 sps:$4 sm:$0xff]   ;;  %v9903_v27 = vld [vmem:[#allocation10 + $0x4fc] ss:$48 sps:$4 sm:$0xff]  }
 0x38b   :  { %6366 = vmatpush1.bf16.msra.mxu1 %v9826_v41  ;;  %v9898_v41 = vld [vmem:[#allocation10 + $0x4f0] ss:$48 sps:$4 sm:$0xff]  }
 0x38c   :  { %6530 = vmatpush1.bf16.msra.mxu0 %v9829_v29  ;;  %6367 = vmatprep.subr.bf16.mxu1 %v9834_v30  ;;  %v9901_v29 = vld [vmem:[#allocation10 + $0x4f8] ss:$48 sps:$4 sm:$0xff]   ;;  %v9906_v30 = vld [vmem:[#allocation10 + $0x554] ss:$48 sps:$4 sm:$0xff]  }
 0x38d   :  { %6531 = vmatprep.subr.bf16.mxu0 %v9837_v31  ;;  %v9909_v31 = vld [vmem:[#allocation10 + $0x55c] ss:$48 sps:$4 sm:$0xff]  }
 0x38f   :  { %6368 = vmatpush1.bf16.msra.mxu1 %v9832_v32  ;;  %v9904_v32 = vld [vmem:[#allocation10 + $0x550] ss:$48 sps:$4 sm:$0xff]  }
 0x390   :  { %6532 = vmatpush1.bf16.msra.mxu0 %v9835_v33  ;;  %6369 = vmatprep.subr.bf16.mxu1 %v9840_v34  ;;  %v9907_v33 = vld [vmem:[#allocation10 + $0x558] ss:$48 sps:$4 sm:$0xff]   ;;  %v9912_v34 = vld [vmem:[#allocation10 + $0x5b4] ss:$48 sps:$4 sm:$0xff]  }
 0x391   :  { %6533 = vmatprep.subr.bf16.mxu0 %v9843_v35  ;;  %v9915_v35 = vld [vmem:[#allocation10 + $0x5bc] ss:$48 sps:$4 sm:$0xff]  }
 0x393   :  { %6370 = vmatpush1.bf16.msra.mxu1 %v9838_v38  ;;  %v9910_v38 = vld [vmem:[#allocation10 + $0x5b0] ss:$48 sps:$4 sm:$0xff]  }
 0x394   :  { %6534 = vmatpush1.bf16.msra.mxu0 %v9841_v39  ;;  %6371 = vmatprep.subr.bf16.mxu1 %v9846_v48  ;;  %v9913_v39 = vld [vmem:[#allocation10 + $0x5b8] ss:$48 sps:$4 sm:$0xff]   ;;  %v9918_v48 = vld [vmem:[#allocation10 + $0x614] ss:$48 sps:$4 sm:$0xff]  }
 0x395   :  { %6535 = vmatprep.subr.bf16.mxu0 %v9849_v49  ;;  %v9921_v49 = vld [vmem:[#allocation10 + $0x61c] ss:$48 sps:$4 sm:$0xff]  }
 0x397   :  { %6372 = vmatpush1.bf16.msra.mxu1 %v9844_v50  ;;  %v9916_v50 = vld [vmem:[#allocation10 + $0x610] ss:$48 sps:$4 sm:$0xff]  }
 0x398   :  { %6536 = vmatpush1.bf16.msra.mxu0 %v9847_v51  ;;  %6373 = vmatprep.subr.bf16.mxu1 %v9852_v53  ;;  %v9919_v51 = vld [vmem:[#allocation10 + $0x618] ss:$48 sps:$4 sm:$0xff]   ;;  %v9924_v53 = vld [vmem:[#allocation10 + $0x674] ss:$48 sps:$4 sm:$0xff]  }
 0x399   :  { %6537 = vmatprep.subr.bf16.mxu0 %v9855_v55  ;;  %v9927_v55 = vld [vmem:[#allocation10 + $0x67c] ss:$48 sps:$4 sm:$0xff]  }
 0x39b   :  { %6374 = vmatpush1.bf16.msra.mxu1 %v9850_v56  ;;  %v9922_v56 = vld [vmem:[#allocation10 + $0x670] ss:$48 sps:$4 sm:$0xff]  }
 0x39c   :  { %6538 = vmatpush1.bf16.msra.mxu0 %v9853_v57  ;;  %6375 = vmatprep.subr.bf16.mxu1 %v9858_v58  ;;  %v9925_v57 = vld [vmem:[#allocation10 + $0x678] ss:$48 sps:$4 sm:$0xff]   ;;  %v9930_v58 = vld [vmem:[#allocation10 + $0x6d4] ss:$48 sps:$4 sm:$0xff]  }
 0x39d   :  { %6539 = vmatprep.subr.bf16.mxu0 %v9861_v37  ;;  %v9933_v37 = vld [vmem:[#allocation10 + $0x6dc] ss:$48 sps:$4 sm:$0xff]  }
 0x39f   :  { %6376 = vmatpush1.bf16.msra.mxu1 %v9856_v59  ;;  %v9928_v59 = vld [vmem:[#allocation10 + $0x6d0] ss:$48 sps:$4 sm:$0xff]  }
 0x3a0   :  { %6540 = vmatpush1.bf16.msra.mxu0 %v9859_v60  ;;  %6377 = vmatprep.subr.bf16.mxu1 %v9864_v61  ;;  %v9931_v60 = vld [vmem:[#allocation10 + $0x6d8] ss:$48 sps:$4 sm:$0xff]   ;;  %v9936_v61 = vld [vmem:[#allocation10 + $0x734] ss:$48 sps:$4 sm:$0xff]  }
 0x3a1   :  { %6541 = vmatprep.subr.bf16.mxu0 %v9867_v62  ;;  %v9939_v62 = vld [vmem:[#allocation10 + $0x73c] ss:$48 sps:$4 sm:$0xff]  }
 0x3a3   :  { %6378 = vmatpush1.bf16.msra.mxu1 %v9862_v63  ;;  %v9934_v63 = vld [vmem:[#allocation10 + $0x730] ss:$48 sps:$4 sm:$0xff]  }
 0x3a4   :  { %6542 = vmatpush1.bf16.msra.mxu0 %v9865_v42  ;;  %6379 = vmatprep.subr.bf16.mxu1 %v9870_v1  ;;  %v9937_v42 = vld [vmem:[#allocation10 + $0x738] ss:$48 sps:$4 sm:$0xff]   ;;  %v9942_v1 = vld [vmem:[#allocation10 + $0x794] ss:$48 sps:$4 sm:$0xff]  }
 0x3a5   :  { %6543 = vmatprep.subr.bf16.mxu0 %v9873_v5  ;;  %v9945_v5 = vld [vmem:[#allocation10 + $0x79c] ss:$48 sps:$4 sm:$0xff]  }
 0x3a7   :  { %6380 = vmatpush1.bf16.msra.mxu1 %v9868_v6  ;;  %v9940_v6 = vld [vmem:[#allocation10 + $0x790] ss:$48 sps:$4 sm:$0xff]  }
 0x3a8   :  { %6544 = vmatpush1.bf16.msra.mxu0 %v9871_v10  ;;  %6381 = vmatprep.subr.bf16.mxu1 %v9876_v11  ;;  %v9943_v10 = vld [vmem:[#allocation10 + $0x798] ss:$48 sps:$4 sm:$0xff]   ;;  %v9948_v11 = vld [vmem:[#allocation10 + $0x7f4] ss:$48 sps:$4 sm:$0xff]  }
 0x3a9   :  { %6545 = vmatprep.subr.bf16.mxu0 %v9879_v12  ;;  %v9951_v12 = vld [vmem:[#allocation10 + $0x7fc] ss:$48 sps:$4 sm:$0xff]  }
 0x3ab   :  { %6382 = vmatpush1.bf16.msra.mxu1 %v9874_v46  ;;  %v9946_v46 = vld [vmem:[#allocation10 + $0x7f0] ss:$48 sps:$4 sm:$0xff]  }
 0x3ac   :  { %6546 = vmatpush1.bf16.msra.mxu0 %v9877_v9  ;;  %6383 = vmatprep.subr.bf16.mxu1 %v9882_v13  ;;  %v9949_v9 = vld [vmem:[#allocation10 + $0x7f8] ss:$48 sps:$4 sm:$0xff]   ;;  %v9954_v13 = vld [vmem:[#allocation10 + $0x854] ss:$48 sps:$4 sm:$0xff]  }
 0x3ad   :  { %6547 = vmatprep.subr.bf16.mxu0 %v9885_v15  ;;  %v9957_v15 = vld [vmem:[#allocation10 + $0x85c] ss:$48 sps:$4 sm:$0xff]  }
 0x3af   :  { %6384 = vmatpush1.bf16.msra.mxu1 %v9880_v16  ;;  %v9952_v16 = vld [vmem:[#allocation10 + $0x850] ss:$48 sps:$4 sm:$0xff]  }
 0x3b0   :  { %6548 = vmatpush1.bf16.msra.mxu0 %v9883_v17  ;;  %6385 = vmatprep.subr.bf16.mxu1 %v9888_v18  ;;  %v9955_v17 = vld [vmem:[#allocation10 + $0x858] ss:$48 sps:$4 sm:$0xff]   ;;  %v9960_v18 = vld [vmem:[#allocation10 + $0x8b4] ss:$48 sps:$4 sm:$0xff]  }
 0x3b1   :  { %6549 = vmatprep.subr.bf16.mxu0 %v9891_v19  ;;  %v9963_v19 = vld [vmem:[#allocation10 + $0x8bc] ss:$48 sps:$4 sm:$0xff]  }
 0x3b3   :  { %6386 = vmatpush1.bf16.msra.mxu1 %v9886_v20  ;;  %v9958_v20 = vld [vmem:[#allocation10 + $0x8b0] ss:$48 sps:$4 sm:$0xff]  }
 0x3b4   :  { %6550 = vmatpush1.bf16.msra.mxu0 %v9889_v26  ;;  %6387 = vmatprep.subr.bf16.mxu1 %v9894_v21  ;;  %v9961_v26 = vld [vmem:[#allocation10 + $0x8b8] ss:$48 sps:$4 sm:$0xff]   ;;  %v9966_v21 = vld [vmem:[#allocation10 + $0x914] ss:$48 sps:$4 sm:$0xff]  }
 0x3b5   :  { %6551 = vmatprep.subr.bf16.mxu0 %v9897_v22  ;;  %v9969_v22 = vld [vmem:[#allocation10 + $0x91c] ss:$48 sps:$4 sm:$0xff]  }
 0x3b7   :  { %6388 = vmatpush1.bf16.msra.mxu1 %v9892_v23  ;;  %v9964_v23 = vld [vmem:[#allocation10 + $0x910] ss:$48 sps:$4 sm:$0xff]  }
 0x3b8   :  { %6552 = vmatpush1.bf16.msra.mxu0 %v9895_v3  ;;  %6389 = vmatprep.subr.bf16.mxu1 %v9900_v52  ;;  %v9967_v3 = vld [vmem:[#allocation10 + $0x918] ss:$48 sps:$4 sm:$0xff]   ;;  %v9972_v52 = vld [vmem:[#allocation10 + $0x974] ss:$48 sps:$4 sm:$0xff]  }
 0x3b9   :  { %6553 = vmatprep.subr.bf16.mxu0 %v9903_v27  ;;  %v9975_v27 = vld [vmem:[#allocation10 + $0x97c] ss:$48 sps:$4 sm:$0xff]  }
 0x3bb   :  { %6390 = vmatpush1.bf16.msra.mxu1 %v9898_v41  ;;  %v9970_v41 = vld [vmem:[#allocation10 + $0x970] ss:$48 sps:$4 sm:$0xff]  }
 0x3bc   :  { %6554 = vmatpush1.bf16.msra.mxu0 %v9901_v29  ;;  %6391 = vmatprep.subr.bf16.mxu1 %v9906_v30  ;;  %v9973_v29 = vld [vmem:[#allocation10 + $0x978] ss:$48 sps:$4 sm:$0xff]   ;;  %v9978_v30 = vld [vmem:[#allocation10 + $0x9d4] ss:$48 sps:$4 sm:$0xff]  }
 0x3bd   :  { %6555 = vmatprep.subr.bf16.mxu0 %v9909_v31  ;;  %v9981_v31 = vld [vmem:[#allocation10 + $0x9dc] ss:$48 sps:$4 sm:$0xff]  }
 0x3bf   :  { %6392 = vmatpush1.bf16.msra.mxu1 %v9904_v32  ;;  %v9976_v32 = vld [vmem:[#allocation10 + $0x9d0] ss:$48 sps:$4 sm:$0xff]  }
 0x3c0   :  { %6556 = vmatpush1.bf16.msra.mxu0 %v9907_v33  ;;  %6393 = vmatprep.subr.bf16.mxu1 %v9912_v34  ;;  %v9979_v33 = vld [vmem:[#allocation10 + $0x9d8] ss:$48 sps:$4 sm:$0xff]   ;;  %v9984_v34 = vld [vmem:[#allocation10 + $0xa34] ss:$48 sps:$4 sm:$0xff]  }
 0x3c1   :  { %6557 = vmatprep.subr.bf16.mxu0 %v9915_v35  ;;  %v9987_v35 = vld [vmem:[#allocation10 + $0xa3c] ss:$48 sps:$4 sm:$0xff]  }
 0x3c3   :  { %6394 = vmatpush1.bf16.msra.mxu1 %v9910_v38  ;;  %v9982_v38 = vld [vmem:[#allocation10 + $0xa30] ss:$48 sps:$4 sm:$0xff]  }
 0x3c4   :  { %6558 = vmatpush1.bf16.msra.mxu0 %v9913_v39  ;;  %6404 = vmatprep.subr.bf16.mxu1 %v9918_v48  ;;  %v9985_v39 = vld [vmem:[#allocation10 + $0xa38] ss:$48 sps:$4 sm:$0xff]   ;;  %v9990_v48 = vld [vmem:[#allocation10 + $0xa94] ss:$48 sps:$4 sm:$0xff]  }
 0x3c5   :  { %6568 = vmatprep.subr.bf16.mxu0 %v9921_v49  ;;  %v9993_v49 = vld [vmem:[#allocation10 + $0xa9c] ss:$48 sps:$4 sm:$0xff]  }
 0x3c6   :  { %6396 = vmatmul.mubr.bf16.vlgmr.msra.gmra.mrb[24].mxu1 %v11283_v8 }
 0x3c7   :  { %6560 = vmatmul.mubr.bf16.vlgmr.msra.gmra.mrb[20].mxu0 %v11283_v8  ;;  %6405 = vmatpush1.bf16.msra.mxu1 %v9916_v50  ;;  %v9988_v50 = vld [vmem:[#allocation10 + $0xa90] ss:$48 sps:$4 sm:$0xff]  }
 0x3c8   :  { %6436 = vmatprep.mubr.bf16.mxu1 %v11287_v14  ;;  %6569 = vmatpush1.bf16.msra.mxu0 %v9919_v51  ;;  %v9991_v51 = vld [vmem:[#allocation10 + $0xa98] ss:$48 sps:$4 sm:$0xff]  }
 0x3c9   :  { %6600 = vmatprep.mubr.bf16.mxu0 %v11287_v14  ;;  %6406 = vmatprep.subr.bf16.mxu1 %v9924_v53  ;;  %v9996_v53 = vld [vmem:[#allocation10 + $0xaf4] ss:$48 sps:$4 sm:$0xff]  }
 0x3ca   :  { %6570 = vmatprep.subr.bf16.mxu0 %v9927_v55  ;;  %v9999_v55 = vld [vmem:[#allocation10 + $0xafc] ss:$48 sps:$4 sm:$0xff]  }
 0x3cb   :  { %6407 = vmatpush1.bf16.msra.mxu1 %v9922_v56  ;;  %v9994_v56 = vld [vmem:[#allocation10 + $0xaf0] ss:$48 sps:$4 sm:$0xff]  }
 0x3cc   :  { %6571 = vmatpush1.bf16.msra.mxu0 %v9925_v57  ;;  %6408 = vmatprep.subr.bf16.mxu1 %v9930_v58  ;;  %v9997_v57 = vld [vmem:[#allocation10 + $0xaf8] ss:$48 sps:$4 sm:$0xff]   ;;  %v10002_v58 = vld [vmem:[#allocation10 + $0xb54] ss:$48 sps:$4 sm:$0xff]  }
 0x3cd   :  { %6572 = vmatprep.subr.bf16.mxu0 %v9933_v37  ;;  %v10005_v37 = vld [vmem:[#allocation10 + $0xb5c] ss:$48 sps:$4 sm:$0xff]  }
 0x3cf   :  { %6409 = vmatpush1.bf16.msra.mxu1 %v9928_v59  ;;  %v10000_v59 = vld [vmem:[#allocation10 + $0xb50] ss:$48 sps:$4 sm:$0xff]  }
 0x3d0   :  { %6573 = vmatpush1.bf16.msra.mxu0 %v9931_v60  ;;  %6410 = vmatprep.subr.bf16.mxu1 %v9936_v61  ;;  %v10003_v60 = vld [vmem:[#allocation10 + $0xb58] ss:$48 sps:$4 sm:$0xff]   ;;  %v10008_v61 = vld [vmem:[#allocation10 + $0xbb4] ss:$48 sps:$4 sm:$0xff]  }
 0x3d1   :  { %6574 = vmatprep.subr.bf16.mxu0 %v9939_v62  ;;  %v10011_v62 = vld [vmem:[#allocation10 + $0xbbc] ss:$48 sps:$4 sm:$0xff]  }
 0x3d3   :  { %6411 = vmatpush1.bf16.msra.mxu1 %v9934_v63  ;;  %v10006_v63 = vld [vmem:[#allocation10 + $0xbb0] ss:$48 sps:$4 sm:$0xff]  }
 0x3d4   :  { %6575 = vmatpush1.bf16.msra.mxu0 %v9937_v42  ;;  %6412 = vmatprep.subr.bf16.mxu1 %v9942_v1  ;;  %v10009_v42 = vld [vmem:[#allocation10 + $0xbb8] ss:$48 sps:$4 sm:$0xff]   ;;  %v10014_v1 = vld [vmem:[#allocation10 + $0xc14] ss:$48 sps:$4 sm:$0xff]  }
 0x3d5   :  { %6576 = vmatprep.subr.bf16.mxu0 %v9945_v5  ;;  %v10017_v5 = vld [vmem:[#allocation10 + $0xc1c] ss:$48 sps:$4 sm:$0xff]  }
 0x3d7   :  { %6413 = vmatpush1.bf16.msra.mxu1 %v9940_v6  ;;  %v10012_v6 = vld [vmem:[#allocation10 + $0xc10] ss:$48 sps:$4 sm:$0xff]  }
 0x3d8   :  { %6577 = vmatpush1.bf16.msra.mxu0 %v9943_v10  ;;  %6414 = vmatprep.subr.bf16.mxu1 %v9948_v11  ;;  %v10015_v10 = vld [vmem:[#allocation10 + $0xc18] ss:$48 sps:$4 sm:$0xff]   ;;  %v10020_v11 = vld [vmem:[#allocation10 + $0xc74] ss:$48 sps:$4 sm:$0xff]  }
 0x3d9   :  { %6578 = vmatprep.subr.bf16.mxu0 %v9951_v12  ;;  %v10023_v12 = vld [vmem:[#allocation10 + $0xc7c] ss:$48 sps:$4 sm:$0xff]  }
 0x3db   :  { %6415 = vmatpush1.bf16.msra.mxu1 %v9946_v46  ;;  %v10018_v46 = vld [vmem:[#allocation10 + $0xc70] ss:$48 sps:$4 sm:$0xff]  }
 0x3dc   :  { %6579 = vmatpush1.bf16.msra.mxu0 %v9949_v9  ;;  %6416 = vmatprep.subr.bf16.mxu1 %v9954_v13  ;;  %v10021_v9 = vld [vmem:[#allocation10 + $0xc78] ss:$48 sps:$4 sm:$0xff]   ;;  %v10026_v13 = vld [vmem:[#allocation10 + $0xcd4] ss:$48 sps:$4 sm:$0xff]  }
 0x3dd   :  { %6580 = vmatprep.subr.bf16.mxu0 %v9957_v15  ;;  %v10029_v15 = vld [vmem:[#allocation10 + $0xcdc] ss:$48 sps:$4 sm:$0xff]  }
 0x3df   :  { %6417 = vmatpush1.bf16.msra.mxu1 %v9952_v16  ;;  %v10024_v16 = vld [vmem:[#allocation10 + $0xcd0] ss:$48 sps:$4 sm:$0xff]  }
 0x3e0   :  { %6581 = vmatpush1.bf16.msra.mxu0 %v9955_v17  ;;  %6418 = vmatprep.subr.bf16.mxu1 %v9960_v18  ;;  %v10027_v17 = vld [vmem:[#allocation10 + $0xcd8] ss:$48 sps:$4 sm:$0xff]   ;;  %v10032_v18 = vld [vmem:[#allocation10 + $0xd34] ss:$48 sps:$4 sm:$0xff]  }
 0x3e1   :  { %6582 = vmatprep.subr.bf16.mxu0 %v9963_v19  ;;  %v10035_v19 = vld [vmem:[#allocation10 + $0xd3c] ss:$48 sps:$4 sm:$0xff]  }
 0x3e3   :  { %6419 = vmatpush1.bf16.msra.mxu1 %v9958_v20  ;;  %v10030_v20 = vld [vmem:[#allocation10 + $0xd30] ss:$48 sps:$4 sm:$0xff]  }
 0x3e4   :  { %6583 = vmatpush1.bf16.msra.mxu0 %v9961_v26  ;;  %6420 = vmatprep.subr.bf16.mxu1 %v9966_v21  ;;  %v10033_v26 = vld [vmem:[#allocation10 + $0xd38] ss:$48 sps:$4 sm:$0xff]   ;;  %v10038_v21 = vld [vmem:[#allocation10 + $0xd94] ss:$48 sps:$4 sm:$0xff]  }
 0x3e5   :  { %6584 = vmatprep.subr.bf16.mxu0 %v9969_v22  ;;  %v10041_v22 = vld [vmem:[#allocation10 + $0xd9c] ss:$48 sps:$4 sm:$0xff]  }
 0x3e7   :  { %6421 = vmatpush1.bf16.msra.mxu1 %v9964_v23  ;;  %v10036_v23 = vld [vmem:[#allocation10 + $0xd90] ss:$48 sps:$4 sm:$0xff]  }
 0x3e8   :  { %6585 = vmatpush1.bf16.msra.mxu0 %v9967_v3  ;;  %6422 = vmatprep.subr.bf16.mxu1 %v9972_v52  ;;  %v10039_v3 = vld [vmem:[#allocation10 + $0xd98] ss:$48 sps:$4 sm:$0xff]   ;;  %v10044_v52 = vld [vmem:[#allocation10 + $0xdf4] ss:$48 sps:$4 sm:$0xff]  }
 0x3e9   :  { %6586 = vmatprep.subr.bf16.mxu0 %v9975_v27  ;;  %v10047_v27 = vld [vmem:[#allocation10 + $0xdfc] ss:$48 sps:$4 sm:$0xff]  }
 0x3eb   :  { %6423 = vmatpush1.bf16.msra.mxu1 %v9970_v41  ;;  %v10042_v41 = vld [vmem:[#allocation10 + $0xdf0] ss:$48 sps:$4 sm:$0xff]  }
 0x3ec   :  { %6587 = vmatpush1.bf16.msra.mxu0 %v9973_v29  ;;  %6424 = vmatprep.subr.bf16.mxu1 %v9978_v30  ;;  %v10045_v29 = vld [vmem:[#allocation10 + $0xdf8] ss:$48 sps:$4 sm:$0xff]   ;;  %v10050_v30 = vld [vmem:[#allocation10 + $0xe54] ss:$48 sps:$4 sm:$0xff]  }
 0x3ed   :  { %6588 = vmatprep.subr.bf16.mxu0 %v9981_v31  ;;  %v10053_v31 = vld [vmem:[#allocation10 + $0xe5c] ss:$48 sps:$4 sm:$0xff]  }
 0x3ef   :  { %6425 = vmatpush1.bf16.msra.mxu1 %v9976_v32  ;;  %v10048_v32 = vld [vmem:[#allocation10 + $0xe50] ss:$48 sps:$4 sm:$0xff]  }
 0x3f0   :  { %6589 = vmatpush1.bf16.msra.mxu0 %v9979_v33  ;;  %6426 = vmatprep.subr.bf16.mxu1 %v9984_v34  ;;  %v10051_v33 = vld [vmem:[#allocation10 + $0xe58] ss:$48 sps:$4 sm:$0xff]   ;;  %v10056_v34 = vld [vmem:[#allocation10 + $0xeb4] ss:$48 sps:$4 sm:$0xff]  }
 0x3f1   :  { %6590 = vmatprep.subr.bf16.mxu0 %v9987_v35  ;;  %v10059_v35 = vld [vmem:[#allocation10 + $0xebc] ss:$48 sps:$4 sm:$0xff]  }
 0x3f3   :  { %6427 = vmatpush1.bf16.msra.mxu1 %v9982_v38  ;;  %v10054_v38 = vld [vmem:[#allocation10 + $0xeb0] ss:$48 sps:$4 sm:$0xff]  }
 0x3f4   :  { %6591 = vmatpush1.bf16.msra.mxu0 %v9985_v39  ;;  %6428 = vmatprep.subr.bf16.mxu1 %v9990_v48  ;;  %v10057_v39 = vld [vmem:[#allocation10 + $0xeb8] ss:$48 sps:$4 sm:$0xff]   ;;  %v10062_v48 = vld [vmem:[#allocation10 + $0xf14] ss:$48 sps:$4 sm:$0xff]  }
 0x3f5   :  { %6592 = vmatprep.subr.bf16.mxu0 %v9993_v49  ;;  %v10065_v49 = vld [vmem:[#allocation10 + $0xf1c] ss:$48 sps:$4 sm:$0xff]  }
 0x3f7   :  { %6429 = vmatpush1.bf16.msra.mxu1 %v9988_v50  ;;  %v10060_v50 = vld [vmem:[#allocation10 + $0xf10] ss:$48 sps:$4 sm:$0xff]  }
 0x3f8   :  { %6593 = vmatpush1.bf16.msra.mxu0 %v9991_v51  ;;  %6430 = vmatprep.subr.bf16.mxu1 %v9996_v53  ;;  %v10063_v51 = vld [vmem:[#allocation10 + $0xf18] ss:$48 sps:$4 sm:$0xff]   ;;  %v10068_v53 = vld [vmem:[#allocation10 + $0xf74] ss:$48 sps:$4 sm:$0xff]  }
 0x3f9   :  { %6594 = vmatprep.subr.bf16.mxu0 %v9999_v55  ;;  %v10071_v55 = vld [vmem:[#allocation10 + $0xf7c] ss:$48 sps:$4 sm:$0xff]  }
 0x3fb   :  { %6431 = vmatpush1.bf16.msra.mxu1 %v9994_v56  ;;  %v10066_v56 = vld [vmem:[#allocation10 + $0xf70] ss:$48 sps:$4 sm:$0xff]  }
 0x3fc   :  { %6595 = vmatpush1.bf16.msra.mxu0 %v9997_v57  ;;  %6432 = vmatprep.subr.bf16.mxu1 %v10002_v58  ;;  %v10069_v57 = vld [vmem:[#allocation10 + $0xf78] ss:$48 sps:$4 sm:$0xff]   ;;  %v10074_v58 = vld [vmem:[#allocation10 + $0xfd4] ss:$48 sps:$4 sm:$0xff]  }
 0x3fd   :  { %6596 = vmatprep.subr.bf16.mxu0 %v10005_v37  ;;  %v10077_v37 = vld [vmem:[#allocation10 + $0xfdc] ss:$48 sps:$4 sm:$0xff]  }
 0x3ff   :  { %6433 = vmatpush1.bf16.msra.mxu1 %v10000_v59  ;;  %v10072_v59 = vld [vmem:[#allocation10 + $0xfd0] ss:$48 sps:$4 sm:$0xff]  }
 0x400   :  { %6597 = vmatpush1.bf16.msra.mxu0 %v10003_v60  ;;  %6434 = vmatprep.subr.bf16.mxu1 %v10008_v61  ;;  %v10075_v60 = vld [vmem:[#allocation10 + $0xfd8] ss:$48 sps:$4 sm:$0xff]   ;;  %v10080_v61 = vld [vmem:[#allocation10 + $0x1034] ss:$48 sps:$4 sm:$0xff]  }
 0x401   :  { %6598 = vmatprep.subr.bf16.mxu0 %v10011_v62  ;;  %v10083_v62 = vld [vmem:[#allocation10 + $0x103c] ss:$48 sps:$4 sm:$0xff]  }
 0x403   :  { %6435 = vmatpush1.bf16.msra.mxu1 %v10006_v63  ;;  %v10078_v63 = vld [vmem:[#allocation10 + $0x1030] ss:$48 sps:$4 sm:$0xff]  }
 0x404   :  { %6599 = vmatpush1.bf16.msra.mxu0 %v10009_v42  ;;  %6445 = vmatprep.subr.bf16.mxu1 %v10014_v1  ;;  %v10081_v42 = vld [vmem:[#allocation10 + $0x1038] ss:$48 sps:$4 sm:$0xff]   ;;  %v10086_v1 = vld [vmem:[#allocation10 + $0x1094] ss:$48 sps:$4 sm:$0xff]  }
 0x405   :  { %6609 = vmatprep.subr.bf16.mxu0 %v10017_v5  ;;  %v10089_v5 = vld [vmem:[#allocation10 + $0x109c] ss:$48 sps:$4 sm:$0xff]  }
 0x406   :  { %6437 = vmatmul.mubr.bf16.vlgmr.msra.gmra.mrb[24].mxu1 %v11298_v25 }
 0x407   :  { %6601 = vmatmul.mubr.bf16.vlgmr.msra.gmra.mrb[20].mxu0 %v11298_v25  ;;  %6446 = vmatpush1.bf16.msra.mxu1 %v10012_v6  ;;  %v10084_v6 = vld [vmem:[#allocation10 + $0x1090] ss:$48 sps:$4 sm:$0xff]  }
 0x408   :  { %6477 = vmatprep.mubr.bf16.mxu1 %v11313_v36  ;;  %6610 = vmatpush1.bf16.msra.mxu0 %v10015_v10  ;;  %v10087_v10 = vld [vmem:[#allocation10 + $0x1098] ss:$48 sps:$4 sm:$0xff]  }
 0x409   :  { %6641 = vmatprep.mubr.bf16.mxu0 %v11313_v36  ;;  %6447 = vmatprep.subr.bf16.mxu1 %v10020_v11  ;;  %v10092_v11 = vld [vmem:[#allocation10 + $0x10f4] ss:$48 sps:$4 sm:$0xff]  }
 0x40a   :  { %6611 = vmatprep.subr.bf16.mxu0 %v10023_v12  ;;  %v10095_v12 = vld [vmem:[#allocation10 + $0x10fc] ss:$48 sps:$4 sm:$0xff]  }
 0x40b   :  { %6448 = vmatpush1.bf16.msra.mxu1 %v10018_v46  ;;  %v10090_v46 = vld [vmem:[#allocation10 + $0x10f0] ss:$48 sps:$4 sm:$0xff]  }
 0x40c   :  { %6612 = vmatpush1.bf16.msra.mxu0 %v10021_v9  ;;  %6449 = vmatprep.subr.bf16.mxu1 %v10026_v13  ;;  %v10093_v9 = vld [vmem:[#allocation10 + $0x10f8] ss:$48 sps:$4 sm:$0xff]   ;;  %v10098_v13 = vld [vmem:[#allocation10 + $0x1154] ss:$48 sps:$4 sm:$0xff]  }
 0x40d   :  { %6613 = vmatprep.subr.bf16.mxu0 %v10029_v15  ;;  %v10101_v15 = vld [vmem:[#allocation10 + $0x115c] ss:$48 sps:$4 sm:$0xff]  }
 0x40f   :  { %6450 = vmatpush1.bf16.msra.mxu1 %v10024_v16  ;;  %v10096_v16 = vld [vmem:[#allocation10 + $0x1150] ss:$48 sps:$4 sm:$0xff]  }
 0x410   :  { %6614 = vmatpush1.bf16.msra.mxu0 %v10027_v17  ;;  %6451 = vmatprep.subr.bf16.mxu1 %v10032_v18  ;;  %v10099_v17 = vld [vmem:[#allocation10 + $0x1158] ss:$48 sps:$4 sm:$0xff]   ;;  %v10104_v18 = vld [vmem:[#allocation10 + $0x11b4] ss:$48 sps:$4 sm:$0xff]  }
 0x411   :  { %6615 = vmatprep.subr.bf16.mxu0 %v10035_v19  ;;  %v10107_v19 = vld [vmem:[#allocation10 + $0x11bc] ss:$48 sps:$4 sm:$0xff]  }
 0x413   :  { %6452 = vmatpush1.bf16.msra.mxu1 %v10030_v20  ;;  %v10102_v20 = vld [vmem:[#allocation10 + $0x11b0] ss:$48 sps:$4 sm:$0xff]  }
 0x414   :  { %6616 = vmatpush1.bf16.msra.mxu0 %v10033_v26  ;;  %6453 = vmatprep.subr.bf16.mxu1 %v10038_v21  ;;  %v10105_v26 = vld [vmem:[#allocation10 + $0x11b8] ss:$48 sps:$4 sm:$0xff]   ;;  %v10110_v21 = vld [vmem:[#allocation10 + $0x1214] ss:$48 sps:$4 sm:$0xff]  }
 0x415   :  { %6617 = vmatprep.subr.bf16.mxu0 %v10041_v22  ;;  %v10113_v22 = vld [vmem:[#allocation10 + $0x121c] ss:$48 sps:$4 sm:$0xff]  }
 0x417   :  { %6454 = vmatpush1.bf16.msra.mxu1 %v10036_v23  ;;  %v10108_v23 = vld [vmem:[#allocation10 + $0x1210] ss:$48 sps:$4 sm:$0xff]  }
 0x418   :  { %6618 = vmatpush1.bf16.msra.mxu0 %v10039_v3  ;;  %6455 = vmatprep.subr.bf16.mxu1 %v10044_v52  ;;  %v10111_v3 = vld [vmem:[#allocation10 + $0x1218] ss:$48 sps:$4 sm:$0xff]   ;;  %v10116_v52 = vld [vmem:[#allocation10 + $0x1274] ss:$48 sps:$4 sm:$0xff]  }
 0x419   :  { %6619 = vmatprep.subr.bf16.mxu0 %v10047_v27  ;;  %v10119_v27 = vld [vmem:[#allocation10 + $0x127c] ss:$48 sps:$4 sm:$0xff]  }
 0x41b   :  { %6456 = vmatpush1.bf16.msra.mxu1 %v10042_v41  ;;  %v10114_v41 = vld [vmem:[#allocation10 + $0x1270] ss:$48 sps:$4 sm:$0xff]  }
 0x41c   :  { %6620 = vmatpush1.bf16.msra.mxu0 %v10045_v29  ;;  %6457 = vmatprep.subr.bf16.mxu1 %v10050_v30  ;;  %v10117_v29 = vld [vmem:[#allocation10 + $0x1278] ss:$48 sps:$4 sm:$0xff]   ;;  %v10122_v30 = vld [vmem:[#allocation10 + $0x12d4] ss:$48 sps:$4 sm:$0xff]  }
 0x41d   :  { %6621 = vmatprep.subr.bf16.mxu0 %v10053_v31  ;;  %v10125_v31 = vld [vmem:[#allocation10 + $0x12dc] ss:$48 sps:$4 sm:$0xff]  }
 0x41f   :  { %6458 = vmatpush1.bf16.msra.mxu1 %v10048_v32  ;;  %v10120_v32 = vld [vmem:[#allocation10 + $0x12d0] ss:$48 sps:$4 sm:$0xff]  }
 0x420   :  { %6622 = vmatpush1.bf16.msra.mxu0 %v10051_v33  ;;  %6459 = vmatprep.subr.bf16.mxu1 %v10056_v34  ;;  %v10123_v33 = vld [vmem:[#allocation10 + $0x12d8] ss:$48 sps:$4 sm:$0xff]   ;;  %v10128_v34 = vld [vmem:[#allocation10 + $0x1334] ss:$48 sps:$4 sm:$0xff]  }
 0x421   :  { %6623 = vmatprep.subr.bf16.mxu0 %v10059_v35  ;;  %v10131_v35 = vld [vmem:[#allocation10 + $0x133c] ss:$48 sps:$4 sm:$0xff]  }
 0x423   :  { %6460 = vmatpush1.bf16.msra.mxu1 %v10054_v38  ;;  %v10126_v38 = vld [vmem:[#allocation10 + $0x1330] ss:$48 sps:$4 sm:$0xff]  }
 0x424   :  { %6624 = vmatpush1.bf16.msra.mxu0 %v10057_v39  ;;  %6461 = vmatprep.subr.bf16.mxu1 %v10062_v48  ;;  %v10129_v39 = vld [vmem:[#allocation10 + $0x1338] ss:$48 sps:$4 sm:$0xff]   ;;  %v10134_v48 = vld [vmem:[#allocation10 + $0x24] ss:$48 sps:$4 sm:$0xff]  }
 0x425   :  { %6625 = vmatprep.subr.bf16.mxu0 %v10065_v49  ;;  %v10137_v49 = vld [vmem:[#allocation10 + $0x2c] ss:$48 sps:$4 sm:$0xff]  }
 0x427   :  { %6462 = vmatpush1.bf16.msra.mxu1 %v10060_v50  ;;  %v10132_v50 = vld [vmem:[#allocation10 + $0x20] ss:$48 sps:$4 sm:$0xff]  }
 0x428   :  { %6626 = vmatpush1.bf16.msra.mxu0 %v10063_v51  ;;  %6463 = vmatprep.subr.bf16.mxu1 %v10068_v53  ;;  %v10135_v51 = vld [vmem:[#allocation10 + $0x28] ss:$48 sps:$4 sm:$0xff]   ;;  %v10140_v53 = vld [vmem:[#allocation10 + $0x84] ss:$48 sps:$4 sm:$0xff]  }
 0x429   :  { %6627 = vmatprep.subr.bf16.mxu0 %v10071_v55  ;;  %v10143_v55 = vld [vmem:[#allocation10 + $0x8c] ss:$48 sps:$4 sm:$0xff]  }
 0x42b   :  { %6464 = vmatpush1.bf16.msra.mxu1 %v10066_v56  ;;  %v10138_v56 = vld [vmem:[#allocation10 + $0x80] ss:$48 sps:$4 sm:$0xff]  }
 0x42c   :  { %6628 = vmatpush1.bf16.msra.mxu0 %v10069_v57  ;;  %6465 = vmatprep.subr.bf16.mxu1 %v10074_v58  ;;  %v10141_v57 = vld [vmem:[#allocation10 + $0x88] ss:$48 sps:$4 sm:$0xff]   ;;  %v10146_v58 = vld [vmem:[#allocation10 + $0xe4] ss:$48 sps:$4 sm:$0xff]  }
 0x42d   :  { %6629 = vmatprep.subr.bf16.mxu0 %v10077_v37 }
 0x42f   :  { %6466 = vmatpush1.bf16.msra.mxu1 %v10072_v59 }
 0x430   :  { %6630 = vmatpush1.bf16.msra.mxu0 %v10075_v60  ;;  %6467 = vmatprep.subr.bf16.mxu1 %v10080_v61  ;;  %v10149_v60 = vld [vmem:[#allocation10 + $0xec] ss:$48 sps:$4 sm:$0xff]  }
 0x431   :  { %6631 = vmatprep.subr.bf16.mxu0 %v10083_v62 }
 0x433   :  { %6468 = vmatpush1.bf16.msra.mxu1 %v10078_v63 }
 0x434   :  { %6632 = vmatpush1.bf16.msra.mxu0 %v10081_v42  ;;  %6469 = vmatprep.subr.bf16.mxu1 %v10086_v1  ;;  %v10144_v1 = vld [vmem:[#allocation10 + $0xe0] ss:$48 sps:$4 sm:$0xff]  }
 0x435   :  { %6633 = vmatprep.subr.bf16.mxu0 %v10089_v5 }
 0x437   :  { %6470 = vmatpush1.bf16.msra.mxu1 %v10084_v6 }
 0x438   :  { %6634 = vmatpush1.bf16.msra.mxu0 %v10087_v10  ;;  %6471 = vmatprep.subr.bf16.mxu1 %v10092_v11  ;;  %v10152_v10 = vld [vmem:[#allocation10 + $0x144] ss:$48 sps:$4 sm:$0xff]   ;;  %v10155_v11 = vld [vmem:[#allocation10 + $0x14c] ss:$48 sps:$4 sm:$0xff]  }
 0x439   :  { %6635 = vmatprep.subr.bf16.mxu0 %v10095_v12  ;;  %v10150_v12 = vld [vmem:[#allocation10 + $0x140] ss:$48 sps:$4 sm:$0xff]  }
 0x43b   :  { %6472 = vmatpush1.bf16.msra.mxu1 %v10090_v46  ;;  %v10153_v46 = vld [vmem:[#allocation10 + $0x148] ss:$48 sps:$4 sm:$0xff]  }
 0x43c   :  { %6636 = vmatpush1.bf16.msra.mxu0 %v10093_v9  ;;  %6473 = vmatprep.subr.bf16.mxu1 %v10098_v13  ;;  %v10158_v9 = vld [vmem:[#allocation10 + $0x1a4] ss:$48 sps:$4 sm:$0xff]   ;;  %v10161_v13 = vld [vmem:[#allocation10 + $0x1ac] ss:$48 sps:$4 sm:$0xff]  }
 0x43d   :  { %6637 = vmatprep.subr.bf16.mxu0 %v10101_v15  ;;  %v10156_v15 = vld [vmem:[#allocation10 + $0x1a0] ss:$48 sps:$4 sm:$0xff]  }
 0x43f   :  { %6474 = vmatpush1.bf16.msra.mxu1 %v10096_v16  ;;  %v10159_v16 = vld [vmem:[#allocation10 + $0x1a8] ss:$48 sps:$4 sm:$0xff]  }
 0x440   :  { %6638 = vmatpush1.bf16.msra.mxu0 %v10099_v17  ;;  %6475 = vmatprep.subr.bf16.mxu1 %v10104_v18  ;;  %v10164_v17 = vld [vmem:[#allocation10 + $0x204] ss:$48 sps:$4 sm:$0xff]   ;;  %v10167_v18 = vld [vmem:[#allocation10 + $0x20c] ss:$48 sps:$4 sm:$0xff]  }
 0x441   :  { %6639 = vmatprep.subr.bf16.mxu0 %v10107_v19  ;;  %v10162_v19 = vld [vmem:[#allocation10 + $0x200] ss:$48 sps:$4 sm:$0xff]  }
 0x443   :  { %6476 = vmatpush1.bf16.msra.mxu1 %v10102_v20  ;;  %v10165_v20 = vld [vmem:[#allocation10 + $0x208] ss:$48 sps:$4 sm:$0xff]  }
 0x444   :  { %6640 = vmatpush1.bf16.msra.mxu0 %v10105_v26  ;;  %6486 = vmatprep.subr.bf16.mxu1 %v10110_v21  ;;  %v10170_v26 = vld [vmem:[#allocation10 + $0x264] ss:$48 sps:$4 sm:$0xff]   ;;  %v10173_v21 = vld [vmem:[#allocation10 + $0x26c] ss:$48 sps:$4 sm:$0xff]  }
 0x445   :  { %6650 = vmatprep.subr.bf16.mxu0 %v10113_v22  ;;  %v10168_v22 = vld [vmem:[#allocation10 + $0x260] ss:$48 sps:$4 sm:$0xff]  }
 0x446   :  { %6478 = vmatmul.mubr.bf16.vlgmr.msra.gmra.mrb[24].mxu1 %v11321_v7 }
 0x447   :  { %6642 = vmatmul.mubr.bf16.vlgmr.msra.gmra.mrb[20].mxu0 %v11321_v7  ;;  %6487 = vmatpush1.bf16.msra.mxu1 %v10108_v23  ;;  %v10171_v23 = vld [vmem:[#allocation10 + $0x268] ss:$48 sps:$4 sm:$0xff]  }
 0x448   :  { %6651 = vmatpush1.bf16.msra.mxu0 %v10111_v3  ;;  %6488 = vmatprep.subr.bf16.mxu1 %v10116_v52  ;;  %v10176_v3 = vld [vmem:[#allocation10 + $0x2c4] ss:$48 sps:$4 sm:$0xff]   ;;  %v10179_v52 = vld [vmem:[#allocation10 + $0x2cc] ss:$48 sps:$4 sm:$0xff]  }
 0x449   :  { %6652 = vmatprep.subr.bf16.mxu0 %v10119_v27  ;;  %6518 = vmatprep.mubr.bf16.mxu1 %v10927_v0  ;;  %v10174_v27 = vld [vmem:[#allocation10 + $0x2c0] ss:$48 sps:$4 sm:$0xff]  }
 0x44a   :  { %6682 = vmatprep.mubr.bf16.mxu0 %v10927_v0 }
 0x44b   :  { %6489 = vmatpush1.bf16.msra.mxu1 %v10114_v41  ;;  %v10177_v41 = vld [vmem:[#allocation10 + $0x2c8] ss:$48 sps:$4 sm:$0xff]  }
 0x44c   :  { %6653 = vmatpush1.bf16.msra.mxu0 %v10117_v29  ;;  %6490 = vmatprep.subr.bf16.mxu1 %v10122_v30  ;;  %v10182_v29 = vld [vmem:[#allocation10 + $0x324] ss:$48 sps:$4 sm:$0xff]   ;;  %v10185_v30 = vld [vmem:[#allocation10 + $0x32c] ss:$48 sps:$4 sm:$0xff]  }
 0x44d   :  { %6654 = vmatprep.subr.bf16.mxu0 %v10125_v31  ;;  %v10180_v31 = vld [vmem:[#allocation10 + $0x320] ss:$48 sps:$4 sm:$0xff]  }
 0x44f   :  { %6491 = vmatpush1.bf16.msra.mxu1 %v10120_v32  ;;  %v10183_v32 = vld [vmem:[#allocation10 + $0x328] ss:$48 sps:$4 sm:$0xff]  }
 0x450   :  { %6655 = vmatpush1.bf16.msra.mxu0 %v10123_v33  ;;  %6492 = vmatprep.subr.bf16.mxu1 %v10128_v34  ;;  %v10188_v33 = vld [vmem:[#allocation10 + $0x384] ss:$48 sps:$4 sm:$0xff]   ;;  %v10191_v34 = vld [vmem:[#allocation10 + $0x38c] ss:$48 sps:$4 sm:$0xff]  }
 0x451   :  { %6656 = vmatprep.subr.bf16.mxu0 %v10131_v35  ;;  %v10186_v35 = vld [vmem:[#allocation10 + $0x380] ss:$48 sps:$4 sm:$0xff]  }
 0x453   :  { %6493 = vmatpush1.bf16.msra.mxu1 %v10126_v38  ;;  %v10189_v38 = vld [vmem:[#allocation10 + $0x388] ss:$48 sps:$4 sm:$0xff]  }
 0x454   :  { %6657 = vmatpush1.bf16.msra.mxu0 %v10129_v39  ;;  %6691 = vmatprep.subr.bf16.mxu1 %v10134_v48  ;;  %v10194_v39 = vld [vmem:[#allocation10 + $0x3e4] ss:$48 sps:$4 sm:$0xff]   ;;  %v10197_v48 = vld [vmem:[#allocation10 + $0x3ec] ss:$48 sps:$4 sm:$0xff]  }
 0x455   :  { %6855 = vmatprep.subr.bf16.mxu0 %v10137_v49  ;;  %v10192_v49 = vld [vmem:[#allocation10 + $0x3e0] ss:$48 sps:$4 sm:$0xff]  }
 0x456   :  { %8867 = vmatmul.mubr.msk.bf16.vlgmr.msra.gmra.mrb[24].mxu1 %vm310_vm0, %v11328_v24 }
 0x457   :  { %8868 = vmatmul.mubr.msk.bf16.vlgmr.msra.gmra.mrb[20].mxu0 %vm310_vm0, %v11328_v24  ;;  %6692 = vmatpush1.bf16.msra.mxu1 %v10132_v50  ;;  %v10195_v50 = vld [vmem:[#allocation10 + $0x3e8] ss:$48 sps:$4 sm:$0xff]  }
 0x458   :  { %6723 = vmatprep.mubr.bf16.mxu1 %v11281_v44  ;;  %6856 = vmatpush1.bf16.msra.mxu0 %v10135_v51  ;;  %v10200_v51 = vld [vmem:[#allocation10 + $0x444] ss:$48 sps:$4 sm:$0xff]  }
 0x459   :  { %6887 = vmatprep.mubr.bf16.mxu0 %v11281_v44  ;;  %v11354_v37 = vpop.f32.mrb[20].mxu1  ;;  %v11356_v59 = vpop.f32.mrb[16].mxu0  ;;  %6693 = vmatprep.subr.bf16.mxu1 %v10140_v53  ;;  %v10147_v44 = vld [vmem:[#allocation10 + $0xe8] ss:$48 sps:$4 sm:$0xff]   ;;  %v10203_v53 = vld [vmem:[#allocation10 + $0x44c] ss:$48 sps:$4 sm:$0xff]  }
 0x45a   :  { %v11358_v61 = vpop.f32.mrb[21].mxu1  ;;  %v11360_v62 = vpop.f32.mrb[17].mxu0  ;;  %6857 = vmatprep.subr.bf16.mxu0 %v10143_v55  ;;  %v10198_v55 = vld [vmem:[#allocation10 + $0x440] ss:$48 sps:$4 sm:$0xff]  }
 0x45b   :  { %v6196_v63 = vpop.f32.mrb[22].mxu1  ;;  %v6360_v42 = vpop.f32.mrb[18].mxu0  ;;  %6694 = vmatpush1.bf16.msra.mxu1 %v10138_v56  ;;  %v10201_v56 = vld [vmem:[#allocation10 + $0x448] ss:$48 sps:$4 sm:$0xff]  }
 0x45c   :  { %6858 = vmatpush1.bf16.msra.mxu0 %v10141_v57  ;;  %v6197_v5 = vpop.f32.mrb[23].mxu1  ;;  %v6361_v6 = vpop.f32.mrb[19].mxu0  ;;  %6695 = vmatprep.subr.bf16.mxu1 %v10146_v58  ;;  %v10206_v57 = vld [vmem:[#allocation10 + $0x4a4] ss:$48 sps:$4 sm:$0xff]   ;;  %v10209_v58 = vld [vmem:[#allocation10 + $0x4ac] ss:$48 sps:$4 sm:$0xff]  }
 0x45d   :  { %6859 = vmatprep.subr.bf16.mxu0 %v10149_v60  ;;  %v10204_v60 = vld [vmem:[#allocation10 + $0x4a0] ss:$48 sps:$4 sm:$0xff]   ;;  %v10207_v63 = vld [vmem:[#allocation10 + $0x4a8] ss:$48 sps:$4 sm:$0xff]   ;;  %v10212_v42 = vld [vmem:[#allocation10 + $0x504] ss:$48 sps:$4 sm:$0xff]  }
 0x45e   :  { %v10210_v5 = vld [vmem:[#allocation10 + $0x500] ss:$48 sps:$4 sm:$0xff]   ;;  %v10213_v6 = vld [vmem:[#allocation10 + $0x508] ss:$48 sps:$4 sm:$0xff]  }
 0x45f   :  { %6696 = vmatpush1.bf16.msra.mxu1 %v10144_v1  ;;  %v10215_v1 = vld [vmem:[#allocation10 + $0x50c] ss:$48 sps:$4 sm:$0xff]  }
 0x460   :  { %6860 = vmatpush1.bf16.msra.mxu0 %v10147_v44  ;;  %6697 = vmatprep.subr.bf16.mxu1 %v10152_v10  ;;  %v10218_v44 = vld [vmem:[#allocation10 + $0x564] ss:$48 sps:$4 sm:$0xff]   ;;  %v10221_v10 = vld [vmem:[#allocation10 + $0x56c] ss:$48 sps:$4 sm:$0xff]  }
 0x461   :  { %6861 = vmatprep.subr.bf16.mxu0 %v10155_v11  ;;  %v10216_v11 = vld [vmem:[#allocation10 + $0x560] ss:$48 sps:$4 sm:$0xff]  }
 0x463   :  { %6698 = vmatpush1.bf16.msra.mxu1 %v10150_v12  ;;  %v10219_v12 = vld [vmem:[#allocation10 + $0x568] ss:$48 sps:$4 sm:$0xff]  }
 0x464   :  { %6862 = vmatpush1.bf16.msra.mxu0 %v10153_v46  ;;  %6699 = vmatprep.subr.bf16.mxu1 %v10158_v9  ;;  %v10224_v46 = vld [vmem:[#allocation10 + $0x5c4] ss:$48 sps:$4 sm:$0xff]   ;;  %v10227_v9 = vld [vmem:[#allocation10 + $0x5cc] ss:$48 sps:$4 sm:$0xff]  }
 0x465   :  { %6863 = vmatprep.subr.bf16.mxu0 %v10161_v13  ;;  %v10222_v13 = vld [vmem:[#allocation10 + $0x5c0] ss:$48 sps:$4 sm:$0xff]  }
 0x467   :  { %6700 = vmatpush1.bf16.msra.mxu1 %v10156_v15  ;;  %v10225_v15 = vld [vmem:[#allocation10 + $0x5c8] ss:$48 sps:$4 sm:$0xff]  }
 0x468   :  { %6864 = vmatpush1.bf16.msra.mxu0 %v10159_v16  ;;  %6701 = vmatprep.subr.bf16.mxu1 %v10164_v17  ;;  %v10230_v16 = vld [vmem:[#allocation10 + $0x624] ss:$48 sps:$4 sm:$0xff]   ;;  %v10233_v17 = vld [vmem:[#allocation10 + $0x62c] ss:$48 sps:$4 sm:$0xff]  }
 0x469   :  { %6865 = vmatprep.subr.bf16.mxu0 %v10167_v18  ;;  %v10228_v18 = vld [vmem:[#allocation10 + $0x620] ss:$48 sps:$4 sm:$0xff]  }
 0x46b   :  { %6702 = vmatpush1.bf16.msra.mxu1 %v10162_v19  ;;  %v10231_v19 = vld [vmem:[#allocation10 + $0x628] ss:$48 sps:$4 sm:$0xff]  }
 0x46c   :  { %6866 = vmatpush1.bf16.msra.mxu0 %v10165_v20  ;;  %6703 = vmatprep.subr.bf16.mxu1 %v10170_v26  ;;  %v10236_v20 = vld [vmem:[#allocation10 + $0x684] ss:$48 sps:$4 sm:$0xff]   ;;  %v10239_v26 = vld [vmem:[#allocation10 + $0x68c] ss:$48 sps:$4 sm:$0xff]  }
 0x46d   :  { %6867 = vmatprep.subr.bf16.mxu0 %v10173_v21  ;;  %v10234_v21 = vld [vmem:[#allocation10 + $0x680] ss:$48 sps:$4 sm:$0xff]  }
 0x46f   :  { %6704 = vmatpush1.bf16.msra.mxu1 %v10168_v22  ;;  %v10237_v22 = vld [vmem:[#allocation10 + $0x688] ss:$48 sps:$4 sm:$0xff]  }
 0x470   :  { %6868 = vmatpush1.bf16.msra.mxu0 %v10171_v23  ;;  %6705 = vmatprep.subr.bf16.mxu1 %v10176_v3  ;;  %v10242_v23 = vld [vmem:[#allocation10 + $0x6e4] ss:$48 sps:$4 sm:$0xff]   ;;  %v10245_v3 = vld [vmem:[#allocation10 + $0x6ec] ss:$48 sps:$4 sm:$0xff]  }
 0x471   :  { %6869 = vmatprep.subr.bf16.mxu0 %v10179_v52  ;;  %v10240_v52 = vld [vmem:[#allocation10 + $0x6e0] ss:$48 sps:$4 sm:$0xff]  }
 0x473   :  { %6706 = vmatpush1.bf16.msra.mxu1 %v10174_v27  ;;  %v10243_v27 = vld [vmem:[#allocation10 + $0x6e8] ss:$48 sps:$4 sm:$0xff]  }
 0x474   :  { %6870 = vmatpush1.bf16.msra.mxu0 %v10177_v41  ;;  %6707 = vmatprep.subr.bf16.mxu1 %v10182_v29  ;;  %v10248_v41 = vld [vmem:[#allocation10 + $0x744] ss:$48 sps:$4 sm:$0xff]   ;;  %v10246_v29 = vld [vmem:[#allocation10 + $0x740] ss:$48 sps:$4 sm:$0xff]  }
 0x475   :  { %6871 = vmatprep.subr.bf16.mxu0 %v10185_v30  ;;  %v10249_v30 = vld [vmem:[#allocation10 + $0x748] ss:$48 sps:$4 sm:$0xff]  }
 0x477   :  { %6708 = vmatpush1.bf16.msra.mxu1 %v10180_v31  ;;  %v10254_v31 = vld [vmem:[#allocation10 + $0x7a4] ss:$48 sps:$4 sm:$0xff]  }
 0x478   :  { %6872 = vmatpush1.bf16.msra.mxu0 %v10183_v32  ;;  %6709 = vmatprep.subr.bf16.mxu1 %v10188_v33  ;;  %v10257_v32 = vld [vmem:[#allocation10 + $0x7ac] ss:$48 sps:$4 sm:$0xff]   ;;  %v10255_v33 = vld [vmem:[#allocation10 + $0x7a8] ss:$48 sps:$4 sm:$0xff]  }
 0x479   :  { %6873 = vmatprep.subr.bf16.mxu0 %v10191_v34  ;;  %v10260_v34 = vld [vmem:[#allocation10 + $0x804] ss:$48 sps:$4 sm:$0xff]  }
 0x47b   :  { %6710 = vmatpush1.bf16.msra.mxu1 %v10186_v35  ;;  %v10263_v35 = vld [vmem:[#allocation10 + $0x80c] ss:$48 sps:$4 sm:$0xff]  }
 0x47c   :  { %6874 = vmatpush1.bf16.msra.mxu0 %v10189_v38  ;;  %6711 = vmatprep.subr.bf16.mxu1 %v10194_v39  ;;  %v10258_v38 = vld [vmem:[#allocation10 + $0x800] ss:$48 sps:$4 sm:$0xff]   ;;  %v10261_v39 = vld [vmem:[#allocation10 + $0x808] ss:$48 sps:$4 sm:$0xff]  }
 0x47d   :  { %6875 = vmatprep.subr.bf16.mxu0 %v10197_v48  ;;  %v10266_v48 = vld [vmem:[#allocation10 + $0x864] ss:$48 sps:$4 sm:$0xff]  }
 0x47f   :  { %6712 = vmatpush1.bf16.msra.mxu1 %v10192_v49  ;;  %v10269_v49 = vld [vmem:[#allocation10 + $0x86c] ss:$48 sps:$4 sm:$0xff]  }
 0x480   :  { %6876 = vmatpush1.bf16.msra.mxu0 %v10195_v50  ;;  %6713 = vmatprep.subr.bf16.mxu1 %v10200_v51  ;;  %v10264_v50 = vld [vmem:[#allocation10 + $0x860] ss:$48 sps:$4 sm:$0xff]   ;;  %v10267_v51 = vld [vmem:[#allocation10 + $0x868] ss:$48 sps:$4 sm:$0xff]  }
 0x481   :  { %6877 = vmatprep.subr.bf16.mxu0 %v10203_v53  ;;  %v10272_v53 = vld [vmem:[#allocation10 + $0x8c4] ss:$48 sps:$4 sm:$0xff]  }
 0x483   :  { %6714 = vmatpush1.bf16.msra.mxu1 %v10198_v55  ;;  %v10275_v55 = vld [vmem:[#allocation10 + $0x8cc] ss:$48 sps:$4 sm:$0xff]  }
 0x484   :  { %6878 = vmatpush1.bf16.msra.mxu0 %v10201_v56  ;;  %6715 = vmatprep.subr.bf16.mxu1 %v10206_v57  ;;  %v10270_v56 = vld [vmem:[#allocation10 + $0x8c0] ss:$48 sps:$4 sm:$0xff]   ;;  %v10273_v57 = vld [vmem:[#allocation10 + $0x8c8] ss:$48 sps:$4 sm:$0xff]  }
 0x485   :  { %6879 = vmatprep.subr.bf16.mxu0 %v10209_v58  ;;  %v10278_v58 = vld [vmem:[#allocation10 + $0x924] ss:$48 sps:$4 sm:$0xff]  }
 0x487   :  { %6716 = vmatpush1.bf16.msra.mxu1 %v10204_v60  ;;  %v10281_v60 = vld [vmem:[#allocation10 + $0x92c] ss:$48 sps:$4 sm:$0xff]  }
 0x488   :  { %6880 = vmatpush1.bf16.msra.mxu0 %v10207_v63  ;;  %6717 = vmatprep.subr.bf16.mxu1 %v10212_v42  ;;  %v10276_v63 = vld [vmem:[#allocation10 + $0x920] ss:$48 sps:$4 sm:$0xff]   ;;  %v10279_v42 = vld [vmem:[#allocation10 + $0x928] ss:$48 sps:$4 sm:$0xff]  }
 0x489   :  { %6881 = vmatprep.subr.bf16.mxu0 %v10215_v1  ;;  %v10284_v1 = vld [vmem:[#allocation10 + $0x984] ss:$48 sps:$4 sm:$0xff]  }
 0x48b   :  { %6718 = vmatpush1.bf16.msra.mxu1 %v10210_v5  ;;  %v10287_v5 = vld [vmem:[#allocation10 + $0x98c] ss:$48 sps:$4 sm:$0xff]  }
 0x48c   :  { %6882 = vmatpush1.bf16.msra.mxu0 %v10213_v6  ;;  %6719 = vmatprep.subr.bf16.mxu1 %v10218_v44  ;;  %v10282_v6 = vld [vmem:[#allocation10 + $0x980] ss:$48 sps:$4 sm:$0xff]   ;;  %v10285_v44 = vld [vmem:[#allocation10 + $0x988] ss:$48 sps:$4 sm:$0xff]  }
 0x48d   :  { %6883 = vmatprep.subr.bf16.mxu0 %v10221_v10  ;;  %v10290_v10 = vld [vmem:[#allocation10 + $0x9e4] ss:$48 sps:$4 sm:$0xff]  }
 0x48f   :  { %6720 = vmatpush1.bf16.msra.mxu1 %v10216_v11  ;;  %v10293_v11 = vld [vmem:[#allocation10 + $0x9ec] ss:$48 sps:$4 sm:$0xff]  }
 0x490   :  { %6884 = vmatpush1.bf16.msra.mxu0 %v10219_v12  ;;  %6721 = vmatprep.subr.bf16.mxu1 %v10224_v46  ;;  %v10288_v12 = vld [vmem:[#allocation10 + $0x9e0] ss:$48 sps:$4 sm:$0xff]   ;;  %v10291_v46 = vld [vmem:[#allocation10 + $0x9e8] ss:$48 sps:$4 sm:$0xff]  }
 0x491   :  { %6885 = vmatprep.subr.bf16.mxu0 %v10227_v9  ;;  %v10296_v9 = vld [vmem:[#allocation10 + $0xa44] ss:$48 sps:$4 sm:$0xff]  }
 0x493   :  { %6722 = vmatpush1.bf16.msra.mxu1 %v10222_v13  ;;  %v10299_v13 = vld [vmem:[#allocation10 + $0xa4c] ss:$48 sps:$4 sm:$0xff]  }
 0x494   :  { %6886 = vmatpush1.bf16.msra.mxu0 %v10225_v15  ;;  %6732 = vmatprep.subr.bf16.mxu1 %v10230_v16  ;;  %v10294_v15 = vld [vmem:[#allocation10 + $0xa40] ss:$48 sps:$4 sm:$0xff]   ;;  %v10297_v16 = vld [vmem:[#allocation10 + $0xa48] ss:$48 sps:$4 sm:$0xff]  }
 0x495   :  { %6896 = vmatprep.subr.bf16.mxu0 %v10233_v17  ;;  %v10302_v17 = vld [vmem:[#allocation10 + $0xaa4] ss:$48 sps:$4 sm:$0xff]  }
 0x496   :  { %6724 = vmatmul.mubr.bf16.vlgmr.msra.gmra.mrb[28].mxu1 %v11283_v8 }
 0x497   :  { %6888 = vmatmul.mubr.bf16.vlgmr.msra.gmra.mrb[24].mxu0 %v11283_v8  ;;  %6733 = vmatpush1.bf16.msra.mxu1 %v10228_v18  ;;  %v10251_v8 = vld [vmem:[#allocation10 + $0x74c] ss:$48 sps:$4 sm:$0xff]  }
 0x498   :  { %6764 = vmatprep.mubr.bf16.mxu1 %v11287_v14  ;;  %6897 = vmatpush1.bf16.msra.mxu0 %v10231_v19  ;;  %v10305_v18 = vld [vmem:[#allocation10 + $0xaac] ss:$48 sps:$4 sm:$0xff]   ;;  %v10300_v19 = vld [vmem:[#allocation10 + $0xaa0] ss:$48 sps:$4 sm:$0xff]  }
 0x499   :  { %6928 = vmatprep.mubr.bf16.mxu0 %v11287_v14  ;;  %6734 = vmatprep.subr.bf16.mxu1 %v10236_v20  ;;  %v10252_v14 = vld [vmem:[#allocation10 + $0x7a0] ss:$48 sps:$4 sm:$0xff]   ;;  %v10303_v20 = vld [vmem:[#allocation10 + $0xaa8] ss:$48 sps:$4 sm:$0xff]  }
 0x49a   :  { %6898 = vmatprep.subr.bf16.mxu0 %v10239_v26  ;;  %v10308_v26 = vld [vmem:[#allocation10 + $0xb04] ss:$48 sps:$4 sm:$0xff]  }
 0x49b   :  { %6735 = vmatpush1.bf16.msra.mxu1 %v10234_v21  ;;  %v10311_v21 = vld [vmem:[#allocation10 + $0xb0c] ss:$48 sps:$4 sm:$0xff]  }
 0x49c   :  { %6899 = vmatpush1.bf16.msra.mxu0 %v10237_v22  ;;  %6736 = vmatprep.subr.bf16.mxu1 %v10242_v23  ;;  %v10306_v22 = vld [vmem:[#allocation10 + $0xb00] ss:$48 sps:$4 sm:$0xff]   ;;  %v10309_v23 = vld [vmem:[#allocation10 + $0xb08] ss:$48 sps:$4 sm:$0xff]  }
 0x49d   :  { %6900 = vmatprep.subr.bf16.mxu0 %v10245_v3  ;;  %v10314_v3 = vld [vmem:[#allocation10 + $0xb64] ss:$48 sps:$4 sm:$0xff]  }
 0x49f   :  { %6737 = vmatpush1.bf16.msra.mxu1 %v10240_v52  ;;  %v10317_v52 = vld [vmem:[#allocation10 + $0xb6c] ss:$48 sps:$4 sm:$0xff]  }
 0x4a0   :  { %6901 = vmatpush1.bf16.msra.mxu0 %v10243_v27  ;;  %6738 = vmatprep.subr.bf16.mxu1 %v10248_v41  ;;  %v10312_v27 = vld [vmem:[#allocation10 + $0xb60] ss:$48 sps:$4 sm:$0xff]   ;;  %v10315_v41 = vld [vmem:[#allocation10 + $0xb68] ss:$48 sps:$4 sm:$0xff]  }
 0x4a1   :  { %6902 = vmatprep.subr.bf16.mxu0 %v10251_v8  ;;  %v10320_v8 = vld [vmem:[#allocation10 + $0xbc4] ss:$48 sps:$4 sm:$0xff]  }
 0x4a3   :  { %6739 = vmatpush1.bf16.msra.mxu1 %v10246_v29  ;;  %v10323_v29 = vld [vmem:[#allocation10 + $0xbcc] ss:$48 sps:$4 sm:$0xff]  }
 0x4a4   :  { %6903 = vmatpush1.bf16.msra.mxu0 %v10249_v30  ;;  %6740 = vmatprep.subr.bf16.mxu1 %v10254_v31  ;;  %v10318_v30 = vld [vmem:[#allocation10 + $0xbc0] ss:$48 sps:$4 sm:$0xff]   ;;  %v10321_v31 = vld [vmem:[#allocation10 + $0xbc8] ss:$48 sps:$4 sm:$0xff]  }
 0x4a5   :  { %6904 = vmatprep.subr.bf16.mxu0 %v10257_v32  ;;  %v10326_v32 = vld [vmem:[#allocation10 + $0xc24] ss:$48 sps:$4 sm:$0xff]  }
 0x4a7   :  { %6741 = vmatpush1.bf16.msra.mxu1 %v10252_v14  ;;  %v10329_v14 = vld [vmem:[#allocation10 + $0xc2c] ss:$48 sps:$4 sm:$0xff]  }
 0x4a8   :  { %6905 = vmatpush1.bf16.msra.mxu0 %v10255_v33  ;;  %6742 = vmatprep.subr.bf16.mxu1 %v10260_v34  ;;  %v10324_v33 = vld [vmem:[#allocation10 + $0xc20] ss:$48 sps:$4 sm:$0xff]   ;;  %v10327_v34 = vld [vmem:[#allocation10 + $0xc28] ss:$48 sps:$4 sm:$0xff]  }
 0x4a9   :  { %6906 = vmatprep.subr.bf16.mxu0 %v10263_v35  ;;  %v10332_v35 = vld [vmem:[#allocation10 + $0xc84] ss:$48 sps:$4 sm:$0xff]  }
 0x4ab   :  { %6743 = vmatpush1.bf16.msra.mxu1 %v10258_v38  ;;  %v10335_v38 = vld [vmem:[#allocation10 + $0xc8c] ss:$48 sps:$4 sm:$0xff]  }
 0x4ac   :  { %6907 = vmatpush1.bf16.msra.mxu0 %v10261_v39  ;;  %6744 = vmatprep.subr.bf16.mxu1 %v10266_v48  ;;  %v10330_v39 = vld [vmem:[#allocation10 + $0xc80] ss:$48 sps:$4 sm:$0xff]   ;;  %v10333_v48 = vld [vmem:[#allocation10 + $0xc88] ss:$48 sps:$4 sm:$0xff]  }
 0x4ad   :  { %6908 = vmatprep.subr.bf16.mxu0 %v10269_v49  ;;  %v10338_v49 = vld [vmem:[#allocation10 + $0xce4] ss:$48 sps:$4 sm:$0xff]  }
 0x4af   :  { %6745 = vmatpush1.bf16.msra.mxu1 %v10264_v50  ;;  %v10341_v50 = vld [vmem:[#allocation10 + $0xcec] ss:$48 sps:$4 sm:$0xff]  }
 0x4b0   :  { %6909 = vmatpush1.bf16.msra.mxu0 %v10267_v51  ;;  %6746 = vmatprep.subr.bf16.mxu1 %v10272_v53  ;;  %v10336_v51 = vld [vmem:[#allocation10 + $0xce0] ss:$48 sps:$4 sm:$0xff]   ;;  %v10339_v53 = vld [vmem:[#allocation10 + $0xce8] ss:$48 sps:$4 sm:$0xff]  }
 0x4b1   :  { %6910 = vmatprep.subr.bf16.mxu0 %v10275_v55  ;;  %v10344_v55 = vld [vmem:[#allocation10 + $0xd44] ss:$48 sps:$4 sm:$0xff]  }
 0x4b3   :  { %6747 = vmatpush1.bf16.msra.mxu1 %v10270_v56  ;;  %v10342_v56 = vld [vmem:[#allocation10 + $0xd40] ss:$48 sps:$4 sm:$0xff]  }
 0x4b4   :  { %6911 = vmatpush1.bf16.msra.mxu0 %v10273_v57  ;;  %6748 = vmatprep.subr.bf16.mxu1 %v10278_v58  ;;  %v10345_v57 = vld [vmem:[#allocation10 + $0xd48] ss:$48 sps:$4 sm:$0xff]   ;;  %v10350_v58 = vld [vmem:[#allocation10 + $0xda4] ss:$48 sps:$4 sm:$0xff]  }
 0x4b5   :  { %6912 = vmatprep.subr.bf16.mxu0 %v10281_v60  ;;  %v10353_v60 = vld [vmem:[#allocation10 + $0xdac] ss:$48 sps:$4 sm:$0xff]  }
 0x4b7   :  { %6749 = vmatpush1.bf16.msra.mxu1 %v10276_v63  ;;  %v10351_v63 = vld [vmem:[#allocation10 + $0xda8] ss:$48 sps:$4 sm:$0xff]  }
 0x4b8   :  { %6913 = vmatpush1.bf16.msra.mxu0 %v10279_v42  ;;  %6750 = vmatprep.subr.bf16.mxu1 %v10284_v1  ;;  %v10356_v42 = vld [vmem:[#allocation10 + $0xe04] ss:$48 sps:$4 sm:$0xff]   ;;  %v10359_v1 = vld [vmem:[#allocation10 + $0xe0c] ss:$48 sps:$4 sm:$0xff]  }
 0x4b9   :  { %6914 = vmatprep.subr.bf16.mxu0 %v10287_v5  ;;  %v10354_v5 = vld [vmem:[#allocation10 + $0xe00] ss:$48 sps:$4 sm:$0xff]  }
 0x4bb   :  { %6751 = vmatpush1.bf16.msra.mxu1 %v10282_v6  ;;  %v10357_v6 = vld [vmem:[#allocation10 + $0xe08] ss:$48 sps:$4 sm:$0xff]  }
 0x4bc   :  { %6915 = vmatpush1.bf16.msra.mxu0 %v10285_v44  ;;  %6752 = vmatprep.subr.bf16.mxu1 %v10290_v10  ;;  %v10362_v44 = vld [vmem:[#allocation10 + $0xe64] ss:$48 sps:$4 sm:$0xff]   ;;  %v10365_v10 = vld [vmem:[#allocation10 + $0xe6c] ss:$48 sps:$4 sm:$0xff]  }
 0x4bd   :  { %6916 = vmatprep.subr.bf16.mxu0 %v10293_v11  ;;  %v10360_v11 = vld [vmem:[#allocation10 + $0xe60] ss:$48 sps:$4 sm:$0xff]  }
 0x4bf   :  { %6753 = vmatpush1.bf16.msra.mxu1 %v10288_v12  ;;  %v10363_v12 = vld [vmem:[#allocation10 + $0xe68] ss:$48 sps:$4 sm:$0xff]  }
 0x4c0   :  { %6917 = vmatpush1.bf16.msra.mxu0 %v10291_v46  ;;  %6754 = vmatprep.subr.bf16.mxu1 %v10296_v9  ;;  %v10368_v46 = vld [vmem:[#allocation10 + $0xec4] ss:$48 sps:$4 sm:$0xff]   ;;  %v10371_v9 = vld [vmem:[#allocation10 + $0xecc] ss:$48 sps:$4 sm:$0xff]  }
 0x4c1   :  { %6918 = vmatprep.subr.bf16.mxu0 %v10299_v13  ;;  %v10366_v13 = vld [vmem:[#allocation10 + $0xec0] ss:$48 sps:$4 sm:$0xff]  }
 0x4c3   :  { %6755 = vmatpush1.bf16.msra.mxu1 %v10294_v15  ;;  %v10369_v15 = vld [vmem:[#allocation10 + $0xec8] ss:$48 sps:$4 sm:$0xff]  }
 0x4c4   :  { %6919 = vmatpush1.bf16.msra.mxu0 %v10297_v16  ;;  %6756 = vmatprep.subr.bf16.mxu1 %v10302_v17  ;;  %v10374_v16 = vld [vmem:[#allocation10 + $0xf24] ss:$48 sps:$4 sm:$0xff]   ;;  %v10377_v17 = vld [vmem:[#allocation10 + $0xf2c] ss:$48 sps:$4 sm:$0xff]  }
 0x4c5   :  { %6920 = vmatprep.subr.bf16.mxu0 %v10305_v18  ;;  %v10372_v18 = vld [vmem:[#allocation10 + $0xf20] ss:$48 sps:$4 sm:$0xff]  }
 0x4c7   :  { %6757 = vmatpush1.bf16.msra.mxu1 %v10300_v19  ;;  %v10375_v19 = vld [vmem:[#allocation10 + $0xf28] ss:$48 sps:$4 sm:$0xff]  }
 0x4c8   :  { %6921 = vmatpush1.bf16.msra.mxu0 %v10303_v20  ;;  %6758 = vmatprep.subr.bf16.mxu1 %v10308_v26  ;;  %v10380_v20 = vld [vmem:[#allocation10 + $0xf84] ss:$48 sps:$4 sm:$0xff]   ;;  %v10383_v26 = vld [vmem:[#allocation10 + $0xf8c] ss:$48 sps:$4 sm:$0xff]  }
 0x4c9   :  { %6922 = vmatprep.subr.bf16.mxu0 %v10311_v21  ;;  %v10378_v21 = vld [vmem:[#allocation10 + $0xf80] ss:$48 sps:$4 sm:$0xff]  }
 0x4cb   :  { %6759 = vmatpush1.bf16.msra.mxu1 %v10306_v22  ;;  %v10381_v22 = vld [vmem:[#allocation10 + $0xf88] ss:$48 sps:$4 sm:$0xff]  }
 0x4cc   :  { %6923 = vmatpush1.bf16.msra.mxu0 %v10309_v23  ;;  %6760 = vmatprep.subr.bf16.mxu1 %v10314_v3  ;;  %v10386_v23 = vld [vmem:[#allocation10 + $0xfe4] ss:$48 sps:$4 sm:$0xff]   ;;  %v10389_v3 = vld [vmem:[#allocation10 + $0xfec] ss:$48 sps:$4 sm:$0xff]  }
 0x4cd   :  { %6924 = vmatprep.subr.bf16.mxu0 %v10317_v52  ;;  %v10384_v52 = vld [vmem:[#allocation10 + $0xfe0] ss:$48 sps:$4 sm:$0xff]  }
 0x4cf   :  { %6761 = vmatpush1.bf16.msra.mxu1 %v10312_v27  ;;  %v10387_v27 = vld [vmem:[#allocation10 + $0xfe8] ss:$48 sps:$4 sm:$0xff]  }
 0x4d0   :  { %6925 = vmatpush1.bf16.msra.mxu0 %v10315_v41  ;;  %6762 = vmatprep.subr.bf16.mxu1 %v10320_v8  ;;  %v10392_v41 = vld [vmem:[#allocation10 + $0x1044] ss:$48 sps:$4 sm:$0xff]   ;;  %v10395_v8 = vld [vmem:[#allocation10 + $0x104c] ss:$48 sps:$4 sm:$0xff]  }
 0x4d1   :  { %6926 = vmatprep.subr.bf16.mxu0 %v10323_v29  ;;  %v10390_v29 = vld [vmem:[#allocation10 + $0x1040] ss:$48 sps:$4 sm:$0xff]  }
 0x4d3   :  { %6763 = vmatpush1.bf16.msra.mxu1 %v10318_v30  ;;  %v10393_v30 = vld [vmem:[#allocation10 + $0x1048] ss:$48 sps:$4 sm:$0xff]  }
 0x4d4   :  { %6927 = vmatpush1.bf16.msra.mxu0 %v10321_v31  ;;  %6773 = vmatprep.subr.bf16.mxu1 %v10326_v32  ;;  %v10398_v31 = vld [vmem:[#allocation10 + $0x10a4] ss:$48 sps:$4 sm:$0xff]   ;;  %v10401_v32 = vld [vmem:[#allocation10 + $0x10ac] ss:$48 sps:$4 sm:$0xff]  }
 0x4d5   :  { %6937 = vmatprep.subr.bf16.mxu0 %v10329_v14  ;;  %v10396_v14 = vld [vmem:[#allocation10 + $0x10a0] ss:$48 sps:$4 sm:$0xff]  }
 0x4d6   :  { %6765 = vmatmul.mubr.bf16.vlgmr.msra.gmra.mrb[28].mxu1 %v11298_v25 }
 0x4d7   :  { %6929 = vmatmul.mubr.bf16.vlgmr.msra.gmra.mrb[24].mxu0 %v11298_v25  ;;  %6774 = vmatpush1.bf16.msra.mxu1 %v10324_v33  ;;  %v10347_v25 = vld [vmem:[#allocation10 + $0xd4c] ss:$48 sps:$4 sm:$0xff]   ;;  %v10399_v33 = vld [vmem:[#allocation10 + $0x10a8] ss:$48 sps:$4 sm:$0xff]  }
 0x4d8   :  { %6805 = vmatprep.mubr.bf16.mxu1 %v11313_v36  ;;  %6938 = vmatpush1.bf16.msra.mxu0 %v10327_v34  ;;  %v10404_v34 = vld [vmem:[#allocation10 + $0x1104] ss:$48 sps:$4 sm:$0xff]  }
 0x4d9   :  { %6969 = vmatprep.mubr.bf16.mxu0 %v11313_v36  ;;  %6775 = vmatprep.subr.bf16.mxu1 %v10332_v35  ;;  %v10348_v36 = vld [vmem:[#allocation10 + $0xda0] ss:$48 sps:$4 sm:$0xff]   ;;  %v10407_v35 = vld [vmem:[#allocation10 + $0x110c] ss:$48 sps:$4 sm:$0xff]  }
 0x4da   :  { %6939 = vmatprep.subr.bf16.mxu0 %v10335_v38  ;;  %v10402_v38 = vld [vmem:[#allocation10 + $0x1100] ss:$48 sps:$4 sm:$0xff]  }
 0x4db   :  { %6776 = vmatpush1.bf16.msra.mxu1 %v10330_v39  ;;  %v10405_v39 = vld [vmem:[#allocation10 + $0x1108] ss:$48 sps:$4 sm:$0xff]  }
 0x4dc   :  { %6940 = vmatpush1.bf16.msra.mxu0 %v10333_v48  ;;  %6777 = vmatprep.subr.bf16.mxu1 %v10338_v49  ;;  %v10410_v48 = vld [vmem:[#allocation10 + $0x1164] ss:$48 sps:$4 sm:$0xff]   ;;  %v10413_v49 = vld [vmem:[#allocation10 + $0x116c] ss:$48 sps:$4 sm:$0xff]  }
 0x4dd   :  { %6941 = vmatprep.subr.bf16.mxu0 %v10341_v50  ;;  %v10408_v50 = vld [vmem:[#allocation10 + $0x1160] ss:$48 sps:$4 sm:$0xff]  }
 0x4df   :  { %6778 = vmatpush1.bf16.msra.mxu1 %v10336_v51  ;;  %v10411_v51 = vld [vmem:[#allocation10 + $0x1168] ss:$48 sps:$4 sm:$0xff]  }
 0x4e0   :  { %6942 = vmatpush1.bf16.msra.mxu0 %v10339_v53  ;;  %6779 = vmatprep.subr.bf16.mxu1 %v10344_v55  ;;  %v10416_v53 = vld [vmem:[#allocation10 + $0x11c4] ss:$48 sps:$4 sm:$0xff]   ;;  %v10419_v55 = vld [vmem:[#allocation10 + $0x11cc] ss:$48 sps:$4 sm:$0xff]  }
 0x4e1   :  { %6943 = vmatprep.subr.bf16.mxu0 %v10347_v25  ;;  %v10414_v25 = vld [vmem:[#allocation10 + $0x11c0] ss:$48 sps:$4 sm:$0xff]  }
 0x4e3   :  { %6780 = vmatpush1.bf16.msra.mxu1 %v10342_v56  ;;  %v10417_v56 = vld [vmem:[#allocation10 + $0x11c8] ss:$48 sps:$4 sm:$0xff]  }
 0x4e4   :  { %6944 = vmatpush1.bf16.msra.mxu0 %v10345_v57  ;;  %6781 = vmatprep.subr.bf16.mxu1 %v10350_v58  ;;  %v10422_v57 = vld [vmem:[#allocation10 + $0x1224] ss:$48 sps:$4 sm:$0xff]   ;;  %v10425_v58 = vld [vmem:[#allocation10 + $0x122c] ss:$48 sps:$4 sm:$0xff]  }
 0x4e5   :  { %6945 = vmatprep.subr.bf16.mxu0 %v10353_v60  ;;  %v10420_v60 = vld [vmem:[#allocation10 + $0x1220] ss:$48 sps:$4 sm:$0xff]  }
 0x4e7   :  { %6782 = vmatpush1.bf16.msra.mxu1 %v10348_v36  ;;  %v10423_v36 = vld [vmem:[#allocation10 + $0x1228] ss:$48 sps:$4 sm:$0xff]  }
 0x4e8   :  { %6946 = vmatpush1.bf16.msra.mxu0 %v10351_v63  ;;  %6783 = vmatprep.subr.bf16.mxu1 %v10356_v42  ;;  %v10428_v63 = vld [vmem:[#allocation10 + $0x1284] ss:$48 sps:$4 sm:$0xff]   ;;  %v10431_v42 = vld [vmem:[#allocation10 + $0x128c] ss:$48 sps:$4 sm:$0xff]  }
 0x4e9   :  { %6947 = vmatprep.subr.bf16.mxu0 %v10359_v1  ;;  %v10426_v1 = vld [vmem:[#allocation10 + $0x1280] ss:$48 sps:$4 sm:$0xff]  }
 0x4eb   :  { %6784 = vmatpush1.bf16.msra.mxu1 %v10354_v5  ;;  %v10429_v5 = vld [vmem:[#allocation10 + $0x1288] ss:$48 sps:$4 sm:$0xff]  }
 0x4ec   :  { %6948 = vmatpush1.bf16.msra.mxu0 %v10357_v6  ;;  %6785 = vmatprep.subr.bf16.mxu1 %v10362_v44  ;;  %v10434_v6 = vld [vmem:[#allocation10 + $0x12e4] ss:$48 sps:$4 sm:$0xff]   ;;  %v10437_v44 = vld [vmem:[#allocation10 + $0x12ec] ss:$48 sps:$4 sm:$0xff]  }
 0x4ed   :  { %6949 = vmatprep.subr.bf16.mxu0 %v10365_v10  ;;  %v10432_v10 = vld [vmem:[#allocation10 + $0x12e0] ss:$48 sps:$4 sm:$0xff]  }
 0x4ef   :  { %6786 = vmatpush1.bf16.msra.mxu1 %v10360_v11  ;;  %v10435_v11 = vld [vmem:[#allocation10 + $0x12e8] ss:$48 sps:$4 sm:$0xff]  }
 0x4f0   :  { %6950 = vmatpush1.bf16.msra.mxu0 %v10363_v12  ;;  %6787 = vmatprep.subr.bf16.mxu1 %v10368_v46  ;;  %v10440_v12 = vld [vmem:[#allocation10 + $0x1344] ss:$48 sps:$4 sm:$0xff]   ;;  %v10438_v46 = vld [vmem:[#allocation10 + $0x1340] ss:$48 sps:$4 sm:$0xff]  }
 0x4f1   :  { %6951 = vmatprep.subr.bf16.mxu0 %v10371_v9  ;;  %v10441_v9 = vld [vmem:[#allocation10 + $0x1348] ss:$48 sps:$4 sm:$0xff]  }
 0x4f3   :  { %6788 = vmatpush1.bf16.msra.mxu1 %v10366_v13  ;;  %v10446_v13 = vld [vmem:[#allocation13 + $0x4] ss:$8 sps:$4 sm:$0xff]  }
 0x4f4   :  { %6952 = vmatpush1.bf16.msra.mxu0 %v10369_v15  ;;  %6789 = vmatprep.subr.bf16.mxu1 %v10374_v16  ;;  %v11374_v15 = vld [vmem:[#allocation12] sm:$0xff]  ;;  %v10444_v16 = vld [vmem:[#allocation13] ss:$8 sps:$4 sm:$0xff]  }
 0x4f5   :  { %6953 = vmatprep.subr.bf16.mxu0 %v10377_v17  ;;  %v2867_v17 = vrot.slane %v11374_v15, %v11215_v2 }
 0x4f7   :  { %6790 = vmatpush1.bf16.msra.mxu1 %v10372_v18  ;;  %v2855_v18 = vrot.slane %v11374_v15, %v11203_v45 }
 0x4f8   :  { %6954 = vmatpush1.bf16.msra.mxu0 %v10375_v19  ;;  %6791 = vmatprep.subr.bf16.mxu1 %v10380_v20  ;;  %v2863_v19 = vrot.slane %v11374_v15, %v11238_v54  ;;  %v2875_v20 = vrot.slane %v11374_v15, %v860_v4 }
 0x4f9   :  { %6955 = vmatprep.subr.bf16.mxu0 %v10383_v26  ;;  %v10447_v26 = vld [vmem:[#allocation13 + $0x10] ss:$8 sps:$4 sm:$0xff]  }
 0x4fb   :  { %6792 = vmatpush1.bf16.msra.mxu1 %v10378_v21  ;;  %v10452_v21 = vld [vmem:[#allocation13 + $0x24] ss:$8 sps:$4 sm:$0xff]  }
 0x4fc   :  { %6956 = vmatpush1.bf16.msra.mxu0 %v10381_v22  ;;  %6793 = vmatprep.subr.bf16.mxu1 %v10386_v23  ;;  %v11390_v22 = vadd.f32 %v11360_v62, %v2867_v17 }
 0x4fd   :  { %6957 = vmatprep.subr.bf16.mxu0 %v10389_v3 }
 0x4ff   :  { %6794 = vmatpush1.bf16.msra.mxu1 %v10384_v52 }
 0x500   :  { %6958 = vmatpush1.bf16.msra.mxu0 %v10387_v27  ;;  %6795 = vmatprep.subr.bf16.mxu1 %v10392_v41  ;;  %v11397_v27 = vadd.f32 %v11354_v37, %v2855_v18 }
 0x501   :  { %6959 = vmatprep.subr.bf16.mxu0 %v10395_v8 }
 0x503   :  { %6796 = vmatpush1.bf16.msra.mxu1 %v10390_v29  ;;  %v10450_v29 = vld [vmem:[#allocation13 + $0x20] ss:$8 sps:$4 sm:$0xff]  }
 0x504   :  { %6960 = vmatpush1.bf16.msra.mxu0 %v10393_v30  ;;  %6797 = vmatprep.subr.bf16.mxu1 %v10398_v31  ;;  %v10455_v31 = vld [vmem:[#allocation13 + $0x34] ss:$8 sps:$4 sm:$0xff]  }
 0x505   :  { %6961 = vmatprep.subr.bf16.mxu0 %v10401_v32  ;;  %v7022_v32 = vmax.f32 %v11390_v22, 0.0 }
 0x507   :  { %6798 = vmatpush1.bf16.msra.mxu1 %v10396_v14 }
 0x508   :  { %6962 = vmatpush1.bf16.msra.mxu0 %v10399_v33  ;;  %6799 = vmatprep.subr.bf16.mxu1 %v10404_v34  ;;  %v7019_v33 = vmax.f32 %v11397_v27, 0.0  ;;  %v10498_v27 = vld [vmem:[#allocation13 + $0x120] ss:$8 sps:$4 sm:$0xff]  }
 0x509   :  { %6963 = vmatprep.subr.bf16.mxu0 %v10407_v35  ;;  %v10453_v35 = vld [vmem:[#allocation13 + $0x30] ss:$8 sps:$4 sm:$0xff]  }
 0x50b   :  { %6800 = vmatpush1.bf16.msra.mxu1 %v10402_v38  ;;  %v10458_v38 = vld [vmem:[#allocation13 + $0x44] ss:$8 sps:$4 sm:$0xff]  }
 0x50c   :  { %6964 = vmatpush1.bf16.msra.mxu0 %v10405_v39  ;;  %6801 = vmatprep.subr.bf16.mxu1 %v10410_v48  ;;  %v10456_v48 = vld [vmem:[#allocation13 + $0x40] ss:$8 sps:$4 sm:$0xff]  }
 0x50d   :  { %6965 = vmatprep.subr.bf16.mxu0 %v10413_v49  ;;  %v10461_v49 = vld [vmem:[#allocation13 + $0x54] ss:$8 sps:$4 sm:$0xff]  }
 0x50f   :  { %6802 = vmatpush1.bf16.msra.mxu1 %v10408_v50  ;;  %v10459_v50 = vld [vmem:[#allocation13 + $0x50] ss:$8 sps:$4 sm:$0xff]  }
 0x510   :  { %6966 = vmatpush1.bf16.msra.mxu0 %v10411_v51  ;;  %6803 = vmatprep.subr.bf16.mxu1 %v10416_v53  ;;  %v10464_v51 = vld [vmem:[#allocation13 + $0x64] ss:$8 sps:$4 sm:$0xff]   ;;  %v10462_v53 = vld [vmem:[#allocation13 + $0x60] ss:$8 sps:$4 sm:$0xff]  }
 0x511   :  { %6967 = vmatprep.subr.bf16.mxu0 %v10419_v55  ;;  %v10467_v55 = vld [vmem:[#allocation13 + $0x74] ss:$8 sps:$4 sm:$0xff]  }
 0x513   :  { %6804 = vmatpush1.bf16.msra.mxu1 %v10414_v25  ;;  %v10465_v25 = vld [vmem:[#allocation13 + $0x70] ss:$8 sps:$4 sm:$0xff]  }
 0x514   :  { %6968 = vmatpush1.bf16.msra.mxu0 %v10417_v56  ;;  %6814 = vmatprep.subr.bf16.mxu1 %v10422_v57  ;;  %v10470_v56 = vld [vmem:[#allocation13 + $0x84] ss:$8 sps:$4 sm:$0xff]   ;;  %v10468_v57 = vld [vmem:[#allocation13 + $0x80] ss:$8 sps:$4 sm:$0xff]  }
 0x515   :  { %6978 = vmatprep.subr.bf16.mxu0 %v10425_v58  ;;  %v10473_v58 = vld [vmem:[#allocation13 + $0x94] ss:$8 sps:$4 sm:$0xff]  }
 0x516   :  { %6806 = vmatmul.mubr.bf16.vlgmr.msra.gmra.mrb[28].mxu1 %v11321_v7 }
 0x517   :  { %6970 = vmatmul.mubr.bf16.vlgmr.msra.gmra.mrb[24].mxu0 %v11321_v7  ;;  %6815 = vmatpush1.bf16.msra.mxu1 %v10420_v60  ;;  %v10443_v7 = vld [vmem:[#allocation10 + $0x134c] ss:$48 sps:$4 sm:$0xff]  }
 0x518   :  { %6979 = vmatpush1.bf16.msra.mxu0 %v10423_v36  ;;  %6816 = vmatprep.subr.bf16.mxu1 %v10428_v63  ;;  %v10471_v60 = vld [vmem:[#allocation13 + $0x90] ss:$8 sps:$4 sm:$0xff]   ;;  %v10476_v36 = vld [vmem:[#allocation13 + $0xa4] ss:$8 sps:$4 sm:$0xff]   ;;  %v10474_v63 = vld [vmem:[#allocation13 + $0xa0] ss:$8 sps:$4 sm:$0xff]  }
 0x519   :  { %6980 = vmatprep.subr.bf16.mxu0 %v10431_v42  ;;  %6846 = vmatprep.mubr.bf16.mxu1 %v10927_v0  ;;  %v10479_v42 = vld [vmem:[#allocation13 + $0xb4] ss:$8 sps:$4 sm:$0xff]  }
 0x51a   :  { %7010 = vmatprep.mubr.bf16.mxu0 %v10927_v0  ;;  %v10449_v0 = vld [vmem:[#allocation13 + $0x14] ss:$8 sps:$4 sm:$0xff]  }
 0x51b   :  { %6817 = vmatpush1.bf16.msra.mxu1 %v10426_v1  ;;  %v10477_v1 = vld [vmem:[#allocation13 + $0xb0] ss:$8 sps:$4 sm:$0xff]  }
 0x51c   :  { %6981 = vmatpush1.bf16.msra.mxu0 %v10429_v5  ;;  %6818 = vmatprep.subr.bf16.mxu1 %v10434_v6  ;;  %v10482_v5 = vld [vmem:[#allocation13 + $0xc4] ss:$8 sps:$4 sm:$0xff]   ;;  %v10480_v6 = vld [vmem:[#allocation13 + $0xc0] ss:$8 sps:$4 sm:$0xff]  }
 0x51d   :  { %6982 = vmatprep.subr.bf16.mxu0 %v10437_v44  ;;  %v10485_v44 = vld [vmem:[#allocation13 + $0xd4] ss:$8 sps:$4 sm:$0xff]  }
 0x51f   :  { %6819 = vmatpush1.bf16.msra.mxu1 %v10432_v10  ;;  %v10483_v10 = vld [vmem:[#allocation13 + $0xd0] ss:$8 sps:$4 sm:$0xff]  }
 0x520   :  { %6983 = vmatpush1.bf16.msra.mxu0 %v10435_v11  ;;  %6820 = vmatprep.subr.bf16.mxu1 %v10440_v12  ;;  %v10488_v11 = vld [vmem:[#allocation13 + $0xe4] ss:$8 sps:$4 sm:$0xff]   ;;  %v10486_v12 = vld [vmem:[#allocation13 + $0xe0] ss:$8 sps:$4 sm:$0xff]  }
 0x521   :  { %6984 = vmatprep.subr.bf16.mxu0 %v10443_v7  ;;  %v10491_v7 = vld [vmem:[#allocation13 + $0xf4] ss:$8 sps:$4 sm:$0xff]  }
 0x523   :  { %6821 = vmatpush1.bf16.msra.mxu1 %v10438_v46  ;;  %v10489_v46 = vld [vmem:[#allocation13 + $0xf0] ss:$8 sps:$4 sm:$0xff]  }
 0x524   :  { %6985 = vmatpush1.bf16.msra.mxu0 %v10441_v9  ;;  %7483 = vmatprep.subr.bf16.mxu1 %v10446_v13  ;;  %v10494_v9 = vld [vmem:[#allocation13 + $0x104] ss:$8 sps:$4 sm:$0xff]   ;;  %v2871_v13 = vrot.slane %v11374_v15, %v856_v40 }
 0x526   :  { %8869 = vmatmul.mubr.msk.bf16.vlgmr.msra.gmra.mrb[28].mxu1 %vm310_vm0, %v11328_v24 }
 0x527   :  { %8870 = vmatmul.mubr.msk.bf16.vlgmr.msra.gmra.mrb[24].mxu0 %vm310_vm0, %v11328_v24  ;;  %7484 = vmatpush1.bf16.msra.mxu1 %v10444_v16  ;;  %v11400_v24 = vadd.f32 %v11356_v59, %v2863_v19  ;;  %v2859_v16 = vrot.slane %v11374_v15, %v11208_v47 }
 0x528   :  { %7485 = vmatprep.subr.bf16.mxu1 %v10449_v0 }
 0x529   :  { %v11392_v23 = vpop.f32.mrb[24].mxu1  ;;  %v7021_v59 = vmax.f32 %v11400_v24, 0.0  ;;  %v9035_v17 = vadd.f32 %v11358_v61, %v2859_v16  ;;  %v10506_v24 = vld [vmem:[#allocation13 + $0x144] ss:$8 sps:$4 sm:$0xff]  }
 0x52a   :  { %v11394_v3 = vpop.f32.mrb[20].mxu0  ;;  %v6522_v52 = vpop.f32.mrb[25].mxu1  ;;  %v9038_v0 = vadd.f32 %v11392_v23, %v2871_v13  ;;  %v10536_v16 = vld [vmem:[#allocation13 + $0x1e4] ss:$8 sps:$4 sm:$0xff]  }
 0x52b   :  { %v11402_v41 = vadd.f32 %v6522_v52, %v2875_v20  ;;  %v11404_v4 = vpop.f32.mrb[21].mxu0  ;;  %v6524_v8 = vpop.f32.mrb[26].mxu1  ;;  %7486 = vmatpush1.bf16.msra.mxu1 %v10447_v26  ;;  %v9165_v39 = vpack.i.bf16 %v7021_v59, %v7019_v33 }
 0x52c   :  { %v6688_v62 = vpop.f32.mrb[22].mxu0  ;;  %v6525_v30 = vpop.f32.mrb[27].mxu1  ;;  %7487 = vmatprep.subr.bf16.mxu1 %v10452_v21  ;;  %v7023_v19 = vmax.f32 %v9038_v0, 0.0  ;;  %v7020_v8 = vmax.f32 %v9035_v17, 0.0  ;;  %v2879_v0 = vrot.slane %v11374_v15, %v864_v28  ;;  %v10537_v28 = vld [vmem:[#allocation13 + $0x1f0] ss:$8 sps:$4 sm:$0xff]  }
 0x52d   :  { %v7024_v14 = vmax.f32 %v11402_v41, 0.0  ;;  %v6689_v37 = vpop.f32.mrb[23].mxu0  ;;  %v10497_v41 = vld [vmem:[#allocation13 + $0x114] ss:$8 sps:$4 sm:$0xff]  }
 0x52f   :  { %v9160_v34 = vpack.i.bf16 %v7024_v14, %v7022_v32  ;;  %7488 = vmatpush1.bf16.msra.mxu1 %v10450_v29 }
 0x530   :  { %7489 = vmatprep.subr.bf16.mxu1 %v10455_v31 }
 0x531   :  { %9161 = vrot.lane.b32.xlu0 %v9160_v34, %s10918_s10 }
 0x533   :  { %7490 = vmatpush1.bf16.msra.mxu1 %v10453_v35 }
 0x534   :  { %7491 = vmatprep.subr.bf16.mxu1 %v10458_v38  ;;  %v10492_v38 = vld [vmem:[#allocation13 + $0x100] ss:$8 sps:$4 sm:$0xff]  }
 0x535   :  { %9166 = vrot.lane.b32.xlu0 %v9165_v39, %s10918_s10 }
 0x537   :  { %7492 = vmatpush1.bf16.msra.mxu1 %v10456_v48  ;;  %v10500_v48 = vld [vmem:[#allocation13 + $0x124] ss:$8 sps:$4 sm:$0xff]  }
 0x538   :  { %7493 = vmatprep.subr.bf16.mxu1 %v10461_v49  ;;  %v10501_v49 = vld [vmem:[#allocation13 + $0x130] ss:$8 sps:$4 sm:$0xff]  }
 0x53b   :  { %7494 = vmatpush1.bf16.msra.mxu1 %v10459_v50  ;;  %v10509_v50 = vld [vmem:[#allocation13 + $0x154] ss:$8 sps:$4 sm:$0xff]  }
 0x53c   :  { %7495 = vmatprep.subr.bf16.mxu1 %v10464_v51  ;;  %v10507_v51 = vld [vmem:[#allocation13 + $0x150] ss:$8 sps:$4 sm:$0xff]  }
 0x53f   :  { %7496 = vmatpush1.bf16.msra.mxu1 %v10462_v53  ;;  %v10512_v53 = vld [vmem:[#allocation13 + $0x164] ss:$8 sps:$4 sm:$0xff]  }
 0x540   :  { %7497 = vmatprep.subr.bf16.mxu1 %v10467_v55  ;;  %v10510_v55 = vld [vmem:[#allocation13 + $0x160] ss:$8 sps:$4 sm:$0xff]  }
 0x543   :  { %7498 = vmatpush1.bf16.msra.mxu1 %v10465_v25  ;;  %v10515_v25 = vld [vmem:[#allocation13 + $0x174] ss:$8 sps:$4 sm:$0xff]  }
 0x544   :  { %7499 = vmatprep.subr.bf16.mxu1 %v10470_v56  ;;  %v10513_v56 = vld [vmem:[#allocation13 + $0x170] ss:$8 sps:$4 sm:$0xff]  }
 0x547   :  { %7500 = vmatpush1.bf16.msra.mxu1 %v10468_v57  ;;  %v10518_v57 = vld [vmem:[#allocation13 + $0x184] ss:$8 sps:$4 sm:$0xff]  }
 0x548   :  { %7501 = vmatprep.subr.bf16.mxu1 %v10473_v58  ;;  %v10516_v58 = vld [vmem:[#allocation13 + $0x180] ss:$8 sps:$4 sm:$0xff]  }
 0x54b   :  { %7502 = vmatpush1.bf16.msra.mxu1 %v10471_v60  ;;  %v10521_v60 = vld [vmem:[#allocation13 + $0x194] ss:$8 sps:$4 sm:$0xff]  }
 0x54c   :  { %7503 = vmatprep.subr.bf16.mxu1 %v10476_v36  ;;  %v10519_v36 = vld [vmem:[#allocation13 + $0x190] ss:$8 sps:$4 sm:$0xff]  }
 0x54f   :  { %7504 = vmatpush1.bf16.msra.mxu1 %v10474_v63  ;;  %v10524_v63 = vld [vmem:[#allocation13 + $0x1a4] ss:$8 sps:$4 sm:$0xff]  }
 0x550   :  { %7505 = vmatprep.subr.bf16.mxu1 %v10479_v42  ;;  %v10522_v42 = vld [vmem:[#allocation13 + $0x1a0] ss:$8 sps:$4 sm:$0xff]  }
 0x553   :  { %7506 = vmatpush1.bf16.msra.mxu1 %v10477_v1  ;;  %v10527_v1 = vld [vmem:[#allocation13 + $0x1b4] ss:$8 sps:$4 sm:$0xff]  }
 0x554   :  { %7507 = vmatprep.subr.bf16.mxu1 %v10482_v5  ;;  %v10525_v5 = vld [vmem:[#allocation13 + $0x1b0] ss:$8 sps:$4 sm:$0xff]  }
 0x557   :  { %7508 = vmatpush1.bf16.msra.mxu1 %v10480_v6  ;;  %v10530_v6 = vld [vmem:[#allocation13 + $0x1c4] ss:$8 sps:$4 sm:$0xff]  }
 0x558   :  { %7509 = vmatprep.subr.bf16.mxu1 %v10485_v44  ;;  %v10528_v44 = vld [vmem:[#allocation13 + $0x1c0] ss:$8 sps:$4 sm:$0xff]  }
 0x55b   :  { %7510 = vmatpush1.bf16.msra.mxu1 %v10483_v10  ;;  %v11437_v10 = vld [vmem:[#allocation12 + $0x8] sm:$0xf] }
 0x55c   :  { %7511 = vmatprep.subr.bf16.mxu1 %v10488_v11  ;;  %v10533_v11 = vld [vmem:[#allocation13 + $0x1d4] ss:$8 sps:$4 sm:$0xff]  }
 0x55f   :  { %7512 = vmatpush1.bf16.msra.mxu1 %v10486_v12  ;;  %v10531_v12 = vld [vmem:[#allocation13 + $0x1d0] ss:$8 sps:$4 sm:$0xff]  }
 0x560   :  { %7513 = vmatprep.subr.bf16.mxu1 %v10491_v7  ;;  %v2891_v7 = vrot.slane %v11437_v10, %v11208_v47 }
 0x563   :  { %7514 = vmatpush1.bf16.msra.mxu1 %v10489_v46  ;;  %v2887_v46 = vrot.slane %v11437_v10, %v11203_v45 }
 0x564   :  { %7524 = vmatprep.subr.bf16.mxu1 %v10494_v9  ;;  %v2899_v9 = vrot.slane %v11437_v10, %v11215_v2 }
 0x5a3   :  { %v9162_v18 = vpop.permute.xlu0 %9161 }
 0x5a4   :  { %v9164_v20 = vunpack.i.h.bf16 %v9162_v18  ;;  %v9163_v26 = vunpack.i.l.bf16 %v9162_v18 }
 0x5a6   :  { %v7047_v21 = vmax.f32 %v7022_v32, %v9163_v26  ;;  %v7053_v52 = vmax.f32 %v7023_v19, %v9164_v20 }
 0x5a7   :  { %v9167_v29 = vpop.permute.xlu0 %9166 }
 0x5a8   :  { %v7048_v62 = vmax.f32 %v7047_v21, %v7023_v19  ;;  %v7054_v40 = vmax.f32 %v7053_v52, %v7024_v14  ;;  %v9169_v30 = vunpack.i.h.bf16 %v9167_v29  ;;  %v9168_v31 = vunpack.i.l.bf16 %v9167_v29  ;;  %v10495_v14 = vld [vmem:[#allocation13 + $0x110] ss:$8 sps:$4 sm:$0xff]   ;;  %v10534_v19 = vld [vmem:[#allocation13 + $0x1e0] ss:$8 sps:$4 sm:$0xff]  }
 0x5aa   :  { %v7041_v37 = vmax.f32 %v7020_v8, %v9169_v30  ;;  %v7035_v61 = vmax.f32 %v7019_v33, %v9168_v31  ;;  %v7080_v23 = vsel %vm310_vm0, %v7048_v62, %v7054_v40  ;;  %v10503_v33 = vld [vmem:[#allocation13 + $0x134] ss:$8 sps:$4 sm:$0xff]   ;;  %v11458_v30 = vadd.f32 %v11394_v3, %v2879_v0 }
 0x5ab   :  { %v7084_v34 = vpack.c.bf16 %v7080_v23, %v7080_v23  ;;  %v10545_v3 = vld [vmem:[#allocation16 + $0x14] ss:$8 sps:$4 sm:$0xff]  }
 0x5ac   :  { %v7042_v22 = vmax.f32 %v7041_v37, %v7021_v59  ;;  %v7036_v32 = vmax.f32 %v7035_v61, %v7020_v8  ;;  %v10504_v59 = vld [vmem:[#allocation13 + $0x140] ss:$8 sps:$4 sm:$0xff]   ;;  %v10539_v37 = vld [vmem:[#allocation13 + $0x1f4] ss:$8 sps:$4 sm:$0xff]  }
 0x5ad   :  { %7515 = vmatprep.mubr.bf16.mxu1 %v7084_v34  ;;  %v7025_v34 = vmax.f32 %v11458_v30, 0.0  ;;  %v10588_v30 = vld [vmem:[#allocation19 + $0x40] sm:$0xff]  }
 0x5ae   :  { %v7079_v35 = vsel %vm310_vm0, %v7036_v32, %v7042_v22  ;;  %v10540_v22 = vld [vmem:[#allocation16] ss:$8 sps:$4 sm:$0xff]   ;;  %v10542_v32 = vld [vmem:[#allocation16 + $0x4] ss:$8 sps:$4 sm:$0xff]  }
 0x5af   :  { %v7083_v39 = vpack.c.bf16 %v7079_v35, %v7079_v35  ;;  %7773 = vmatprep.subr.bf16.mxu0 %v10542_v32 }
 0x5b0   :  { %7774 = vmatpush1.bf16.msra.mxu0 %v10540_v22 }
 0x5b1   :  { %7516 = vmatmul.mubr.bf16.vlgmr.msra.gmra.mrb[32].mxu1 %v7083_v39  ;;  %7775 = vmatprep.subr.bf16.mxu0 %v10545_v3  ;;  %v10548_v39 = vld [vmem:[#allocation16 + $0x24] ss:$8 sps:$4 sm:$0xff]  }
 0x5b2   :  { %7525 = vmatpush1.bf16.msra.mxu1 %v10492_v38  ;;  %v10543_v38 = vld [vmem:[#allocation16 + $0x10] ss:$8 sps:$4 sm:$0xff]  }
 0x5b3   :  { %7526 = vmatprep.subr.bf16.mxu1 %v10497_v41  ;;  %v10546_v41 = vld [vmem:[#allocation16 + $0x20] ss:$8 sps:$4 sm:$0xff]  }
 0x5b4   :  { %7776 = vmatpush1.bf16.msra.mxu0 %v10543_v38 }
 0x5b5   :  { %7777 = vmatprep.subr.bf16.mxu0 %v10548_v39 }
 0x5b6   :  { %7527 = vmatpush1.bf16.msra.mxu1 %v10495_v14  ;;  %v10551_v14 = vld [vmem:[#allocation16 + $0x34] ss:$8 sps:$4 sm:$0xff]  }
 0x5b7   :  { %7528 = vmatprep.subr.bf16.mxu1 %v10500_v48  ;;  %v10549_v48 = vld [vmem:[#allocation16 + $0x30] ss:$8 sps:$4 sm:$0xff]  }
 0x5b8   :  { %7778 = vmatpush1.bf16.msra.mxu0 %v10546_v41 }
 0x5b9   :  { %7779 = vmatprep.subr.bf16.mxu0 %v10551_v14 }
 0x5ba   :  { %7529 = vmatpush1.bf16.msra.mxu1 %v10498_v27  ;;  %v10554_v27 = vld [vmem:[#allocation16 + $0x44] ss:$8 sps:$4 sm:$0xff]  }
 0x5bb   :  { %7530 = vmatprep.subr.bf16.mxu1 %v10503_v33  ;;  %v10552_v33 = vld [vmem:[#allocation16 + $0x40] ss:$8 sps:$4 sm:$0xff]  }
 0x5bc   :  { %7780 = vmatpush1.bf16.msra.mxu0 %v10549_v48 }
 0x5bd   :  { %7781 = vmatprep.subr.bf16.mxu0 %v10554_v27  ;;  %v10589_v27 = vld [vmem:[#allocation19] sm:$0xff]  }
 0x5be   :  { %7531 = vmatpush1.bf16.msra.mxu1 %v10501_v49  ;;  %v10557_v49 = vld [vmem:[#allocation16 + $0x54] ss:$8 sps:$4 sm:$0xff]  }
 0x5bf   :  { %7532 = vmatprep.subr.bf16.mxu1 %v10506_v24  ;;  %v10555_v24 = vld [vmem:[#allocation16 + $0x50] ss:$8 sps:$4 sm:$0xff]  }
 0x5c0   :  { %7782 = vmatpush1.bf16.msra.mxu0 %v10552_v33 }
 0x5c1   :  { %7783 = vmatprep.subr.bf16.mxu0 %v10557_v49  ;;  %v10590_v49 = vld [vmem:[#allocation19 + $0x48] sm:$0xff]  }
 0x5c2   :  { %7533 = vmatpush1.bf16.msra.mxu1 %v10504_v59  ;;  %v10560_v59 = vld [vmem:[#allocation16 + $0x64] ss:$8 sps:$4 sm:$0xff]  }
 0x5c3   :  { %7534 = vmatprep.subr.bf16.mxu1 %v10509_v50  ;;  %v10558_v50 = vld [vmem:[#allocation16 + $0x60] ss:$8 sps:$4 sm:$0xff]  }
 0x5c4   :  { %7784 = vmatpush1.bf16.msra.mxu0 %v10555_v24  ;;  %v10591_v24 = vld [vmem:[#allocation19 + $0x8] sm:$0xff]  }
 0x5c5   :  { %7785 = vmatprep.subr.bf16.mxu0 %v10560_v59  ;;  %v10592_v59 = vld [vmem:[#allocation19 + $0x50] sm:$0xff]  }
 0x5c6   :  { %7535 = vmatpush1.bf16.msra.mxu1 %v10507_v51  ;;  %v10563_v51 = vld [vmem:[#allocation16 + $0x74] ss:$8 sps:$4 sm:$0xff]  }
 0x5c7   :  { %7536 = vmatprep.subr.bf16.mxu1 %v10512_v53  ;;  %v10561_v53 = vld [vmem:[#allocation16 + $0x70] ss:$8 sps:$4 sm:$0xff]  }
 0x5c8   :  { %7786 = vmatpush1.bf16.msra.mxu0 %v10558_v50  ;;  %v10593_v50 = vld [vmem:[#allocation19 + $0x10] sm:$0xff]  }
 0x5c9   :  { %7787 = vmatprep.subr.bf16.mxu0 %v10563_v51  ;;  %v10594_v51 = vld [vmem:[#allocation19 + $0x58] sm:$0xff]  }
 0x5ca   :  { %7537 = vmatpush1.bf16.msra.mxu1 %v10510_v55  ;;  %v10566_v55 = vld [vmem:[#allocation16 + $0x84] ss:$8 sps:$4 sm:$0xff]  }
 0x5cb   :  { %7538 = vmatprep.subr.bf16.mxu1 %v10515_v25  ;;  %v10564_v25 = vld [vmem:[#allocation16 + $0x80] ss:$8 sps:$4 sm:$0xff]  }
 0x5cc   :  { %7788 = vmatpush1.bf16.msra.mxu0 %v10561_v53  ;;  %v10595_v53 = vld [vmem:[#allocation19 + $0x18] sm:$0xff]  }
 0x5cd   :  { %7789 = vmatprep.subr.bf16.mxu0 %v10566_v55  ;;  %v10596_v55 = vld [vmem:[#allocation19 + $0x60] sm:$0xff]  }
 0x5ce   :  { %7539 = vmatpush1.bf16.msra.mxu1 %v10513_v56  ;;  %v10569_v56 = vld [vmem:[#allocation16 + $0x94] ss:$8 sps:$4 sm:$0xff]  }
 0x5cf   :  { %7540 = vmatprep.subr.bf16.mxu1 %v10518_v57  ;;  %v10567_v57 = vld [vmem:[#allocation16 + $0x90] ss:$8 sps:$4 sm:$0xff]  }
 0x5d0   :  { %7790 = vmatpush1.bf16.msra.mxu0 %v10564_v25  ;;  %v10597_v25 = vld [vmem:[#allocation19 + $0x20] sm:$0xff]  }
 0x5d1   :  { %7791 = vmatprep.subr.bf16.mxu0 %v10569_v56  ;;  %v10598_v56 = vld [vmem:[#allocation19 + $0x68] sm:$0xff]  }
 0x5d2   :  { %7541 = vmatpush1.bf16.msra.mxu1 %v10516_v58  ;;  %v10572_v58 = vld [vmem:[#allocation16 + $0xa4] ss:$8 sps:$4 sm:$0xff]  }
 0x5d3   :  { %7542 = vmatprep.subr.bf16.mxu1 %v10521_v60  ;;  %v10570_v60 = vld [vmem:[#allocation16 + $0xa0] ss:$8 sps:$4 sm:$0xff]  }
 0x5d4   :  { %7792 = vmatpush1.bf16.msra.mxu0 %v10567_v57  ;;  %v10599_v57 = vld [vmem:[#allocation19 + $0x28] sm:$0xff]  }
 0x5d5   :  { %7793 = vmatprep.subr.bf16.mxu0 %v10572_v58  ;;  %v10600_v58 = vld [vmem:[#allocation19 + $0x70] sm:$0xff]  }
 0x5d6   :  { %7543 = vmatpush1.bf16.msra.mxu1 %v10519_v36  ;;  %v10575_v36 = vld [vmem:[#allocation16 + $0xb4] ss:$8 sps:$4 sm:$0xff]  }
 0x5d7   :  { %7544 = vmatprep.subr.bf16.mxu1 %v10524_v63  ;;  %v10573_v63 = vld [vmem:[#allocation16 + $0xb0] ss:$8 sps:$4 sm:$0xff]  }
 0x5d8   :  { %7794 = vmatpush1.bf16.msra.mxu0 %v10570_v60  ;;  %v10601_v60 = vld [vmem:[#allocation19 + $0x30] sm:$0xff]  }
 0x5d9   :  { %7795 = vmatprep.subr.bf16.mxu0 %v10575_v36  ;;  %v10602_v36 = vld [vmem:[#allocation19 + $0x78] sm:$0xff]  }
 0x5da   :  { %7545 = vmatpush1.bf16.msra.mxu1 %v10522_v42  ;;  %v10578_v42 = vld [vmem:[#allocation16 + $0xc4] ss:$8 sps:$4 sm:$0xff]  }
 0x5db   :  { %7546 = vmatprep.subr.bf16.mxu1 %v10527_v1  ;;  %v10576_v1 = vld [vmem:[#allocation16 + $0xc0] ss:$8 sps:$4 sm:$0xff]  }
 0x5dc   :  { %7796 = vmatpush1.bf16.msra.mxu0 %v10573_v63  ;;  %v10603_v63 = vld [vmem:[#allocation19 + $0x38] sm:$0xff]  }
 0x5dd   :  { %7797 = vmatprep.subr.bf16.mxu0 %v10578_v42  ;;  %v7601_v42 = vld [vmem:[#allocation18] sm:$0x3] }
 0x5de   :  { %7547 = vmatpush1.bf16.msra.mxu1 %v10525_v5  ;;  %v10581_v5 = vld [vmem:[#allocation16 + $0xd4] ss:$8 sps:$4 sm:$0xff]  }
 0x5df   :  { %7548 = vmatprep.subr.bf16.mxu1 %v10530_v6  ;;  %v10579_v6 = vld [vmem:[#allocation16 + $0xd0] ss:$8 sps:$4 sm:$0xff]  }
 0x5e0   :  { %7798 = vmatpush1.bf16.msra.mxu0 %v10576_v1  ;;  %v7606_v1 = vrot.slane %v7601_v42, %v11203_v45 }
 0x5e1   :  { %7799 = vmatprep.subr.bf16.mxu0 %v10581_v5  ;;  %v7610_v5 = vrot.slane %v7601_v42, %v11208_v47 }
 0x5e2   :  { %7549 = vmatpush1.bf16.msra.mxu1 %v10528_v44  ;;  %v2882_v44 = vsub.s32 7, %v11198_v43 }
 0x5e3   :  { %7550 = vmatprep.subr.bf16.mxu1 %v10533_v11  ;;  %v2895_v11 = vrot.slane %v11437_v10, %v11238_v54 }
 0x5e4   :  { %7800 = vmatpush1.bf16.msra.mxu0 %v10579_v6 }
 0x5e6   :  { %7551 = vmatpush1.bf16.msra.mxu1 %v10531_v12  ;;  %v2883_v12 = vrot.slane %v11374_v15, %v2882_v44 }
 0x5e7   :  { %7552 = vmatprep.subr.bf16.mxu1 %v10536_v16 }
 0x5ea   :  { %7553 = vmatpush1.bf16.msra.mxu1 %v10534_v19 }
 0x5eb   :  { %7554 = vmatprep.subr.bf16.mxu1 %v10539_v37  ;;  %v10587_v37 = vld [vmem:[#allocation16 + $0xf4] ss:$8 sps:$4 sm:$0xff]  }
 0x5ee   :  { %7555 = vmatpush1.bf16.msra.mxu1 %v10537_v28 }
 0x5f9   :  { %v6848_v13 = vpop.f32.mrb[28].mxu1 }
 0x5fa   :  { %v11448_v17 = vpop.f32.mrb[24].mxu0  ;;  %v6850_v18 = vpop.f32.mrb[29].mxu1  ;;  %v11452_v52 = vadd.f32 %v6848_v13, %v2887_v46  ;;  %v9041_v46 = vadd.f32 %v11404_v4, %v2883_v12 }
 0x5fb   :  { %v11450_v20 = vadd.f32 %v6850_v18, %v2891_v7  ;;  %v7014_v26 = vpop.f32.mrb[25].mxu0  ;;  %v6852_v21 = vpop.f32.mrb[30].mxu1  ;;  %v9044_v7 = vadd.f32 %v11448_v17, %v2895_v11 }
 0x5fc   :  { %v11454_v8 = vadd.f32 %v7014_v26, %v2899_v9  ;;  %v7016_v2 = vpop.f32.mrb[26].mxu0  ;;  %v6853_v29 = vpop.f32.mrb[31].mxu1  ;;  %v7027_v61 = vmax.f32 %v11452_v52, 0.0  ;;  %v7026_v26 = vmax.f32 %v9041_v46, 0.0 }
 0x5fd   :  { %v7028_v62 = vmax.f32 %v11450_v20, 0.0  ;;  %v7017_v40 = vpop.f32.mrb[27].mxu0  ;;  %v7029_v13 = vmax.f32 %v9044_v7, 0.0 }
 0x5fe   :  { %v7030_v31 = vmax.f32 %v11454_v8, 0.0  ;;  %v9175_v35 = vpack.i.bf16 %v7027_v61, %v7025_v34  ;;  %v10584_v8 = vld [vmem:[#allocation16 + $0xe4] ss:$8 sps:$4 sm:$0xff]  }
 0x5ff   :  { %7801 = vmatprep.subr.bf16.mxu0 %v10584_v8 }
 0x600   :  { %v9170_v23 = vpack.i.bf16 %v7030_v31, %v7028_v62 }
 0x602   :  { %9171 = vrot.lane.b32.xlu1 %v9170_v23, %s10918_s10  ;;  %v10585_v23 = vld [vmem:[#allocation16 + $0xf0] ss:$8 sps:$4 sm:$0xff]  }
 0x606   :  { %9176 = vrot.lane.b32.xlu1 %v9175_v35, %s10918_s10 }
 0x674   :  { %v9172_v9 = vpop.permute.xlu1 %9171 }
 0x675   :  { %v9174_v16 = vunpack.i.h.bf16 %v9172_v9  ;;  %v9173_v0 = vunpack.i.l.bf16 %v9172_v9 }
 0x677   :  { %v7077_v18 = vmax.f32 %v7029_v13, %v9174_v16  ;;  %v7071_v19 = vmax.f32 %v7028_v62, %v9173_v0 }
 0x678   :  { %v9177_v21 = vpop.permute.xlu1 %9176 }
 0x679   :  { %v7078_v43 = vmax.f32 %v7077_v18, %v7030_v31  ;;  %v7072_v54 = vmax.f32 %v7071_v19, %v7029_v13  ;;  %v9179_v10 = vunpack.i.h.bf16 %v9177_v21  ;;  %v9178_v15 = vunpack.i.l.bf16 %v9177_v21  ;;  %v10582_v31 = vld [vmem:[#allocation16 + $0xe0] ss:$8 sps:$4 sm:$0xff]  }
 0x67a   :  { %7802 = vmatpush1.bf16.msra.mxu0 %v10582_v31  ;;  %v8967_v19 = vld [vmem:[#allocation21] ss:$0 sm:$0xff] }
 0x67b   :  { %v7065_v2 = vmax.f32 %v7026_v26, %v9179_v10  ;;  %v7059_v4 = vmax.f32 %v7025_v34, %v9178_v15  ;;  %v7082_v17 = vsel %vm310_vm0, %v7072_v54, %v7078_v43  ;;  %7803 = vmatprep.subr.bf16.mxu0 %v10587_v37  ;;  %v7151_v34 = vld [vmem:[#allocation15] sm:$0x3] }
 0x67c   :  { %v7086_v29 = vpack.c.bf16 %v7082_v17, %v7082_v17  ;;  %v7156_v52 = vrot.slane %v7151_v34, %v11203_v45 }
 0x67d   :  { %v7066_v40 = vmax.f32 %v7065_v2, %v7027_v61  ;;  %v7060_v20 = vmax.f32 %v7059_v4, %v7026_v26  ;;  %v7160_v61 = vrot.slane %v7151_v34, %v11208_v47 }
 0x67e   :  { %7556 = vmatprep.mubr.bf16.mxu1 %v7086_v29  ;;  %7804 = vmatpush1.bf16.msra.mxu0 %v10585_v23 }
 0x67f   :  { %v7081_v62 = vsel %vm310_vm0, %v7060_v20, %v7066_v40  ;;  %9006 = vmatprep.subr.bf16.mxu0 %v10588_v30 }
 0x680   :  { %v7085_v28 = vpack.c.bf16 %v7081_v62, %v7081_v62 }
 0x682   :  { %7557 = vmatmul.mubr.bf16.vlgmr.msra.gmra.mrb[32].mxu1 %v7085_v28 }
 0x755   :  { %v7558_v22 = vpop.f32.mrb[32].mxu1 }
 0x756   :  { %v9046_v32 = vadd.f32 %v7558_v22, %v7156_v52  ;;  %v7560_v3 = vpop.f32.mrb[33].mxu1 }
 0x757   :  { %v9047_v35 = vadd.f32 %v7560_v3, %v7160_v61  ;;  %v7562_v38 = vpop.f32.mrb[34].mxu1 }
 0x758   :  { %v7565_v39 = vmax.f32 %v9046_v32, 0.0  ;;  %v7563_v41 = vpop.f32.mrb[35].mxu1 }
 0x759   :  { %v7566_v14 = vmax.f32 %v9047_v35, 0.0 }
 0x75a   :  { %v7567_v33 = vpack.c.bf16 %v7565_v39, %v7565_v39 }
 0x75b   :  { %v7568_v48 = vpack.c.bf16 %v7566_v14, %v7566_v14 }
 0x75d   :  { %7805 = vmatprep.mubr.bf16.mxu0 %v7568_v48 }
 0x75e   :  { %7806 = vmatmul.mubr.bf16.vlgmr.msra.gmra.mrb[28].mxu0 %v7567_v33 }
 0x75f   :  { %9007 = vmatpush3.bf16.msra.mxu0 %v10589_v27 }
 0x760   :  { %9008 = vmatprep.subr.bf16.mxu0 %v10590_v49 }
 0x763   :  { %9009 = vmatpush3.bf16.msra.mxu0 %v10591_v24 }
 0x764   :  { %9010 = vmatprep.subr.bf16.mxu0 %v10592_v59 }
 0x767   :  { %9011 = vmatpush3.bf16.msra.mxu0 %v10593_v50 }
 0x768   :  { %9012 = vmatprep.subr.bf16.mxu0 %v10594_v51 }
 0x76b   :  { %9013 = vmatpush3.bf16.msra.mxu0 %v10595_v53 }
 0x76c   :  { %9014 = vmatprep.subr.bf16.mxu0 %v10596_v55 }
 0x76f   :  { %9015 = vmatpush3.bf16.msra.mxu0 %v10597_v25 }
 0x770   :  { %9016 = vmatprep.subr.bf16.mxu0 %v10598_v56 }
 0x773   :  { %9017 = vmatpush3.bf16.msra.mxu0 %v10599_v57 }
 0x774   :  { %9018 = vmatprep.subr.bf16.mxu0 %v10600_v58 }
 0x777   :  { %9019 = vmatpush3.bf16.msra.mxu0 %v10601_v60 }
 0x778   :  { %9020 = vmatprep.subr.bf16.mxu0 %v10602_v36 }
 0x77b   :  { %9021 = vmatpush3.bf16.msra.mxu0 %v10603_v63 }
 0x831   :  { %v7807_v6 = vpop.f32.mrb[28].mxu0 }
 0x832   :  { %v7808_v44 = vadd.f32 %v7807_v6, %v7606_v1  ;;  %v7809_v11 = vpop.f32.mrb[29].mxu0 }
 0x833   :  { %v7810_v12 = vadd.f32 %v7809_v11, %v7610_v5  ;;  %v7811_v7 = vpop.f32.mrb[30].mxu0 }
 0x834   :  { %v7814_v46 = vmax.f32 %v7808_v44, 0.0  ;;  %v7812_v9 = vpop.f32.mrb[31].mxu0 }
 0x835   :  { %v7815_v13 = vmax.f32 %v7810_v12, 0.0 }
 0x836   :  { %v7816_v0 = vpack.c.bf16 %v7814_v46, %v7814_v46 }
 0x837   :  { %v7817_v16 = vpack.c.bf16 %v7815_v13, %v7815_v13 }
 0x839   :  { %7985 = vmatprep.mubr.bf16.mxu0 %v7817_v16 }
 0x83a   :  { %7986 = vmatmul.mubr.bf16.vlgmr.msra.gmra.mrb[32].mxu0 %v7816_v0 }
 0x90d   :  { %v9022_v18 = vpop.f32.mrb[32].mxu0 }
 0x90e   :  { %v9023_v26 = vpop.f32.mrb[33].mxu0 }
 0x90f   :  { %v9024_v21 = vadd.f32 %v9023_v26, %v9022_v18  ;;  %v9025_v43 = vpop.f32.mrb[34].mxu0 }
 0x910   :  { %v9026_v45 = vpop.f32.mrb[35].mxu0 }
 0x911   :  { %v7988_v54 = vadd.f32 %v9024_v21, %v8967_v19 }
 0x913   :  { %7993 = vst [vmem:[%s11510_s14] sm:$0xff] %v7988_v54 }
 0x914   :  { %7998 = vsyncpa [#allocation3], 1 }
 0x915   :  { %7999 = vsyncpa [#allocation5], 1 }
 0x916   :  { %8000 = vsyncpa [#allocation8], 1 }
 0x917   :  { %8001 = vsyncpa [#allocation11], 1 }
 0x918   :  { %8002 = vsyncpa [#allocation14], 1 }
 0x919   :  { %8003 = vsyncpa [#allocation17], 1 }
 0x91a   :  { %8004 = vsyncpa [#allocation20], 1 }

</bundles_post_ra>
